<compile_context>
chip_gen: v7x
topology: tpu7x:2x2x1
jax: 0.10.0
libtpu: 0.0.40
codegen_flags: <defaults>
</compile_context>

<pallas_src>
import functools

import jax
import jax.numpy as jnp
from jax import lax
from jax.experimental import pallas as pl
from jax.experimental.pallas import tpu as pltpu


def _softplus(x):
    # numerically stable; matches torch.nn.Softplus(beta=1, threshold=20)
    return jnp.maximum(x, 0.0) + jnp.log1p(jnp.exp(-jnp.abs(x)))


def _megnet_block_kernel(
    # streamed per-edge-tile inputs
    src_ref, dst_ref, invdeg_ref, e_ref,
    # resident inputs
    v_ref, u_ref,
    pe_w, pe_b, pv_w, pv_b, pu_w, pu_b,
    ce_w1, ce_b1, ce_w2, ce_b2,
    cv_w1, cv_b1, cv_w2, cv_b2,
    cu_w1, cu_b1, cu_w2, cu_b2,
    # outputs
    e_out, v_out, u_out,
    # VMEM scratch (persists across grid steps)
    a_s, b_s, he0_s, hv0_s, hu0_s, ve_acc, ue_acc,
    pe_w_s, we1e_s, ce_w2_s,
    *, num_edges,
):
    f32 = jnp.float32
    bf16 = jnp.bfloat16
    step = pl.program_id(0)
    n_steps = pl.num_programs(0)
    te = e_ref.shape[0]          # edge-tile rows
    n_nodes = v_ref.shape[0]
    d = pv_w.shape[1]            # conv_dim (pre-dense output width)
    o = ce_w2.shape[1]           # conv output width

    # ---- step 0: one-time pre-dense MLPs + grid-invariant hoists + init ----
    @pl.when(step == 0)
    def _init():
        # pre-dense node / graph-attr MLPs (run once -> keep f32 accuracy)
        v_pre = _softplus(
            jnp.dot(v_ref[...], pv_w[...], preferred_element_type=f32) + pv_b[...])
        u_pre = _softplus(
            jnp.dot(u_ref[...], pu_w[...], preferred_element_type=f32) + pu_b[...])

        we1 = ce_w1[...]                          # rows: [vi | vj | eij | u]
        # gather directly at width `hidden`: A/B precompute removes two
        # per-tile [te,d]@[d,hidden] matmuls and widens MXU output columns.
        a_s[...] = jnp.dot(v_pre, we1[0 * d:1 * d],
                           preferred_element_type=f32).astype(bf16)
        b_s[...] = jnp.dot(v_pre, we1[1 * d:2 * d],
                           preferred_element_type=f32).astype(bf16)
        # grid-invariant u-term + bias of the edge MLP layer 1
        he0_s[...] = (jnp.dot(u_pre, we1[3 * d:4 * d], preferred_element_type=f32)
                      + ce_b1[...])

        # ve-independent halves of the node MLP layer 1 (epilogue hoisting)
        wv1 = cv_w1[...]                          # rows: [v | ve | u]
        hv0_s[...] = (jnp.dot(v_pre, wv1[0:d], preferred_element_type=f32)
                      + jnp.dot(u_pre, wv1[d + o:2 * d + o],
                                preferred_element_type=f32)
                      + cv_b1[...])
        # u-only term + bias of the attr MLP layer 1
        wu1 = cu_w1[...]                          # rows: [u | ue | uv]
        hu0_s[...] = (jnp.dot(u_pre, wu1[0:d], preferred_element_type=f32)
                      + cu_b1[...])

        # bf16 copies of the per-tile weights (hoisted casts)
        pe_w_s[...] = pe_w[...].astype(bf16)
        we1e_s[...] = we1[2 * d:3 * d].astype(bf16)
        ce_w2_s[...] = ce_w2[...].astype(bf16)

        ve_acc[...] = jnp.zeros_like(ve_acc)
        ue_acc[...] = jnp.zeros_like(ue_acc)

    # ---- per-tile edge path (every grid step) ----
    e_in_t = e_ref[...]                                                # [te, Din] f32
    e_t = _softplus(jnp.dot(e_in_t.astype(bf16), pe_w_s[...],
                            preferred_element_type=f32) + pe_b[...])   # [te, d] f32

    # one-hot gathers of src/dst against the hoisted A/B tables (bf16 MXU)
    node_iota = lax.broadcasted_iota(jnp.int32, (te, n_nodes), 1)
    oh_src = (src_ref[...] == node_iota).astype(bf16)                  # [te, N]
    oh_dst = (dst_ref[...] == node_iota).astype(bf16)                  # [te, N]

    h_e = (jnp.dot(oh_src, a_s[...], preferred_element_type=f32)
           + jnp.dot(oh_dst, b_s[...], preferred_element_type=f32)
           + jnp.dot(e_t.astype(bf16), we1e_s[...], preferred_element_type=f32)
           + he0_s[...])
    h_e = _softplus(h_e)                                               # [te, hidden]
    e_new_t = _softplus(jnp.dot(h_e.astype(bf16), ce_w2_s[...],
                                preferred_element_type=f32) + ce_b2[...])  # [te, o]

    # fused skip connection, per-tile store
    e_out[...] = e_new_t + e_in_t

    # ---- accumulate dst-segment mean and edge readout in VMEM ----
    # per-edge 1/deg(dst) pre-scaling: ve_acc directly holds the segment mean.
    e_scaled = (e_new_t * invdeg_ref[...]).astype(bf16)                # [te, o]
    tcontract = (((0,), (0,)), ((), ()))       # contract over the edge-tile axis
    # TODO(synk): verify via pl.lower_as_mlir that no per-step vxpose of the
    #             [te,N] one-hot is emitted; if it is, stream dst lane-major.
    ve_acc[...] += lax.dot_general(oh_dst, e_scaled, tcontract,
                                   preferred_element_type=f32)         # [N, o]
    ue_acc[...] += jnp.sum(e_new_t, axis=0, keepdims=True)             # [1, o]

    # ---- last step: ve-dependent node + graph-attr updates (short epilogue) ----
    @pl.when(step == n_steps - 1)
    def _finalize():
        ve = ve_acc[...]                                               # segment mean
        wv1_ve = cv_w1[...][d:d + o]
        h_v = _softplus(jnp.dot(ve.astype(bf16), wv1_ve.astype(bf16),
                                preferred_element_type=f32) + hv0_s[...])
        v_new = _softplus(jnp.dot(h_v.astype(bf16), cv_w2[...].astype(bf16),
                                  preferred_element_type=f32) + cv_b2[...])  # [N, o]
        v_out[...] = v_new + v_ref[...]                                # fused skip

        ue = ue_acc[...] * (1.0 / num_edges)                           # mean / edges
        uv = jnp.sum(v_new, axis=0, keepdims=True) * (1.0 / n_nodes)   # mean / nodes
        wu1 = cu_w1[...]
        h_u = _softplus(jnp.dot(ue, wu1[d:d + o], preferred_element_type=f32)
                        + jnp.dot(uv, wu1[d + o:d + 2 * o],
                                  preferred_element_type=f32)
                        + hu0_s[...])
        u_new = _softplus(jnp.dot(h_u, cu_w2[...], preferred_element_type=f32)
                          + cu_b2[...])                                # [1, o]
        u_out[...] = u_new + u_ref[...]                                # fused skip


_PARAM_ORDER = (
    "pre_e_w", "pre_e_b", "pre_v_w", "pre_v_b", "pre_u_w", "pre_u_b",
    "ce_w1", "ce_b1", "ce_w2", "ce_b2",
    "cv_w1", "cv_b1", "cv_w2", "cv_b2",
    "cu_w1", "cu_b1", "cu_w2", "cu_b2",
)


@functools.partial(jax.jit, static_argnames=("edge_tile", "single_buffer_residents"))
def megnet_block_forward(params, edge_feat, node_feat, graph_attr, src, dst,
                         edge_tile=None, single_buffer_residents=True):
    E, d_in = edge_feat.shape
    N = node_feat.shape[0]
    d = params["pre_v_w"].shape[1]
    hidden = params["ce_w1"].shape[1]
    o = params["ce_w2"].shape[1]
    assert o == d_in, "skip connection requires conv_hiddens[-1] == feature dim"

    if edge_tile is None:
        # TODO(synk): re-derive for v7x (64 MiB VMEM) at production N (use ~256).
        edge_tile = E if E <= 512 else 512
    assert E % edge_tile == 0 and edge_tile % 8 == 0
    n_tiles = E // edge_tile

    src_col = src.astype(jnp.int32).reshape(E, 1)
    dst_col = dst.astype(jnp.int32).reshape(E, 1)
    # per-edge inverse in-degree of dst, streamed with the edge tile
    deg = jnp.zeros((N,), jnp.float32).at[dst].add(1.0)
    inv_deg_e = (1.0 / jnp.maximum(deg, 1.0))[dst].reshape(E, 1)

    param_vals = [params[k] for k in _PARAM_ORDER]

    def resident(shape):
        index_map = lambda i: (0,) * len(shape)
        if single_buffer_residents:
            try:
                # constant-index operands: fetched once -> single-buffer them
                return pl.BlockSpec(shape, index_map, pipeline_mode=pl.Buffered(1))
            except (TypeError, AttributeError):
                pass
        return pl.BlockSpec(shape, index_map)

    tile_spec = pl.BlockSpec((edge_tile, d_in), lambda i: (i, 0))
    col_spec = pl.BlockSpec((edge_tile, 1), lambda i: (i, 0))

    in_specs = ([col_spec, col_spec, col_spec, tile_spec,
                 resident(node_feat.shape), resident(graph_attr.shape)]
                + [resident(p.shape) for p in param_vals])
    out_specs = (pl.BlockSpec((edge_tile, o), lambda i: (i, 0)),
                 pl.BlockSpec((N, o), lambda i: (0, 0)),
                 pl.BlockSpec((1, o), lambda i: (0, 0)))
    out_shape = (jax.ShapeDtypeStruct((E, o), jnp.float32),
                 jax.ShapeDtypeStruct((N, o), jnp.float32),
                 jax.ShapeDtypeStruct((1, o), jnp.float32))

    scratch_shapes = [
        pltpu.VMEM((N, hidden), jnp.bfloat16),   # A  = v_pre @ ce_w1[0:d]
        pltpu.VMEM((N, hidden), jnp.bfloat16),   # B  = v_pre @ ce_w1[d:2d]
        pltpu.VMEM((1, hidden), jnp.float32),    # he0: u-term + bias (edge MLP L1)
        pltpu.VMEM((N, hidden), jnp.float32),    # hv0: v/u-terms + bias (node MLP L1)
        pltpu.VMEM((1, hidden), jnp.float32),    # hu0: u-term + bias (attr MLP L1)
        pltpu.VMEM((N, o), jnp.float32),         # ve_acc: per-dst segment mean
        pltpu.VMEM((1, o), jnp.float32),         # ue_acc: edge readout running sum
        pltpu.VMEM((d_in, d), jnp.bfloat16),     # pre-dense edge weight (bf16)
        pltpu.VMEM((d, hidden), jnp.bfloat16),   # ce_w1[2d:3d] (bf16)
        pltpu.VMEM((hidden, o), jnp.bfloat16),   # ce_w2 (bf16)
    ]

    # explicit scoped-VMEM budget: residents + streamed blocks + scratch + one-hots
    param_bytes = sum(int(p.size) * 4 for p in param_vals)
    resident_bytes = (int(node_feat.size) + int(graph_attr.size) + N * o + o) * 4 \
        + param_bytes
    stream_bytes = 2 * edge_tile * (d_in + o + 3) * 4
    scratch_bytes = (2 * N * hidden * 2 + (N + 2) * hidden * 4 + (N + 1) * o * 4
                     + (d_in * d + d * hidden + hidden * o) * 2)
    onehot_bytes = 2 * edge_tile * N * 2 + edge_tile * N * 4
    est = resident_bytes + stream_bytes + scratch_bytes + onehot_bytes
    vmem_limit = int(min(max(2 * est + (8 << 20), 32 << 20), 56 << 20))

    kernel = functools.partial(_megnet_block_kernel, num_edges=E)
    e_out, v_out, u_out = pl.pallas_call(
        kernel,
        grid=(n_tiles,),
        in_specs=in_specs,
        out_specs=out_specs,
        out_shape=out_shape,
        scratch_shapes=scratch_shapes,
        compiler_params=pltpu.CompilerParams(
            dimension_semantics=("arbitrary",),
            vmem_limit_bytes=vmem_limit),
    )(src_col, dst_col, inv_deg_e, edge_feat, node_feat, graph_attr, *param_vals)
    return e_out, v_out, u_out


# ----------------------------------------------------------------------------
# Parameter construction (deterministic, synthetic)
# ----------------------------------------------------------------------------
def _linear_params(key, d_in, d_out):
    kw, kb = jax.random.split(key)
    w = jax.random.normal(kw, (d_in, d_out), jnp.float32) * 0.1
    b = jax.random.normal(kb, (1, d_out), jnp.float32) * 0.1
    return w, b


def init_megnet_block_params(key, dims, conv_hiddens):
    assert len(dims) == 2 and len(conv_hiddens) == 2
    conv_dim, out_dim, hidden = dims[-1], conv_hiddens[-1], conv_hiddens[0]
    edge_in = 2 * conv_dim + conv_dim + conv_dim     # hstack([vi, vj, eij, u])
    node_in = conv_dim + out_dim + conv_dim          # hstack([v, ve, u])
    attr_in = conv_dim + out_dim + out_dim           # hstack([u, ue, uv])

    keys = jax.random.split(key, 9)
    p = {}
    p["pre_e_w"], p["pre_e_b"] = _linear_params(keys[0], dims[0], dims[1])
    p["pre_v_w"], p["pre_v_b"] = _linear_params(keys[1], dims[0], dims[1])
    p["pre_u_w"], p["pre_u_b"] = _linear_params(keys[2], dims[0], dims[1])
    p["ce_w1"], p["ce_b1"] = _linear_params(keys[3], edge_in, hidden)
    p["ce_w2"], p["ce_b2"] = _linear_params(keys[4], hidden, out_dim)
    p["cv_w1"], p["cv_b1"] = _linear_params(keys[5], node_in, hidden)
    p["cv_w2"], p["cv_b2"] = _linear_params(keys[6], hidden, out_dim)
    p["cu_w1"], p["cu_b1"] = _linear_params(keys[7], attr_in, hidden)
    p["cu_w2"], p["cu_b2"] = _linear_params(keys[8], hidden, out_dim)
    return p


# ----------------------------------------------------------------------------
# Pure-JAX reference (mirrors the torch module; uses hstack + dense incidence)
# ----------------------------------------------------------------------------
def _ref_forward(params, edge_feat, node_feat, graph_attr, src, dst):
    sp = lambda x: jnp.where(x > 20.0, x, jnp.log1p(jnp.exp(x)))
    lin = lambda x, w, b: x @ w + b
    N = node_feat.shape[0]

    e = sp(lin(edge_feat, params["pre_e_w"], params["pre_e_b"]))
    v = sp(lin(node_feat, params["pre_v_w"], params["pre_v_b"]))
    u = sp(lin(graph_attr, params["pre_u_w"], params["pre_u_b"]))
    u_nodes = jnp.broadcast_to(u, (N, u.shape[1]))

    ein = jnp.concatenate([v[src], v[dst], e, u_nodes[src]], axis=1)
    e_new = sp(lin(sp(lin(ein, params["ce_w1"], params["ce_b1"])),
                   params["ce_w2"], params["ce_b2"]))

    inc = (dst[None, :] == jnp.arange(N)[:, None]).astype(jnp.float32)
    ve = (inc / jnp.maximum(inc.sum(1, keepdims=True), 1.0)) @ e_new
    nin = jnp.concatenate([v, ve, u_nodes], axis=1)
    v_new = sp(lin(sp(lin(nin, params["cv_w1"], params["cv_b1"])),
                   params["cv_w2"], params["cv_b2"]))

    ain = jnp.concatenate([u, e_new.mean(0, keepdims=True),
                           v_new.mean(0, keepdims=True)], axis=1)
    u_new = sp(lin(sp(lin(ain, params["cu_w1"], params["cu_b1"])),
                   params["cu_w2"], params["cu_b2"]))
    return e_new + edge_feat, v_new + node_feat, u_new + graph_attr


# ----------------------------------------------------------------------------
if __name__ == "__main__":
    D, H, N, E = 32, 64, 8, 16
    dims = [D, D]
    conv_hiddens = [H, D]

    key = jax.random.PRNGKey(0)
    k_p, k_e, k_v, k_u, k_s, k_d = jax.random.split(key, 6)

    params = init_megnet_block_params(k_p, dims, conv_hiddens)
    edge_feat = jax.random.normal(k_e, (E, D), jnp.float32)
    node_feat = jax.random.normal(k_v, (N, D), jnp.float32)
    graph_attr = jax.random.normal(k_u, (1, D), jnp.float32)
    src = jax.random.randint(k_s, (E,), 0, N, jnp.int32)
    dst = jax.random.randint(k_d, (E,), 0, N, jnp.int32)

    def run(single_buffer):
        outs = megnet_block_forward(params, edge_feat, node_feat, graph_attr,
                                    src, dst, edge_tile=8,
                                    single_buffer_residents=single_buffer)
        jax.block_until_ready(outs)
        return outs

    try:
        e_out, v_out, u_out = run(True)
    except Exception:
        # Buffered(1) unsupported on this build -> default double buffering.
        e_out, v_out, u_out = run(False)

    e_chk, v_chk, u_chk = _ref_forward(
        params, edge_feat, node_feat, graph_attr, src, dst)
    # bf16 MXU operands with f32 accumulation -> ~1% worst-case deviation
    tol = dict(atol=3e-2, rtol=3e-2)
    assert jnp.allclose(e_out, e_chk, **tol), "edge mismatch"
    assert jnp.allclose(v_out, v_chk, **tol), "node mismatch"
    assert jnp.allclose(u_out, u_chk, **tol), "graph-attr mismatch"

    print("KERNEL_OK")
</pallas_src>

<mosaic_0001>
module attributes {stable_mosaic.version = 11 : i64} {
  func.func private @main(%arg0: i32) attributes {dimension_semantics = [#tpu.dimension_semantics<core_parallel>], iteration_bounds = array<i64: 2>, tpu.core_type = #tpu.core_type<sc_scalar_subcore>, window_params = []} {
    return
  }
}

module attributes {stable_mosaic.version = 11 : i64} {
  func.func private @main(%arg0: i32) attributes {dimension_semantics = [#tpu.dimension_semantics<core_parallel>], iteration_bounds = array<i64: 2>, tpu.core_type = #tpu.core_type<sc_scalar_subcore>, window_params = []} {
    return
  }
}

module attributes {stable_mosaic.version = 11 : i64} {
  func.func @_megnet_block_kernel(%arg0: i32, %arg1: memref<8x1xi32, #tpu.memory_space<vmem>>, %arg2: memref<8x1xi32, #tpu.memory_space<vmem>>, %arg3: memref<8x1xf32, #tpu.memory_space<vmem>>, %arg4: memref<8x32xf32, #tpu.memory_space<vmem>>, %arg5: memref<8x32xf32, #tpu.memory_space<vmem>>, %arg6: memref<1x32xf32, #tpu.memory_space<vmem>>, %arg7: memref<32x32xf32, #tpu.memory_space<vmem>>, %arg8: memref<1x32xf32, #tpu.memory_space<vmem>>, %arg9: memref<32x32xf32, #tpu.memory_space<vmem>>, %arg10: memref<1x32xf32, #tpu.memory_space<vmem>>, %arg11: memref<32x32xf32, #tpu.memory_space<vmem>>, %arg12: memref<1x32xf32, #tpu.memory_space<vmem>>, %arg13: memref<128x64xf32, #tpu.memory_space<vmem>>, %arg14: memref<1x64xf32, #tpu.memory_space<vmem>>, %arg15: memref<64x32xf32, #tpu.memory_space<vmem>>, %arg16: memref<1x32xf32, #tpu.memory_space<vmem>>, %arg17: memref<96x64xf32, #tpu.memory_space<vmem>>, %arg18: memref<1x64xf32, #tpu.memory_space<vmem>>, %arg19: memref<64x32xf32, #tpu.memory_space<vmem>>, %arg20: memref<1x32xf32, #tpu.memory_space<vmem>>, %arg21: memref<96x64xf32, #tpu.memory_space<vmem>>, %arg22: memref<1x64xf32, #tpu.memory_space<vmem>>, %arg23: memref<64x32xf32, #tpu.memory_space<vmem>>, %arg24: memref<1x32xf32, #tpu.memory_space<vmem>>, %arg25: memref<8x32xf32, #tpu.memory_space<vmem>>, %arg26: memref<8x32xf32, #tpu.memory_space<vmem>>, %arg27: memref<1x32xf32, #tpu.memory_space<vmem>>, %arg28: memref<8x64xbf16, #tpu.memory_space<vmem>>, %arg29: memref<8x64xbf16, #tpu.memory_space<vmem>>, %arg30: memref<1x64xf32, #tpu.memory_space<vmem>>, %arg31: memref<8x64xf32, #tpu.memory_space<vmem>>, %arg32: memref<1x64xf32, #tpu.memory_space<vmem>>, %arg33: memref<8x32xf32, #tpu.memory_space<vmem>>, %arg34: memref<1x32xf32, #tpu.memory_space<vmem>>, %arg35: memref<32x32xbf16, #tpu.memory_space<vmem>>, %arg36: memref<32x64xbf16, #tpu.memory_space<vmem>>, %arg37: memref<64x32xbf16, #tpu.memory_space<vmem>>) attributes {dimension_semantics = [#tpu.dimension_semantics<arbitrary>], iteration_bounds = array<i64: 2>, scalar_prefetch = 0 : i64, scratch_operands = 10 : i64, tpu.core_type = #tpu.core_type<tc>, window_params = [{transform_indices = @transform_0, window_bounds = array<i64: 8, 1>}, {transform_indices = @transform_1, window_bounds = array<i64: 8, 1>}, {transform_indices = @transform_2, window_bounds = array<i64: 8, 1>}, {transform_indices = @transform_3, window_bounds = array<i64: 8, 32>}, {pipeline_mode = #tpu.pipeline_mode<synchronous>, transform_indices = @transform_4, window_bounds = array<i64: 8, 32>}, {pipeline_mode = #tpu.pipeline_mode<synchronous>, transform_indices = @transform_5, window_bounds = array<i64: 1, 32>}, {pipeline_mode = #tpu.pipeline_mode<synchronous>, transform_indices = @transform_6, window_bounds = array<i64: 32, 32>}, {pipeline_mode = #tpu.pipeline_mode<synchronous>, transform_indices = @transform_7, window_bounds = array<i64: 1, 32>}, {pipeline_mode = #tpu.pipeline_mode<synchronous>, transform_indices = @transform_8, window_bounds = array<i64: 32, 32>}, {pipeline_mode = #tpu.pipeline_mode<synchronous>, transform_indices = @transform_9, window_bounds = array<i64: 1, 32>}, {pipeline_mode = #tpu.pipeline_mode<synchronous>, transform_indices = @transform_10, window_bounds = array<i64: 32, 32>}, {pipeline_mode = #tpu.pipeline_mode<synchronous>, transform_indices = @transform_11, window_bounds = array<i64: 1, 32>}, {pipeline_mode = #tpu.pipeline_mode<synchronous>, transform_indices = @transform_12, window_bounds = array<i64: 128, 64>}, {pipeline_mode = #tpu.pipeline_mode<synchronous>, transform_indices = @transform_13, window_bounds = array<i64: 1, 64>}, {pipeline_mode = #tpu.pipeline_mode<synchronous>, transform_indices = @transform_14, window_bounds = array<i64: 64, 32>}, {pipeline_mode = #tpu.pipeline_mode<synchronous>, transform_indices = @transform_15, window_bounds = array<i64: 1, 32>}, {pipeline_mode = #tpu.pipeline_mode<synchronous>, transform_indices = @transform_16, window_bounds = array<i64: 96, 64>}, {pipeline_mode = #tpu.pipeline_mode<synchronous>, transform_indices = @transform_17, window_bounds = array<i64: 1, 64>}, {pipeline_mode = #tpu.pipeline_mode<synchronous>, transform_indices = @transform_18, window_bounds = array<i64: 64, 32>}, {pipeline_mode = #tpu.pipeline_mode<synchronous>, transform_indices = @transform_19, window_bounds = array<i64: 1, 32>}, {pipeline_mode = #tpu.pipeline_mode<synchronous>, transform_indices = @transform_20, window_bounds = array<i64: 96, 64>}, {pipeline_mode = #tpu.pipeline_mode<synchronous>, transform_indices = @transform_21, window_bounds = array<i64: 1, 64>}, {pipeline_mode = #tpu.pipeline_mode<synchronous>, transform_indices = @transform_22, window_bounds = array<i64: 64, 32>}, {pipeline_mode = #tpu.pipeline_mode<synchronous>, transform_indices = @transform_23, window_bounds = array<i64: 1, 32>}, {transform_indices = @transform_24, window_bounds = array<i64: 8, 32>}, {pipeline_mode = #tpu.pipeline_mode<synchronous>, transform_indices = @transform_25, window_bounds = array<i64: 8, 32>}, {pipeline_mode = #tpu.pipeline_mode<synchronous>, transform_indices = @transform_26, window_bounds = array<i64: 1, 32>}]} {
    %c0_i32 = arith.constant 0 : i32
    %0 = arith.cmpi eq, %arg0, %c0_i32 : i32
    %1 = arith.extui %0 : i1 to i32
    %c0_i32_0 = arith.constant 0 : i32
    %2 = arith.cmpi ne, %1, %c0_i32_0 : i32
    scf.if %2 {
      %c0_47 = arith.constant 0 : index
      %c0_48 = arith.constant 0 : index
      %83 = vector.load %arg5[%c0_47, %c0_48] : memref<8x32xf32, #tpu.memory_space<vmem>>, vector<8x32xf32>
      %c0_49 = arith.constant 0 : index
      %c0_50 = arith.constant 0 : index
      %84 = vector.load %arg9[%c0_49, %c0_50] : memref<32x32xf32, #tpu.memory_space<vmem>>, vector<32x32xf32>
      %cst_51 = arith.constant dense<0.000000e+00> : vector<8x32xf32>
      %85 = tpu.matmul %83, %84, %cst_51 {dimension_numbers = #tpu.dot_dimension_numbers<[1], [0], [0], [1], [0, 0, 1, 1], [], []>} : vector<8x32xf32>, vector<32x32xf32>, vector<8x32xf32> -> vector<8x32xf32>
      %c0_52 = arith.constant 0 : index
      %c0_53 = arith.constant 0 : index
      %86 = vector.load %arg10[%c0_52, %c0_53] : memref<1x32xf32, #tpu.memory_space<vmem>>, vector<1x32xf32>
      %87 = vector.broadcast %86 : vector<1x32xf32> to vector<8x32xf32>
      %88 = arith.addf %85, %87 : vector<8x32xf32>
      %cst_54 = arith.constant 0.000000e+00 : f32
      %89 = vector.broadcast %cst_54 : f32 to vector<8x32xf32>
      %90 = arith.maximumf %88, %89 : vector<8x32xf32>
      %91 = math.absf %88 : vector<8x32xf32>
      %cst_55 = arith.constant 0.000000e+00 : f32
      %92 = vector.broadcast %cst_55 : f32 to vector<8x32xf32>
      %93 = arith.subf %92, %91 : vector<8x32xf32>
      %94 = math.exp %93 : vector<8x32xf32>
      %95 = math.log1p %94 : vector<8x32xf32>
      %96 = arith.addf %90, %95 : vector<8x32xf32>
      %c0_56 = arith.constant 0 : index
      %c0_57 = arith.constant 0 : index
      %97 = vector.load %arg6[%c0_56, %c0_57] : memref<1x32xf32, #tpu.memory_space<vmem>>, vector<1x32xf32>
      %c0_58 = arith.constant 0 : index
      %c0_59 = arith.constant 0 : index
      %98 = vector.load %arg11[%c0_58, %c0_59] : memref<32x32xf32, #tpu.memory_space<vmem>>, vector<32x32xf32>
      %cst_60 = arith.constant dense<0.000000e+00> : vector<1x32xf32>
      %99 = tpu.matmul %97, %98, %cst_60 {dimension_numbers = #tpu.dot_dimension_numbers<[1], [0], [0], [1], [0, 0, 1, 1], [], []>} : vector<1x32xf32>, vector<32x32xf32>, vector<1x32xf32> -> vector<1x32xf32>
      %c0_61 = arith.constant 0 : index
      %c0_62 = arith.constant 0 : index
      %100 = vector.load %arg12[%c0_61, %c0_62] : memref<1x32xf32, #tpu.memory_space<vmem>>, vector<1x32xf32>
      %101 = arith.addf %99, %100 : vector<1x32xf32>
      %cst_63 = arith.constant 0.000000e+00 : f32
      %102 = vector.broadcast %cst_63 : f32 to vector<1x32xf32>
      %103 = arith.maximumf %101, %102 : vector<1x32xf32>
      %104 = math.absf %101 : vector<1x32xf32>
      %cst_64 = arith.constant 0.000000e+00 : f32
      %105 = vector.broadcast %cst_64 : f32 to vector<1x32xf32>
      %106 = arith.subf %105, %104 : vector<1x32xf32>
      %107 = math.exp %106 : vector<1x32xf32>
      %108 = math.log1p %107 : vector<1x32xf32>
      %109 = arith.addf %103, %108 : vector<1x32xf32>
      %c0_65 = arith.constant 0 : index
      %c0_66 = arith.constant 0 : index
      %110 = vector.load %arg13[%c0_65, %c0_66] : memref<128x64xf32, #tpu.memory_space<vmem>>, vector<128x64xf32>
      %111 = vector.extract_strided_slice %110 {offsets = [0, 0], sizes = [32, 64], strides = [1, 1]} : vector<128x64xf32> to vector<32x64xf32>
      %cst_67 = arith.constant dense<0.000000e+00> : vector<8x64xf32>
      %112 = tpu.matmul %96, %111, %cst_67 {dimension_numbers = #tpu.dot_dimension_numbers<[1], [0], [0], [1], [0, 0, 1, 1], [], []>} : vector<8x32xf32>, vector<32x64xf32>, vector<8x64xf32> -> vector<8x64xf32>
      %113 = arith.truncf %112 : vector<8x64xf32> to vector<8x64xbf16>
      %c0_68 = arith.constant 0 : index
      %c0_69 = arith.constant 0 : index
      %114 = vector.load %arg28[%c0_68, %c0_69] : memref<8x64xbf16, #tpu.memory_space<vmem>>, vector<8x64xbf16>
      tpu.vector_store %arg28[%c0_68, %c0_69], %113 {strides = array<i32>} : memref<8x64xbf16, #tpu.memory_space<vmem>>, vector<8x64xbf16>,
      %115 = vector.extract_strided_slice %110 {offsets = [32, 0], sizes = [32, 64], strides = [1, 1]} : vector<128x64xf32> to vector<32x64xf32>
      %cst_70 = arith.constant dense<0.000000e+00> : vector<8x64xf32>
      %116 = tpu.matmul %96, %115, %cst_70 {dimension_numbers = #tpu.dot_dimension_numbers<[1], [0], [0], [1], [0, 0, 1, 1], [], []>} : vector<8x32xf32>, vector<32x64xf32>, vector<8x64xf32> -> vector<8x64xf32>
      %117 = arith.truncf %116 : vector<8x64xf32> to vector<8x64xbf16>
      %c0_71 = arith.constant 0 : index
      %c0_72 = arith.constant 0 : index
      %118 = vector.load %arg29[%c0_71, %c0_72] : memref<8x64xbf16, #tpu.memory_space<vmem>>, vector<8x64xbf16>
      tpu.vector_store %arg29[%c0_71, %c0_72], %117 {strides = array<i32>} : memref<8x64xbf16, #tpu.memory_space<vmem>>, vector<8x64xbf16>,
      %119 = vector.extract_strided_slice %110 {offsets = [96, 0], sizes = [32, 64], strides = [1, 1]} : vector<128x64xf32> to vector<32x64xf32>
      %cst_73 = arith.constant dense<0.000000e+00> : vector<1x64xf32>
      %120 = tpu.matmul %109, %119, %cst_73 {dimension_numbers = #tpu.dot_dimension_numbers<[1], [0], [0], [1], [0, 0, 1, 1], [], []>} : vector<1x32xf32>, vector<32x64xf32>, vector<1x64xf32> -> vector<1x64xf32>
      %c0_74 = arith.constant 0 : index
      %c0_75 = arith.constant 0 : index
      %121 = vector.load %arg14[%c0_74, %c0_75] : memref<1x64xf32, #tpu.memory_space<vmem>>, vector<1x64xf32>
      %122 = arith.addf %120, %121 : vector<1x64xf32>
      %c0_76 = arith.constant 0 : index
      %c0_77 = arith.constant 0 : index
      %123 = vector.load %arg30[%c0_76, %c0_77] : memref<1x64xf32, #tpu.memory_space<vmem>>, vector<1x64xf32>
      tpu.vector_store %arg30[%c0_76, %c0_77], %122 {strides = array<i32>} : memref<1x64xf32, #tpu.memory_space<vmem>>, vector<1x64xf32>,
      %c0_78 = arith.constant 0 : index
      %c0_79 = arith.constant 0 : index
      %124 = vector.load %arg17[%c0_78, %c0_79] : memref<96x64xf32, #tpu.memory_space<vmem>>, vector<96x64xf32>
      %125 = vector.extract_strided_slice %124 {offsets = [0, 0], sizes = [32, 64], strides = [1, 1]} : vector<96x64xf32> to vector<32x64xf32>
      %cst_80 = arith.constant dense<0.000000e+00> : vector<8x64xf32>
      %126 = tpu.matmul %96, %125, %cst_80 {dimension_numbers = #tpu.dot_dimension_numbers<[1], [0], [0], [1], [0, 0, 1, 1], [], []>} : vector<8x32xf32>, vector<32x64xf32>, vector<8x64xf32> -> vector<8x64xf32>
      %127 = vector.extract_strided_slice %124 {offsets = [64, 0], sizes = [32, 64], strides = [1, 1]} : vector<96x64xf32> to vector<32x64xf32>
      %cst_81 = arith.constant dense<0.000000e+00> : vector<1x64xf32>
      %128 = tpu.matmul %109, %127, %cst_81 {dimension_numbers = #tpu.dot_dimension_numbers<[1], [0], [0], [1], [0, 0, 1, 1], [], []>} : vector<1x32xf32>, vector<32x64xf32>, vector<1x64xf32> -> vector<1x64xf32>
      %129 = vector.broadcast %128 : vector<1x64xf32> to vector<8x64xf32>
      %130 = arith.addf %126, %129 : vector<8x64xf32>
      %c0_82 = arith.constant 0 : index
      %c0_83 = arith.constant 0 : index
      %131 = vector.load %arg18[%c0_82, %c0_83] : memref<1x64xf32, #tpu.memory_space<vmem>>, vector<1x64xf32>
      %132 = vector.broadcast %131 : vector<1x64xf32> to vector<8x64xf32>
      %133 = arith.addf %130, %132 : vector<8x64xf32>
      %c0_84 = arith.constant 0 : index
      %c0_85 = arith.constant 0 : index
      %134 = vector.load %arg31[%c0_84, %c0_85] : memref<8x64xf32, #tpu.memory_space<vmem>>, vector<8x64xf32>
      tpu.vector_store %arg31[%c0_84, %c0_85], %133 {strides = array<i32>} : memref<8x64xf32, #tpu.memory_space<vmem>>, vector<8x64xf32>,
      %c0_86 = arith.constant 0 : index
      %c0_87 = arith.constant 0 : index
      %135 = vector.load %arg21[%c0_86, %c0_87] : memref<96x64xf32, #tpu.memory_space<vmem>>, vector<96x64xf32>
      %136 = vector.extract_strided_slice %135 {offsets = [0, 0], sizes = [32, 64], strides = [1, 1]} : vector<96x64xf32> to vector<32x64xf32>
      %cst_88 = arith.constant dense<0.000000e+00> : vector<1x64xf32>
      %137 = tpu.matmul %109, %136, %cst_88 {dimension_numbers = #tpu.dot_dimension_numbers<[1], [0], [0], [1], [0, 0, 1, 1], [], []>} : vector<1x32xf32>, vector<32x64xf32>, vector<1x64xf32> -> vector<1x64xf32>
      %c0_89 = arith.constant 0 : index
      %c0_90 = arith.constant 0 : index
      %138 = vector.load %arg22[%c0_89, %c0_90] : memref<1x64xf32, #tpu.memory_space<vmem>>, vector<1x64xf32>
      %139 = arith.addf %137, %138 : vector<1x64xf32>
      %c0_91 = arith.constant 0 : index
      %c0_92 = arith.constant 0 : index
      %140 = vector.load %arg32[%c0_91, %c0_92] : memref<1x64xf32, #tpu.memory_space<vmem>>, vector<1x64xf32>
      tpu.vector_store %arg32[%c0_91, %c0_92], %139 {strides = array<i32>} : memref<1x64xf32, #tpu.memory_space<vmem>>, vector<1x64xf32>,
      %c0_93 = arith.constant 0 : index
      %c0_94 = arith.constant 0 : index
      %141 = vector.load %arg7[%c0_93, %c0_94] : memref<32x32xf32, #tpu.memory_space<vmem>>, vector<32x32xf32>
      %142 = arith.truncf %141 : vector<32x32xf32> to vector<32x32xbf16>
      %c0_95 = arith.constant 0 : index
      %c0_96 = arith.constant 0 : index
      %143 = vector.load %arg35[%c0_95, %c0_96] : memref<32x32xbf16, #tpu.memory_space<vmem>>, vector<32x32xbf16>
      tpu.vector_store %arg35[%c0_95, %c0_96], %142 {strides = array<i32>} : memref<32x32xbf16, #tpu.memory_space<vmem>>, vector<32x32xbf16>,
      %144 = vector.extract_strided_slice %110 {offsets = [64, 0], sizes = [32, 64], strides = [1, 1]} : vector<128x64xf32> to vector<32x64xf32>
      %145 = arith.truncf %144 : vector<32x64xf32> to vector<32x64xbf16>
      %c0_97 = arith.constant 0 : index
      %c0_98 = arith.constant 0 : index
      %146 = vector.load %arg36[%c0_97, %c0_98] : memref<32x64xbf16, #tpu.memory_space<vmem>>, vector<32x64xbf16>
      tpu.vector_store %arg36[%c0_97, %c0_98], %145 {strides = array<i32>} : memref<32x64xbf16, #tpu.memory_space<vmem>>, vector<32x64xbf16>,
      %c0_99 = arith.constant 0 : index
      %c0_100 = arith.constant 0 : index
      %147 = vector.load %arg15[%c0_99, %c0_100] : memref<64x32xf32, #tpu.memory_space<vmem>>, vector<64x32xf32>
      %148 = arith.truncf %147 : vector<64x32xf32> to vector<64x32xbf16>
      %c0_101 = arith.constant 0 : index
      %c0_102 = arith.constant 0 : index
      %149 = vector.load %arg37[%c0_101, %c0_102] : memref<64x32xbf16, #tpu.memory_space<vmem>>, vector<64x32xbf16>
      tpu.vector_store %arg37[%c0_101, %c0_102], %148 {strides = array<i32>} : memref<64x32xbf16, #tpu.memory_space<vmem>>, vector<64x32xbf16>,
      %cst_103 = arith.constant 0.000000e+00 : f32
      %150 = vector.broadcast %cst_103 : f32 to vector<8x32xf32>
      %c0_104 = arith.constant 0 : index
      %c0_105 = arith.constant 0 : index
      %151 = vector.load %arg33[%c0_104, %c0_105] : memref<8x32xf32, #tpu.memory_space<vmem>>, vector<8x32xf32>
      tpu.vector_store %arg33[%c0_104, %c0_105], %150 {strides = array<i32>} : memref<8x32xf32, #tpu.memory_space<vmem>>, vector<8x32xf32>,
      %cst_106 = arith.constant 0.000000e+00 : f32
      %152 = vector.broadcast %cst_106 : f32 to vector<1x32xf32>
      %c0_107 = arith.constant 0 : index
      %c0_108 = arith.constant 0 : index
      %153 = vector.load %arg34[%c0_107, %c0_108] : memref<1x32xf32, #tpu.memory_space<vmem>>, vector<1x32xf32>
      tpu.vector_store %arg34[%c0_107, %c0_108], %152 {strides = array<i32>} : memref<1x32xf32, #tpu.memory_space<vmem>>, vector<1x32xf32>,
    } else {
    }
    %c0 = arith.constant 0 : index
    %c0_1 = arith.constant 0 : index
    %3 = vector.load %arg4[%c0, %c0_1] : memref<8x32xf32, #tpu.memory_space<vmem>>, vector<8x32xf32>
    %4 = arith.truncf %3 : vector<8x32xf32> to vector<8x32xbf16>
    %c0_2 = arith.constant 0 : index
    %c0_3 = arith.constant 0 : index
    %5 = vector.load %arg35[%c0_2, %c0_3] : memref<32x32xbf16, #tpu.memory_space<vmem>>, vector<32x32xbf16>
    %cst = arith.constant dense<0.000000e+00> : vector<8x32xf32>
    %6 = tpu.matmul %4, %5, %cst {dimension_numbers = #tpu.dot_dimension_numbers<[1], [0], [0], [1], [0, 0, 1, 1], [], []>} : vector<8x32xbf16>, vector<32x32xbf16>, vector<8x32xf32> -> vector<8x32xf32>
    %c0_4 = arith.constant 0 : index
    %c0_5 = arith.constant 0 : index
    %7 = vector.load %arg8[%c0_4, %c0_5] : memref<1x32xf32, #tpu.memory_space<vmem>>, vector<1x32xf32>
    %8 = vector.broadcast %7 : vector<1x32xf32> to vector<8x32xf32>
    %9 = arith.addf %6, %8 : vector<8x32xf32>
    %cst_6 = arith.constant 0.000000e+00 : f32
    %10 = vector.broadcast %cst_6 : f32 to vector<8x32xf32>
    %11 = arith.maximumf %9, %10 : vector<8x32xf32>
    %12 = math.absf %9 : vector<8x32xf32>
    %cst_7 = arith.constant 0.000000e+00 : f32
    %13 = vector.broadcast %cst_7 : f32 to vector<8x32xf32>
    %14 = arith.subf %13, %12 : vector<8x32xf32>
    %15 = math.exp %14 : vector<8x32xf32>
    %16 = math.log1p %15 : vector<8x32xf32>
    %17 = arith.addf %11, %16 : vector<8x32xf32>
    %18 = tpu.iota {dimensions = array<i32: 1>} : vector<8x8xi32>
    %c0_8 = arith.constant 0 : index
    %c0_9 = arith.constant 0 : index
    %19 = vector.load %arg1[%c0_8, %c0_9] : memref<8x1xi32, #tpu.memory_space<vmem>>, vector<8x1xi32>
    %20 = vector.broadcast %19 : vector<8x1xi32> to vector<8x8xi32>
    %21 = arith.cmpi eq, %20, %18 : vector<8x8xi32>
    %22 = arith.extui %21 : vector<8x8xi1> to vector<8x8xi32>
    %23 = arith.sitofp %22 : vector<8x8xi32> to vector<8x8xf32>
    %24 = arith.truncf %23 : vector<8x8xf32> to vector<8x8xbf16>
    %c0_10 = arith.constant 0 : index
    %c0_11 = arith.constant 0 : index
    %25 = vector.load %arg2[%c0_10, %c0_11] : memref<8x1xi32, #tpu.memory_space<vmem>>, vector<8x1xi32>
    %26 = vector.broadcast %25 : vector<8x1xi32> to vector<8x8xi32>
    %27 = arith.cmpi eq, %26, %18 : vector<8x8xi32>
    %28 = arith.extui %27 : vector<8x8xi1> to vector<8x8xi32>
    %29 = arith.sitofp %28 : vector<8x8xi32> to vector<8x8xf32>
    %30 = arith.truncf %29 : vector<8x8xf32> to vector<8x8xbf16>
    %c0_12 = arith.constant 0 : index
    %c0_13 = arith.constant 0 : index
    %31 = vector.load %arg28[%c0_12, %c0_13] : memref<8x64xbf16, #tpu.memory_space<vmem>>, vector<8x64xbf16>
    %cst_14 = arith.constant dense<0.000000e+00> : vector<8x64xf32>
    %32 = tpu.matmul %24, %31, %cst_14 {dimension_numbers = #tpu.dot_dimension_numbers<[1], [0], [0], [1], [0, 0, 1, 1], [], []>} : vector<8x8xbf16>, vector<8x64xbf16>, vector<8x64xf32> -> vector<8x64xf32>
    %c0_15 = arith.constant 0 : index
    %c0_16 = arith.constant 0 : index
    %33 = vector.load %arg29[%c0_15, %c0_16] : memref<8x64xbf16, #tpu.memory_space<vmem>>, vector<8x64xbf16>
    %cst_17 = arith.constant dense<0.000000e+00> : vector<8x64xf32>
    %34 = tpu.matmul %30, %33, %cst_17 {dimension_numbers = #tpu.dot_dimension_numbers<[1], [0], [0], [1], [0, 0, 1, 1], [], []>} : vector<8x8xbf16>, vector<8x64xbf16>, vector<8x64xf32> -> vector<8x64xf32>
    %35 = arith.addf %32, %34 : vector<8x64xf32>
    %36 = arith.truncf %17 : vector<8x32xf32> to vector<8x32xbf16>
    %c0_18 = arith.constant 0 : index
    %c0_19 = arith.constant 0 : index
    %37 = vector.load %arg36[%c0_18, %c0_19] : memref<32x64xbf16, #tpu.memory_space<vmem>>, vector<32x64xbf16>
    %cst_20 = arith.constant dense<0.000000e+00> : vector<8x64xf32>
    %38 = tpu.matmul %36, %37, %cst_20 {dimension_numbers = #tpu.dot_dimension_numbers<[1], [0], [0], [1], [0, 0, 1, 1], [], []>} : vector<8x32xbf16>, vector<32x64xbf16>, vector<8x64xf32> -> vector<8x64xf32>
    %39 = arith.addf %35, %38 : vector<8x64xf32>
    %c0_21 = arith.constant 0 : index
    %c0_22 = arith.constant 0 : index
    %40 = vector.load %arg30[%c0_21, %c0_22] : memref<1x64xf32, #tpu.memory_space<vmem>>, vector<1x64xf32>
    %41 = vector.broadcast %40 : vector<1x64xf32> to vector<8x64xf32>
    %42 = arith.addf %39, %41 : vector<8x64xf32>
    %cst_23 = arith.constant 0.000000e+00 : f32
    %43 = vector.broadcast %cst_23 : f32 to vector<8x64xf32>
    %44 = arith.maximumf %42, %43 : vector<8x64xf32>
    %45 = math.absf %42 : vector<8x64xf32>
    %cst_24 = arith.constant 0.000000e+00 : f32
    %46 = vector.broadcast %cst_24 : f32 to vector<8x64xf32>
    %47 = arith.subf %46, %45 : vector<8x64xf32>
    %48 = math.exp %47 : vector<8x64xf32>
    %49 = math.log1p %48 : vector<8x64xf32>
    %50 = arith.addf %44, %49 : vector<8x64xf32>
    %51 = arith.truncf %50 : vector<8x64xf32> to vector<8x64xbf16>
    %c0_25 = arith.constant 0 : index
    %c0_26 = arith.constant 0 : index
    %52 = vector.load %arg37[%c0_25, %c0_26] : memref<64x32xbf16, #tpu.memory_space<vmem>>, vector<64x32xbf16>
    %cst_27 = arith.constant dense<0.000000e+00> : vector<8x32xf32>
    %53 = tpu.matmul %51, %52, %cst_27 {dimension_numbers = #tpu.dot_dimension_numbers<[1], [0], [0], [1], [0, 0, 1, 1], [], []>} : vector<8x64xbf16>, vector<64x32xbf16>, vector<8x32xf32> -> vector<8x32xf32>
    %c0_28 = arith.constant 0 : index
    %c0_29 = arith.constant 0 : index
    %54 = vector.load %arg16[%c0_28, %c0_29] : memref<1x32xf32, #tpu.memory_space<vmem>>, vector<1x32xf32>
    %55 = vector.broadcast %54 : vector<1x32xf32> to vector<8x32xf32>
    %56 = arith.addf %53, %55 : vector<8x32xf32>
    %cst_30 = arith.constant 0.000000e+00 : f32
    %57 = vector.broadcast %cst_30 : f32 to vector<8x32xf32>
    %58 = arith.maximumf %56, %57 : vector<8x32xf32>
    %59 = math.absf %56 : vector<8x32xf32>
    %cst_31 = arith.constant 0.000000e+00 : f32
    %60 = vector.broadcast %cst_31 : f32 to vector<8x32xf32>
    %61 = arith.subf %60, %59 : vector<8x32xf32>
    %62 = math.exp %61 : vector<8x32xf32>
    %63 = math.log1p %62 : vector<8x32xf32>
    %64 = arith.addf %58, %63 : vector<8x32xf32>
    %65 = arith.addf %64, %3 : vector<8x32xf32>
    %c0_32 = arith.constant 0 : index
    %c0_33 = arith.constant 0 : index
    %66 = vector.load %arg25[%c0_32, %c0_33] : memref<8x32xf32, #tpu.memory_space<vmem>>, vector<8x32xf32>
    tpu.vector_store %arg25[%c0_32, %c0_33], %65 {strides = array<i32>} : memref<8x32xf32, #tpu.memory_space<vmem>>, vector<8x32xf32>,
    %c0_34 = arith.constant 0 : index
    %c0_35 = arith.constant 0 : index
    %67 = vector.load %arg3[%c0_34, %c0_35] : memref<8x1xf32, #tpu.memory_space<vmem>>, vector<8x1xf32>
    %68 = vector.broadcast %67 : vector<8x1xf32> to vector<8x32xf32>
    %69 = arith.mulf %64, %68 : vector<8x32xf32>
    %70 = arith.truncf %69 : vector<8x32xf32> to vector<8x32xbf16>
    %c0_36 = arith.constant 0 : index
    %c0_37 = arith.constant 0 : index
    %71 = vector.load %arg33[%c0_36, %c0_37] : memref<8x32xf32, #tpu.memory_space<vmem>>, vector<8x32xf32>
    %cst_38 = arith.constant dense<0.000000e+00> : vector<8x32xf32>
    %72 = tpu.matmul %30, %70, %cst_38 {dimension_numbers = #tpu.dot_dimension_numbers<[0], [0], [1], [1], [0, 1, 1, 1], [], []>} : vector<8x8xbf16>, vector<8x32xbf16>, vector<8x32xf32> -> vector<8x32xf32>
    %73 = arith.addf %71, %72 : vector<8x32xf32>
    %c0_39 = arith.constant 0 : index
    %c0_40 = arith.constant 0 : index
    %74 = vector.load %arg33[%c0_39, %c0_40] : memref<8x32xf32, #tpu.memory_space<vmem>>, vector<8x32xf32>
    tpu.vector_store %arg33[%c0_39, %c0_40], %73 {strides = array<i32>} : memref<8x32xf32, #tpu.memory_space<vmem>>, vector<8x32xf32>,
    %c0_41 = arith.constant 0 : index
    %c0_42 = arith.constant 0 : index
    %75 = vector.load %arg34[%c0_41, %c0_42] : memref<1x32xf32, #tpu.memory_space<vmem>>, vector<1x32xf32>
    %cst_43 = arith.constant dense<0.000000e+00> : vector<32xf32>
    %76 = vector.multi_reduction <add>, %64, %cst_43 [0] : vector<8x32xf32> to vector<32xf32>
    %77 = vector.shape_cast %76 : vector<32xf32> to vector<1x32xf32>
    %78 = arith.addf %75, %77 : vector<1x32xf32>
    %c0_44 = arith.constant 0 : index
    %c0_45 = arith.constant 0 : index
    %79 = vector.load %arg34[%c0_44, %c0_45] : memref<1x32xf32, #tpu.memory_space<vmem>>, vector<1x32xf32>
    tpu.vector_store %arg34[%c0_44, %c0_45], %78 {strides = array<i32>} : memref<1x32xf32, #tpu.memory_space<vmem>>, vector<1x32xf32>,
    %c1_i32 = arith.constant 1 : i32
    %80 = arith.cmpi eq, %arg0, %c1_i32 : i32
    %81 = arith.extui %80 : i1 to i32
    %c0_i32_46 = arith.constant 0 : i32
    %82 = arith.cmpi ne, %81, %c0_i32_46 : i32
    scf.if %82 {
      %c0_47 = arith.constant 0 : index
      %c0_48 = arith.constant 0 : index
      %83 = vector.load %arg33[%c0_47, %c0_48] : memref<8x32xf32, #tpu.memory_space<vmem>>, vector<8x32xf32>
      %c0_49 = arith.constant 0 : index
      %c0_50 = arith.constant 0 : index
      %84 = vector.load %arg17[%c0_49, %c0_50] : memref<96x64xf32, #tpu.memory_space<vmem>>, vector<96x64xf32>
      %85 = vector.extract_strided_slice %84 {offsets = [32, 0], sizes = [32, 64], strides = [1, 1]} : vector<96x64xf32> to vector<32x64xf32>
      %86 = arith.truncf %83 : vector<8x32xf32> to vector<8x32xbf16>
      %87 = arith.truncf %85 : vector<32x64xf32> to vector<32x64xbf16>
      %cst_51 = arith.constant dense<0.000000e+00> : vector<8x64xf32>
      %88 = tpu.matmul %86, %87, %cst_51 {dimension_numbers = #tpu.dot_dimension_numbers<[1], [0], [0], [1], [0, 0, 1, 1], [], []>} : vector<8x32xbf16>, vector<32x64xbf16>, vector<8x64xf32> -> vector<8x64xf32>
      %c0_52 = arith.constant 0 : index
      %c0_53 = arith.constant 0 : index
      %89 = vector.load %arg31[%c0_52, %c0_53] : memref<8x64xf32, #tpu.memory_space<vmem>>, vector<8x64xf32>
      %90 = arith.addf %88, %89 : vector<8x64xf32>
      %cst_54 = arith.constant 0.000000e+00 : f32
      %91 = vector.broadcast %cst_54 : f32 to vector<8x64xf32>
      %92 = arith.maximumf %90, %91 : vector<8x64xf32>
      %93 = math.absf %90 : vector<8x64xf32>
      %cst_55 = arith.constant 0.000000e+00 : f32
      %94 = vector.broadcast %cst_55 : f32 to vector<8x64xf32>
      %95 = arith.subf %94, %93 : vector<8x64xf32>
      %96 = math.exp %95 : vector<8x64xf32>
      %97 = math.log1p %96 : vector<8x64xf32>
      %98 = arith.addf %92, %97 : vector<8x64xf32>
      %99 = arith.truncf %98 : vector<8x64xf32> to vector<8x64xbf16>
      %c0_56 = arith.constant 0 : index
      %c0_57 = arith.constant 0 : index
      %100 = vector.load %arg19[%c0_56, %c0_57] : memref<64x32xf32, #tpu.memory_space<vmem>>, vector<64x32xf32>
      %101 = arith.truncf %100 : vector<64x32xf32> to vector<64x32xbf16>
      %cst_58 = arith.constant dense<0.000000e+00> : vector<8x32xf32>
      %102 = tpu.matmul %99, %101, %cst_58 {dimension_numbers = #tpu.dot_dimension_numbers<[1], [0], [0], [1], [0, 0, 1, 1], [], []>} : vector<8x64xbf16>, vector<64x32xbf16>, vector<8x32xf32> -> vector<8x32xf32>
      %c0_59 = arith.constant 0 : index
      %c0_60 = arith.constant 0 : index
      %103 = vector.load %arg20[%c0_59, %c0_60] : memref<1x32xf32, #tpu.memory_space<vmem>>, vector<1x32xf32>
      %104 = vector.broadcast %103 : vector<1x32xf32> to vector<8x32xf32>
      %105 = arith.addf %102, %104 : vector<8x32xf32>
      %cst_61 = arith.constant 0.000000e+00 : f32
      %106 = vector.broadcast %cst_61 : f32 to vector<8x32xf32>
      %107 = arith.maximumf %105, %106 : vector<8x32xf32>
      %108 = math.absf %105 : vector<8x32xf32>
      %cst_62 = arith.constant 0.000000e+00 : f32
      %109 = vector.broadcast %cst_62 : f32 to vector<8x32xf32>
      %110 = arith.subf %109, %108 : vector<8x32xf32>
      %111 = math.exp %110 : vector<8x32xf32>
      %112 = math.log1p %111 : vector<8x32xf32>
      %113 = arith.addf %107, %112 : vector<8x32xf32>
      %c0_63 = arith.constant 0 : index
      %c0_64 = arith.constant 0 : index
      %114 = vector.load %arg5[%c0_63, %c0_64] : memref<8x32xf32, #tpu.memory_space<vmem>>, vector<8x32xf32>
      %115 = arith.addf %113, %114 : vector<8x32xf32>
      %c0_65 = arith.constant 0 : index
      %c0_66 = arith.constant 0 : index
      %116 = vector.load %arg26[%c0_65, %c0_66] : memref<8x32xf32, #tpu.memory_space<vmem>>, vector<8x32xf32>
      tpu.vector_store %arg26[%c0_65, %c0_66], %115 {strides = array<i32>} : memref<8x32xf32, #tpu.memory_space<vmem>>, vector<8x32xf32>,
      %c0_67 = arith.constant 0 : index
      %c0_68 = arith.constant 0 : index
      %117 = vector.load %arg34[%c0_67, %c0_68] : memref<1x32xf32, #tpu.memory_space<vmem>>, vector<1x32xf32>
      %cst_69 = arith.constant 6.250000e-02 : f32
      %118 = vector.broadcast %cst_69 : f32 to vector<1x32xf32>
      %119 = arith.mulf %117, %118 : vector<1x32xf32>
      %cst_70 = arith.constant dense<0.000000e+00> : vector<32xf32>
      %120 = vector.multi_reduction <add>, %113, %cst_70 [0] : vector<8x32xf32> to vector<32xf32>
      %121 = vector.shape_cast %120 : vector<32xf32> to vector<1x32xf32>
      %cst_71 = arith.constant 1.250000e-01 : f32
      %122 = vector.broadcast %cst_71 : f32 to vector<1x32xf32>
      %123 = arith.mulf %121, %122 : vector<1x32xf32>
      %c0_72 = arith.constant 0 : index
      %c0_73 = arith.constant 0 : index
      %124 = vector.load %arg21[%c0_72, %c0_73] : memref<96x64xf32, #tpu.memory_space<vmem>>, vector<96x64xf32>
      %125 = vector.extract_strided_slice %124 {offsets = [32, 0], sizes = [32, 64], strides = [1, 1]} : vector<96x64xf32> to vector<32x64xf32>
      %cst_74 = arith.constant dense<0.000000e+00> : vector<1x64xf32>
      %126 = tpu.matmul %119, %125, %cst_74 {dimension_numbers = #tpu.dot_dimension_numbers<[1], [0], [0], [1], [0, 0, 1, 1], [], []>} : vector<1x32xf32>, vector<32x64xf32>, vector<1x64xf32> -> vector<1x64xf32>
      %127 = vector.extract_strided_slice %124 {offsets = [64, 0], sizes = [32, 64], strides = [1, 1]} : vector<96x64xf32> to vector<32x64xf32>
      %cst_75 = arith.constant dense<0.000000e+00> : vector<1x64xf32>
      %128 = tpu.matmul %123, %127, %cst_75 {dimension_numbers = #tpu.dot_dimension_numbers<[1], [0], [0], [1], [0, 0, 1, 1], [], []>} : vector<1x32xf32>, vector<32x64xf32>, vector<1x64xf32> -> vector<1x64xf32>
      %129 = arith.addf %126, %128 : vector<1x64xf32>
      %c0_76 = arith.constant 0 : index
      %c0_77 = arith.constant 0 : index
      %130 = vector.load %arg32[%c0_76, %c0_77] : memref<1x64xf32, #tpu.memory_space<vmem>>, vector<1x64xf32>
      %131 = arith.addf %129, %130 : vector<1x64xf32>
      %cst_78 = arith.constant 0.000000e+00 : f32
      %132 = vector.broadcast %cst_78 : f32 to vector<1x64xf32>
      %133 = arith.maximumf %131, %132 : vector<1x64xf32>
      %134 = math.absf %131 : vector<1x64xf32>
      %cst_79 = arith.constant 0.000000e+00 : f32
      %135 = vector.broadcast %cst_79 : f32 to vector<1x64xf32>
      %136 = arith.subf %135, %134 : vector<1x64xf32>
      %137 = math.exp %136 : vector<1x64xf32>
      %138 = math.log1p %137 : vector<1x64xf32>
      %139 = arith.addf %133, %138 : vector<1x64xf32>
      %c0_80 = arith.constant 0 : index
      %c0_81 = arith.constant 0 : index
      %140 = vector.load %arg23[%c0_80, %c0_81] : memref<64x32xf32, #tpu.memory_space<vmem>>, vector<64x32xf32>
      %cst_82 = arith.constant dense<0.000000e+00> : vector<1x32xf32>
      %141 = tpu.matmul %139, %140, %cst_82 {dimension_numbers = #tpu.dot_dimension_numbers<[1], [0], [0], [1], [0, 0, 1, 1], [], []>} : vector<1x64xf32>, vector<64x32xf32>, vector<1x32xf32> -> vector<1x32xf32>
      %c0_83 = arith.constant 0 : index
      %c0_84 = arith.constant 0 : index
      %142 = vector.load %arg24[%c0_83, %c0_84] : memref<1x32xf32, #tpu.memory_space<vmem>>, vector<1x32xf32>
      %143 = arith.addf %141, %142 : vector<1x32xf32>
      %cst_85 = arith.constant 0.000000e+00 : f32
      %144 = vector.broadcast %cst_85 : f32 to vector<1x32xf32>
      %145 = arith.maximumf %143, %144 : vector<1x32xf32>
      %146 = math.absf %143 : vector<1x32xf32>
      %cst_86 = arith.constant 0.000000e+00 : f32
      %147 = vector.broadcast %cst_86 : f32 to vector<1x32xf32>
      %148 = arith.subf %147, %146 : vector<1x32xf32>
      %149 = math.exp %148 : vector<1x32xf32>
      %150 = math.log1p %149 : vector<1x32xf32>
      %151 = arith.addf %145, %150 : vector<1x32xf32>
      %c0_87 = arith.constant 0 : index
      %c0_88 = arith.constant 0 : index
      %152 = vector.load %arg6[%c0_87, %c0_88] : memref<1x32xf32, #tpu.memory_space<vmem>>, vector<1x32xf32>
      %153 = arith.addf %151, %152 : vector<1x32xf32>
      %c0_89 = arith.constant 0 : index
      %c0_90 = arith.constant 0 : index
      %154 = vector.load %arg27[%c0_89, %c0_90] : memref<1x32xf32, #tpu.memory_space<vmem>>, vector<1x32xf32>
      tpu.vector_store %arg27[%c0_89, %c0_90], %153 {strides = array<i32>} : memref<1x32xf32, #tpu.memory_space<vmem>>, vector<1x32xf32>,
    } else {
    }
    return
  }
  func.func @transform_0(%arg0: i32) -> (i32, i32) {
    %c0_i32 = arith.constant 0 : i32
    %c0_i32_0 = arith.constant 0 : i32
    return %arg0, %c0_i32 : i32, i32
  }
  func.func @transform_1(%arg0: i32) -> (i32, i32) {
    %c0_i32 = arith.constant 0 : i32
    %c0_i32_0 = arith.constant 0 : i32
    return %arg0, %c0_i32 : i32, i32
  }
  func.func @transform_2(%arg0: i32) -> (i32, i32) {
    %c0_i32 = arith.constant 0 : i32
    %c0_i32_0 = arith.constant 0 : i32
    return %arg0, %c0_i32 : i32, i32
  }
  func.func @transform_3(%arg0: i32) -> (i32, i32) {
    %c0_i32 = arith.constant 0 : i32
    %c0_i32_0 = arith.constant 0 : i32
    return %arg0, %c0_i32 : i32, i32
  }
  func.func @transform_4(%arg0: i32) -> (i32, i32) {
    %c0_i32 = arith.constant 0 : i32
    %c0_i32_0 = arith.constant 0 : i32
    %c0_i32_1 = arith.constant 0 : i32
    return %c0_i32, %c0_i32_0 : i32, i32
  }
  func.func @transform_5(%arg0: i32) -> (i32, i32) {
    %c0_i32 = arith.constant 0 : i32
    %c0_i32_0 = arith.constant 0 : i32
    %c0_i32_1 = arith.constant 0 : i32
    return %c0_i32, %c0_i32_0 : i32, i32
  }
  func.func @transform_6(%arg0: i32) -> (i32, i32) {
    %c0_i32 = arith.constant 0 : i32
    %c0_i32_0 = arith.constant 0 : i32
    %c0_i32_1 = arith.constant 0 : i32
    return %c0_i32, %c0_i32_0 : i32, i32
  }
  func.func @transform_7(%arg0: i32) -> (i32, i32) {
    %c0_i32 = arith.constant 0 : i32
    %c0_i32_0 = arith.constant 0 : i32
    %c0_i32_1 = arith.constant 0 : i32
    return %c0_i32, %c0_i32_0 : i32, i32
  }
  func.func @transform_8(%arg0: i32) -> (i32, i32) {
    %c0_i32 = arith.constant 0 : i32
    %c0_i32_0 = arith.constant 0 : i32
    %c0_i32_1 = arith.constant 0 : i32
    return %c0_i32, %c0_i32_0 : i32, i32
  }
  func.func @transform_9(%arg0: i32) -> (i32, i32) {
    %c0_i32 = arith.constant 0 : i32
    %c0_i32_0 = arith.constant 0 : i32
    %c0_i32_1 = arith.constant 0 : i32
    return %c0_i32, %c0_i32_0 : i32, i32
  }
  func.func @transform_10(%arg0: i32) -> (i32, i32) {
    %c0_i32 = arith.constant 0 : i32
    %c0_i32_0 = arith.constant 0 : i32
    %c0_i32_1 = arith.constant 0 : i32
    return %c0_i32, %c0_i32_0 : i32, i32
  }
  func.func @transform_11(%arg0: i32) -> (i32, i32) {
    %c0_i32 = arith.constant 0 : i32
    %c0_i32_0 = arith.constant 0 : i32
    %c0_i32_1 = arith.constant 0 : i32
    return %c0_i32, %c0_i32_0 : i32, i32
  }
  func.func @transform_12(%arg0: i32) -> (i32, i32) {
    %c0_i32 = arith.constant 0 : i32
    %c0_i32_0 = arith.constant 0 : i32
    %c0_i32_1 = arith.constant 0 : i32
    return %c0_i32, %c0_i32_0 : i32, i32
  }
  func.func @transform_13(%arg0: i32) -> (i32, i32) {
    %c0_i32 = arith.constant 0 : i32
    %c0_i32_0 = arith.constant 0 : i32
    %c0_i32_1 = arith.constant 0 : i32
    return %c0_i32, %c0_i32_0 : i32, i32
  }
  func.func @transform_14(%arg0: i32) -> (i32, i32) {
    %c0_i32 = arith.constant 0 : i32
    %c0_i32_0 = arith.constant 0 : i32
    %c0_i32_1 = arith.constant 0 : i32
    return %c0_i32, %c0_i32_0 : i32, i32
  }
  func.func @transform_15(%arg0: i32) -> (i32, i32) {
    %c0_i32 = arith.constant 0 : i32
    %c0_i32_0 = arith.constant 0 : i32
    %c0_i32_1 = arith.constant 0 : i32
    return %c0_i32, %c0_i32_0 : i32, i32
  }
  func.func @transform_16(%arg0: i32) -> (i32, i32) {
    %c0_i32 = arith.constant 0 : i32
    %c0_i32_0 = arith.constant 0 : i32
    %c0_i32_1 = arith.constant 0 : i32
    return %c0_i32, %c0_i32_0 : i32, i32
  }
  func.func @transform_17(%arg0: i32) -> (i32, i32) {
    %c0_i32 = arith.constant 0 : i32
    %c0_i32_0 = arith.constant 0 : i32
    %c0_i32_1 = arith.constant 0 : i32
    return %c0_i32, %c0_i32_0 : i32, i32
  }
  func.func @transform_18(%arg0: i32) -> (i32, i32) {
    %c0_i32 = arith.constant 0 : i32
    %c0_i32_0 = arith.constant 0 : i32
    %c0_i32_1 = arith.constant 0 : i32
    return %c0_i32, %c0_i32_0 : i32, i32
  }
  func.func @transform_19(%arg0: i32) -> (i32, i32) {
    %c0_i32 = arith.constant 0 : i32
    %c0_i32_0 = arith.constant 0 : i32
    %c0_i32_1 = arith.constant 0 : i32
    return %c0_i32, %c0_i32_0 : i32, i32
  }
  func.func @transform_20(%arg0: i32) -> (i32, i32) {
    %c0_i32 = arith.constant 0 : i32
    %c0_i32_0 = arith.constant 0 : i32
    %c0_i32_1 = arith.constant 0 : i32
    return %c0_i32, %c0_i32_0 : i32, i32
  }
  func.func @transform_21(%arg0: i32) -> (i32, i32) {
    %c0_i32 = arith.constant 0 : i32
    %c0_i32_0 = arith.constant 0 : i32
    %c0_i32_1 = arith.constant 0 : i32
    return %c0_i32, %c0_i32_0 : i32, i32
  }
  func.func @transform_22(%arg0: i32) -> (i32, i32) {
    %c0_i32 = arith.constant 0 : i32
    %c0_i32_0 = arith.constant 0 : i32
    %c0_i32_1 = arith.constant 0 : i32
    return %c0_i32, %c0_i32_0 : i32, i32
  }
  func.func @transform_23(%arg0: i32) -> (i32, i32) {
    %c0_i32 = arith.constant 0 : i32
    %c0_i32_0 = arith.constant 0 : i32
    %c0_i32_1 = arith.constant 0 : i32
    return %c0_i32, %c0_i32_0 : i32, i32
  }
  func.func @transform_24(%arg0: i32) -> (i32, i32) {
    %c0_i32 = arith.constant 0 : i32
    %c0_i32_0 = arith.constant 0 : i32
    return %arg0, %c0_i32 : i32, i32
  }
  func.func @transform_25(%arg0: i32) -> (i32, i32) {
    %c0_i32 = arith.constant 0 : i32
    %c0_i32_0 = arith.constant 0 : i32
    %c0_i32_1 = arith.constant 0 : i32
    return %c0_i32, %c0_i32_0 : i32, i32
  }
  func.func @transform_26(%arg0: i32) -> (i32, i32) {
    %c0_i32 = arith.constant 0 : i32
    %c0_i32_0 = arith.constant 0 : i32
    %c0_i32_1 = arith.constant 0 : i32
    return %c0_i32, %c0_i32_0 : i32, i32
  }
}

module attributes {stable_mosaic.version = 11 : i64} {
  func.func private @main(%arg0: i32) attributes {dimension_semantics = [#tpu.dimension_semantics<core_parallel>], iteration_bounds = array<i64: 2>, tpu.core_type = #tpu.core_type<sc_scalar_subcore>, window_params = []} {
    return
  }
}

module attributes {stable_mosaic.version = 11 : i64} {
  func.func private @main(%arg0: i32) attributes {dimension_semantics = [#tpu.dimension_semantics<core_parallel>], iteration_bounds = array<i64: 2>, tpu.core_type = #tpu.core_type<sc_scalar_subcore>, window_params = []} {
    return
  }
}

module attributes {stable_mosaic.version = 11 : i64} {
  func.func @_megnet_block_kernel(%arg0: i32, %arg1: memref<8x1xi32, #tpu.memory_space<vmem>>, %arg2: memref<8x1xi32, #tpu.memory_space<vmem>>, %arg3: memref<8x1xf32, #tpu.memory_space<vmem>>, %arg4: memref<8x32xf32, #tpu.memory_space<vmem>>, %arg5: memref<8x32xf32, #tpu.memory_space<vmem>>, %arg6: memref<1x32xf32, #tpu.memory_space<vmem>>, %arg7: memref<32x32xf32, #tpu.memory_space<vmem>>, %arg8: memref<1x32xf32, #tpu.memory_space<vmem>>, %arg9: memref<32x32xf32, #tpu.memory_space<vmem>>, %arg10: memref<1x32xf32, #tpu.memory_space<vmem>>, %arg11: memref<32x32xf32, #tpu.memory_space<vmem>>, %arg12: memref<1x32xf32, #tpu.memory_space<vmem>>, %arg13: memref<128x64xf32, #tpu.memory_space<vmem>>, %arg14: memref<1x64xf32, #tpu.memory_space<vmem>>, %arg15: memref<64x32xf32, #tpu.memory_space<vmem>>, %arg16: memref<1x32xf32, #tpu.memory_space<vmem>>, %arg17: memref<96x64xf32, #tpu.memory_space<vmem>>, %arg18: memref<1x64xf32, #tpu.memory_space<vmem>>, %arg19: memref<64x32xf32, #tpu.memory_space<vmem>>, %arg20: memref<1x32xf32, #tpu.memory_space<vmem>>, %arg21: memref<96x64xf32, #tpu.memory_space<vmem>>, %arg22: memref<1x64xf32, #tpu.memory_space<vmem>>, %arg23: memref<64x32xf32, #tpu.memory_space<vmem>>, %arg24: memref<1x32xf32, #tpu.memory_space<vmem>>, %arg25: memref<8x32xf32, #tpu.memory_space<vmem>>, %arg26: memref<8x32xf32, #tpu.memory_space<vmem>>, %arg27: memref<1x32xf32, #tpu.memory_space<vmem>>, %arg28: memref<8x64xbf16, #tpu.memory_space<vmem>>, %arg29: memref<8x64xbf16, #tpu.memory_space<vmem>>, %arg30: memref<1x64xf32, #tpu.memory_space<vmem>>, %arg31: memref<8x64xf32, #tpu.memory_space<vmem>>, %arg32: memref<1x64xf32, #tpu.memory_space<vmem>>, %arg33: memref<8x32xf32, #tpu.memory_space<vmem>>, %arg34: memref<1x32xf32, #tpu.memory_space<vmem>>, %arg35: memref<32x32xbf16, #tpu.memory_space<vmem>>, %arg36: memref<32x64xbf16, #tpu.memory_space<vmem>>, %arg37: memref<64x32xbf16, #tpu.memory_space<vmem>>) attributes {dimension_semantics = [#tpu.dimension_semantics<arbitrary>], iteration_bounds = array<i64: 2>, scalar_prefetch = 0 : i64, scratch_operands = 10 : i64, tpu.core_type = #tpu.core_type<tc>, window_params = [{transform_indices = @transform_0, window_bounds = array<i64: 8, 1>}, {transform_indices = @transform_1, window_bounds = array<i64: 8, 1>}, {transform_indices = @transform_2, window_bounds = array<i64: 8, 1>}, {transform_indices = @transform_3, window_bounds = array<i64: 8, 32>}, {pipeline_mode = #tpu.pipeline_mode<synchronous>, transform_indices = @transform_4, window_bounds = array<i64: 8, 32>}, {pipeline_mode = #tpu.pipeline_mode<synchronous>, transform_indices = @transform_5, window_bounds = array<i64: 1, 32>}, {pipeline_mode = #tpu.pipeline_mode<synchronous>, transform_indices = @transform_6, window_bounds = array<i64: 32, 32>}, {pipeline_mode = #tpu.pipeline_mode<synchronous>, transform_indices = @transform_7, window_bounds = array<i64: 1, 32>}, {pipeline_mode = #tpu.pipeline_mode<synchronous>, transform_indices = @transform_8, window_bounds = array<i64: 32, 32>}, {pipeline_mode = #tpu.pipeline_mode<synchronous>, transform_indices = @transform_9, window_bounds = array<i64: 1, 32>}, {pipeline_mode = #tpu.pipeline_mode<synchronous>, transform_indices = @transform_10, window_bounds = array<i64: 32, 32>}, {pipeline_mode = #tpu.pipeline_mode<synchronous>, transform_indices = @transform_11, window_bounds = array<i64: 1, 32>}, {pipeline_mode = #tpu.pipeline_mode<synchronous>, transform_indices = @transform_12, window_bounds = array<i64: 128, 64>}, {pipeline_mode = #tpu.pipeline_mode<synchronous>, transform_indices = @transform_13, window_bounds = array<i64: 1, 64>}, {pipeline_mode = #tpu.pipeline_mode<synchronous>, transform_indices = @transform_14, window_bounds = array<i64: 64, 32>}, {pipeline_mode = #tpu.pipeline_mode<synchronous>, transform_indices = @transform_15, window_bounds = array<i64: 1, 32>}, {pipeline_mode = #tpu.pipeline_mode<synchronous>, transform_indices = @transform_16, window_bounds = array<i64: 96, 64>}, {pipeline_mode = #tpu.pipeline_mode<synchronous>, transform_indices = @transform_17, window_bounds = array<i64: 1, 64>}, {pipeline_mode = #tpu.pipeline_mode<synchronous>, transform_indices = @transform_18, window_bounds = array<i64: 64, 32>}, {pipeline_mode = #tpu.pipeline_mode<synchronous>, transform_indices = @transform_19, window_bounds = array<i64: 1, 32>}, {pipeline_mode = #tpu.pipeline_mode<synchronous>, transform_indices = @transform_20, window_bounds = array<i64: 96, 64>}, {pipeline_mode = #tpu.pipeline_mode<synchronous>, transform_indices = @transform_21, window_bounds = array<i64: 1, 64>}, {pipeline_mode = #tpu.pipeline_mode<synchronous>, transform_indices = @transform_22, window_bounds = array<i64: 64, 32>}, {pipeline_mode = #tpu.pipeline_mode<synchronous>, transform_indices = @transform_23, window_bounds = array<i64: 1, 32>}, {transform_indices = @transform_24, window_bounds = array<i64: 8, 32>}, {pipeline_mode = #tpu.pipeline_mode<synchronous>, transform_indices = @transform_25, window_bounds = array<i64: 8, 32>}, {pipeline_mode = #tpu.pipeline_mode<synchronous>, transform_indices = @transform_26, window_bounds = array<i64: 1, 32>}]} {
    %c0_i32 = arith.constant 0 : i32
    %0 = arith.cmpi eq, %arg0, %c0_i32 : i32
    %1 = arith.extui %0 : i1 to i32
    %c0_i32_0 = arith.constant 0 : i32
    %2 = arith.cmpi ne, %1, %c0_i32_0 : i32
    scf.if %2 {
      %c0_47 = arith.constant 0 : index
      %c0_48 = arith.constant 0 : index
      %83 = vector.load %arg5[%c0_47, %c0_48] : memref<8x32xf32, #tpu.memory_space<vmem>>, vector<8x32xf32>
      %c0_49 = arith.constant 0 : index
      %c0_50 = arith.constant 0 : index
      %84 = vector.load %arg9[%c0_49, %c0_50] : memref<32x32xf32, #tpu.memory_space<vmem>>, vector<32x32xf32>
      %cst_51 = arith.constant dense<0.000000e+00> : vector<8x32xf32>
      %85 = tpu.matmul %83, %84, %cst_51 {dimension_numbers = #tpu.dot_dimension_numbers<[1], [0], [0], [1], [0, 0, 1, 1], [], []>} : vector<8x32xf32>, vector<32x32xf32>, vector<8x32xf32> -> vector<8x32xf32>
      %c0_52 = arith.constant 0 : index
      %c0_53 = arith.constant 0 : index
      %86 = vector.load %arg10[%c0_52, %c0_53] : memref<1x32xf32, #tpu.memory_space<vmem>>, vector<1x32xf32>
      %87 = vector.broadcast %86 : vector<1x32xf32> to vector<8x32xf32>
      %88 = arith.addf %85, %87 : vector<8x32xf32>
      %cst_54 = arith.constant 0.000000e+00 : f32
      %89 = vector.broadcast %cst_54 : f32 to vector<8x32xf32>
      %90 = arith.maximumf %88, %89 : vector<8x32xf32>
      %91 = math.absf %88 : vector<8x32xf32>
      %cst_55 = arith.constant 0.000000e+00 : f32
      %92 = vector.broadcast %cst_55 : f32 to vector<8x32xf32>
      %93 = arith.subf %92, %91 : vector<8x32xf32>
      %94 = math.exp %93 : vector<8x32xf32>
      %95 = math.log1p %94 : vector<8x32xf32>
      %96 = arith.addf %90, %95 : vector<8x32xf32>
      %c0_56 = arith.constant 0 : index
      %c0_57 = arith.constant 0 : index
      %97 = vector.load %arg6[%c0_56, %c0_57] : memref<1x32xf32, #tpu.memory_space<vmem>>, vector<1x32xf32>
      %c0_58 = arith.constant 0 : index
      %c0_59 = arith.constant 0 : index
      %98 = vector.load %arg11[%c0_58, %c0_59] : memref<32x32xf32, #tpu.memory_space<vmem>>, vector<32x32xf32>
      %cst_60 = arith.constant dense<0.000000e+00> : vector<1x32xf32>
      %99 = tpu.matmul %97, %98, %cst_60 {dimension_numbers = #tpu.dot_dimension_numbers<[1], [0], [0], [1], [0, 0, 1, 1], [], []>} : vector<1x32xf32>, vector<32x32xf32>, vector<1x32xf32> -> vector<1x32xf32>
      %c0_61 = arith.constant 0 : index
      %c0_62 = arith.constant 0 : index
      %100 = vector.load %arg12[%c0_61, %c0_62] : memref<1x32xf32, #tpu.memory_space<vmem>>, vector<1x32xf32>
      %101 = arith.addf %99, %100 : vector<1x32xf32>
      %cst_63 = arith.constant 0.000000e+00 : f32
      %102 = vector.broadcast %cst_63 : f32 to vector<1x32xf32>
      %103 = arith.maximumf %101, %102 : vector<1x32xf32>
      %104 = math.absf %101 : vector<1x32xf32>
      %cst_64 = arith.constant 0.000000e+00 : f32
      %105 = vector.broadcast %cst_64 : f32 to vector<1x32xf32>
      %106 = arith.subf %105, %104 : vector<1x32xf32>
      %107 = math.exp %106 : vector<1x32xf32>
      %108 = math.log1p %107 : vector<1x32xf32>
      %109 = arith.addf %103, %108 : vector<1x32xf32>
      %c0_65 = arith.constant 0 : index
      %c0_66 = arith.constant 0 : index
      %110 = vector.load %arg13[%c0_65, %c0_66] : memref<128x64xf32, #tpu.memory_space<vmem>>, vector<128x64xf32>
      %111 = vector.extract_strided_slice %110 {offsets = [0, 0], sizes = [32, 64], strides = [1, 1]} : vector<128x64xf32> to vector<32x64xf32>
      %cst_67 = arith.constant dense<0.000000e+00> : vector<8x64xf32>
      %112 = tpu.matmul %96, %111, %cst_67 {dimension_numbers = #tpu.dot_dimension_numbers<[1], [0], [0], [1], [0, 0, 1, 1], [], []>} : vector<8x32xf32>, vector<32x64xf32>, vector<8x64xf32> -> vector<8x64xf32>
      %113 = arith.truncf %112 : vector<8x64xf32> to vector<8x64xbf16>
      %c0_68 = arith.constant 0 : index
      %c0_69 = arith.constant 0 : index
      %114 = vector.load %arg28[%c0_68, %c0_69] : memref<8x64xbf16, #tpu.memory_space<vmem>>, vector<8x64xbf16>
      tpu.vector_store %arg28[%c0_68, %c0_69], %113 {strides = array<i32>} : memref<8x64xbf16, #tpu.memory_space<vmem>>, vector<8x64xbf16>,
      %115 = vector.extract_strided_slice %110 {offsets = [32, 0], sizes = [32, 64], strides = [1, 1]} : vector<128x64xf32> to vector<32x64xf32>
      %cst_70 = arith.constant dense<0.000000e+00> : vector<8x64xf32>
      %116 = tpu.matmul %96, %115, %cst_70 {dimension_numbers = #tpu.dot_dimension_numbers<[1], [0], [0], [1], [0, 0, 1, 1], [], []>} : vector<8x32xf32>, vector<32x64xf32>, vector<8x64xf32> -> vector<8x64xf32>
      %117 = arith.truncf %116 : vector<8x64xf32> to vector<8x64xbf16>
      %c0_71 = arith.constant 0 : index
      %c0_72 = arith.constant 0 : index
      %118 = vector.load %arg29[%c0_71, %c0_72] : memref<8x64xbf16, #tpu.memory_space<vmem>>, vector<8x64xbf16>
      tpu.vector_store %arg29[%c0_71, %c0_72], %117 {strides = array<i32>} : memref<8x64xbf16, #tpu.memory_space<vmem>>, vector<8x64xbf16>,
      %119 = vector.extract_strided_slice %110 {offsets = [96, 0], sizes = [32, 64], strides = [1, 1]} : vector<128x64xf32> to vector<32x64xf32>
      %cst_73 = arith.constant dense<0.000000e+00> : vector<1x64xf32>
      %120 = tpu.matmul %109, %119, %cst_73 {dimension_numbers = #tpu.dot_dimension_numbers<[1], [0], [0], [1], [0, 0, 1, 1], [], []>} : vector<1x32xf32>, vector<32x64xf32>, vector<1x64xf32> -> vector<1x64xf32>
      %c0_74 = arith.constant 0 : index
      %c0_75 = arith.constant 0 : index
      %121 = vector.load %arg14[%c0_74, %c0_75] : memref<1x64xf32, #tpu.memory_space<vmem>>, vector<1x64xf32>
      %122 = arith.addf %120, %121 : vector<1x64xf32>
      %c0_76 = arith.constant 0 : index
      %c0_77 = arith.constant 0 : index
      %123 = vector.load %arg30[%c0_76, %c0_77] : memref<1x64xf32, #tpu.memory_space<vmem>>, vector<1x64xf32>
      tpu.vector_store %arg30[%c0_76, %c0_77], %122 {strides = array<i32>} : memref<1x64xf32, #tpu.memory_space<vmem>>, vector<1x64xf32>,
      %c0_78 = arith.constant 0 : index
      %c0_79 = arith.constant 0 : index
      %124 = vector.load %arg17[%c0_78, %c0_79] : memref<96x64xf32, #tpu.memory_space<vmem>>, vector<96x64xf32>
      %125 = vector.extract_strided_slice %124 {offsets = [0, 0], sizes = [32, 64], strides = [1, 1]} : vector<96x64xf32> to vector<32x64xf32>
      %cst_80 = arith.constant dense<0.000000e+00> : vector<8x64xf32>
      %126 = tpu.matmul %96, %125, %cst_80 {dimension_numbers = #tpu.dot_dimension_numbers<[1], [0], [0], [1], [0, 0, 1, 1], [], []>} : vector<8x32xf32>, vector<32x64xf32>, vector<8x64xf32> -> vector<8x64xf32>
      %127 = vector.extract_strided_slice %124 {offsets = [64, 0], sizes = [32, 64], strides = [1, 1]} : vector<96x64xf32> to vector<32x64xf32>
      %cst_81 = arith.constant dense<0.000000e+00> : vector<1x64xf32>
      %128 = tpu.matmul %109, %127, %cst_81 {dimension_numbers = #tpu.dot_dimension_numbers<[1], [0], [0], [1], [0, 0, 1, 1], [], []>} : vector<1x32xf32>, vector<32x64xf32>, vector<1x64xf32> -> vector<1x64xf32>
      %129 = vector.broadcast %128 : vector<1x64xf32> to vector<8x64xf32>
      %130 = arith.addf %126, %129 : vector<8x64xf32>
      %c0_82 = arith.constant 0 : index
      %c0_83 = arith.constant 0 : index
      %131 = vector.load %arg18[%c0_82, %c0_83] : memref<1x64xf32, #tpu.memory_space<vmem>>, vector<1x64xf32>
      %132 = vector.broadcast %131 : vector<1x64xf32> to vector<8x64xf32>
      %133 = arith.addf %130, %132 : vector<8x64xf32>
      %c0_84 = arith.constant 0 : index
      %c0_85 = arith.constant 0 : index
      %134 = vector.load %arg31[%c0_84, %c0_85] : memref<8x64xf32, #tpu.memory_space<vmem>>, vector<8x64xf32>
      tpu.vector_store %arg31[%c0_84, %c0_85], %133 {strides = array<i32>} : memref<8x64xf32, #tpu.memory_space<vmem>>, vector<8x64xf32>,
      %c0_86 = arith.constant 0 : index
      %c0_87 = arith.constant 0 : index
      %135 = vector.load %arg21[%c0_86, %c0_87] : memref<96x64xf32, #tpu.memory_space<vmem>>, vector<96x64xf32>
      %136 = vector.extract_strided_slice %135 {offsets = [0, 0], sizes = [32, 64], strides = [1, 1]} : vector<96x64xf32> to vector<32x64xf32>
      %cst_88 = arith.constant dense<0.000000e+00> : vector<1x64xf32>
      %137 = tpu.matmul %109, %136, %cst_88 {dimension_numbers = #tpu.dot_dimension_numbers<[1], [0], [0], [1], [0, 0, 1, 1], [], []>} : vector<1x32xf32>, vector<32x64xf32>, vector<1x64xf32> -> vector<1x64xf32>
      %c0_89 = arith.constant 0 : index
      %c0_90 = arith.constant 0 : index
      %138 = vector.load %arg22[%c0_89, %c0_90] : memref<1x64xf32, #tpu.memory_space<vmem>>, vector<1x64xf32>
      %139 = arith.addf %137, %138 : vector<1x64xf32>
      %c0_91 = arith.constant 0 : index
      %c0_92 = arith.constant 0 : index
      %140 = vector.load %arg32[%c0_91, %c0_92] : memref<1x64xf32, #tpu.memory_space<vmem>>, vector<1x64xf32>
      tpu.vector_store %arg32[%c0_91, %c0_92], %139 {strides = array<i32>} : memref<1x64xf32, #tpu.memory_space<vmem>>, vector<1x64xf32>,
      %c0_93 = arith.constant 0 : index
      %c0_94 = arith.constant 0 : index
      %141 = vector.load %arg7[%c0_93, %c0_94] : memref<32x32xf32, #tpu.memory_space<vmem>>, vector<32x32xf32>
      %142 = arith.truncf %141 : vector<32x32xf32> to vector<32x32xbf16>
      %c0_95 = arith.constant 0 : index
      %c0_96 = arith.constant 0 : index
      %143 = vector.load %arg35[%c0_95, %c0_96] : memref<32x32xbf16, #tpu.memory_space<vmem>>, vector<32x32xbf16>
      tpu.vector_store %arg35[%c0_95, %c0_96], %142 {strides = array<i32>} : memref<32x32xbf16, #tpu.memory_space<vmem>>, vector<32x32xbf16>,
      %144 = vector.extract_strided_slice %110 {offsets = [64, 0], sizes = [32, 64], strides = [1, 1]} : vector<128x64xf32> to vector<32x64xf32>
      %145 = arith.truncf %144 : vector<32x64xf32> to vector<32x64xbf16>
      %c0_97 = arith.constant 0 : index
      %c0_98 = arith.constant 0 : index
      %146 = vector.load %arg36[%c0_97, %c0_98] : memref<32x64xbf16, #tpu.memory_space<vmem>>, vector<32x64xbf16>
      tpu.vector_store %arg36[%c0_97, %c0_98], %145 {strides = array<i32>} : memref<32x64xbf16, #tpu.memory_space<vmem>>, vector<32x64xbf16>,
      %c0_99 = arith.constant 0 : index
      %c0_100 = arith.constant 0 : index
      %147 = vector.load %arg15[%c0_99, %c0_100] : memref<64x32xf32, #tpu.memory_space<vmem>>, vector<64x32xf32>
      %148 = arith.truncf %147 : vector<64x32xf32> to vector<64x32xbf16>
      %c0_101 = arith.constant 0 : index
      %c0_102 = arith.constant 0 : index
      %149 = vector.load %arg37[%c0_101, %c0_102] : memref<64x32xbf16, #tpu.memory_space<vmem>>, vector<64x32xbf16>
      tpu.vector_store %arg37[%c0_101, %c0_102], %148 {strides = array<i32>} : memref<64x32xbf16, #tpu.memory_space<vmem>>, vector<64x32xbf16>,
      %cst_103 = arith.constant 0.000000e+00 : f32
      %150 = vector.broadcast %cst_103 : f32 to vector<8x32xf32>
      %c0_104 = arith.constant 0 : index
      %c0_105 = arith.constant 0 : index
      %151 = vector.load %arg33[%c0_104, %c0_105] : memref<8x32xf32, #tpu.memory_space<vmem>>, vector<8x32xf32>
      tpu.vector_store %arg33[%c0_104, %c0_105], %150 {strides = array<i32>} : memref<8x32xf32, #tpu.memory_space<vmem>>, vector<8x32xf32>,
      %cst_106 = arith.constant 0.000000e+00 : f32
      %152 = vector.broadcast %cst_106 : f32 to vector<1x32xf32>
      %c0_107 = arith.constant 0 : index
      %c0_108 = arith.constant 0 : index
      %153 = vector.load %arg34[%c0_107, %c0_108] : memref<1x32xf32, #tpu.memory_space<vmem>>, vector<1x32xf32>
      tpu.vector_store %arg34[%c0_107, %c0_108], %152 {strides = array<i32>} : memref<1x32xf32, #tpu.memory_space<vmem>>, vector<1x32xf32>,
    } else {
    }
    %c0 = arith.constant 0 : index
    %c0_1 = arith.constant 0 : index
    %3 = vector.load %arg4[%c0, %c0_1] : memref<8x32xf32, #tpu.memory_space<vmem>>, vector<8x32xf32>
    %4 = arith.truncf %3 : vector<8x32xf32> to vector<8x32xbf16>
    %c0_2 = arith.constant 0 : index
    %c0_3 = arith.constant 0 : index
    %5 = vector.load %arg35[%c0_2, %c0_3] : memref<32x32xbf16, #tpu.memory_space<vmem>>, vector<32x32xbf16>
    %cst = arith.constant dense<0.000000e+00> : vector<8x32xf32>
    %6 = tpu.matmul %4, %5, %cst {dimension_numbers = #tpu.dot_dimension_numbers<[1], [0], [0], [1], [0, 0, 1, 1], [], []>} : vector<8x32xbf16>, vector<32x32xbf16>, vector<8x32xf32> -> vector<8x32xf32>
    %c0_4 = arith.constant 0 : index
    %c0_5 = arith.constant 0 : index
    %7 = vector.load %arg8[%c0_4, %c0_5] : memref<1x32xf32, #tpu.memory_space<vmem>>, vector<1x32xf32>
    %8 = vector.broadcast %7 : vector<1x32xf32> to vector<8x32xf32>
    %9 = arith.addf %6, %8 : vector<8x32xf32>
    %cst_6 = arith.constant 0.000000e+00 : f32
    %10 = vector.broadcast %cst_6 : f32 to vector<8x32xf32>
    %11 = arith.maximumf %9, %10 : vector<8x32xf32>
    %12 = math.absf %9 : vector<8x32xf32>
    %cst_7 = arith.constant 0.000000e+00 : f32
    %13 = vector.broadcast %cst_7 : f32 to vector<8x32xf32>
    %14 = arith.subf %13, %12 : vector<8x32xf32>
    %15 = math.exp %14 : vector<8x32xf32>
    %16 = math.log1p %15 : vector<8x32xf32>
    %17 = arith.addf %11, %16 : vector<8x32xf32>
    %18 = tpu.iota {dimensions = array<i32: 1>} : vector<8x8xi32>
    %c0_8 = arith.constant 0 : index
    %c0_9 = arith.constant 0 : index
    %19 = vector.load %arg1[%c0_8, %c0_9] : memref<8x1xi32, #tpu.memory_space<vmem>>, vector<8x1xi32>
    %20 = vector.broadcast %19 : vector<8x1xi32> to vector<8x8xi32>
    %21 = arith.cmpi eq, %20, %18 : vector<8x8xi32>
    %22 = arith.extui %21 : vector<8x8xi1> to vector<8x8xi32>
    %23 = arith.sitofp %22 : vector<8x8xi32> to vector<8x8xf32>
    %24 = arith.truncf %23 : vector<8x8xf32> to vector<8x8xbf16>
    %c0_10 = arith.constant 0 : index
    %c0_11 = arith.constant 0 : index
    %25 = vector.load %arg2[%c0_10, %c0_11] : memref<8x1xi32, #tpu.memory_space<vmem>>, vector<8x1xi32>
    %26 = vector.broadcast %25 : vector<8x1xi32> to vector<8x8xi32>
    %27 = arith.cmpi eq, %26, %18 : vector<8x8xi32>
    %28 = arith.extui %27 : vector<8x8xi1> to vector<8x8xi32>
    %29 = arith.sitofp %28 : vector<8x8xi32> to vector<8x8xf32>
    %30 = arith.truncf %29 : vector<8x8xf32> to vector<8x8xbf16>
    %c0_12 = arith.constant 0 : index
    %c0_13 = arith.constant 0 : index
    %31 = vector.load %arg28[%c0_12, %c0_13] : memref<8x64xbf16, #tpu.memory_space<vmem>>, vector<8x64xbf16>
    %cst_14 = arith.constant dense<0.000000e+00> : vector<8x64xf32>
    %32 = tpu.matmul %24, %31, %cst_14 {dimension_numbers = #tpu.dot_dimension_numbers<[1], [0], [0], [1], [0, 0, 1, 1], [], []>} : vector<8x8xbf16>, vector<8x64xbf16>, vector<8x64xf32> -> vector<8x64xf32>
    %c0_15 = arith.constant 0 : index
    %c0_16 = arith.constant 0 : index
    %33 = vector.load %arg29[%c0_15, %c0_16] : memref<8x64xbf16, #tpu.memory_space<vmem>>, vector<8x64xbf16>
    %cst_17 = arith.constant dense<0.000000e+00> : vector<8x64xf32>
    %34 = tpu.matmul %30, %33, %cst_17 {dimension_numbers = #tpu.dot_dimension_numbers<[1], [0], [0], [1], [0, 0, 1, 1], [], []>} : vector<8x8xbf16>, vector<8x64xbf16>, vector<8x64xf32> -> vector<8x64xf32>
    %35 = arith.addf %32, %34 : vector<8x64xf32>
    %36 = arith.truncf %17 : vector<8x32xf32> to vector<8x32xbf16>
    %c0_18 = arith.constant 0 : index
    %c0_19 = arith.constant 0 : index
    %37 = vector.load %arg36[%c0_18, %c0_19] : memref<32x64xbf16, #tpu.memory_space<vmem>>, vector<32x64xbf16>
    %cst_20 = arith.constant dense<0.000000e+00> : vector<8x64xf32>
    %38 = tpu.matmul %36, %37, %cst_20 {dimension_numbers = #tpu.dot_dimension_numbers<[1], [0], [0], [1], [0, 0, 1, 1], [], []>} : vector<8x32xbf16>, vector<32x64xbf16>, vector<8x64xf32> -> vector<8x64xf32>
    %39 = arith.addf %35, %38 : vector<8x64xf32>
    %c0_21 = arith.constant 0 : index
    %c0_22 = arith.constant 0 : index
    %40 = vector.load %arg30[%c0_21, %c0_22] : memref<1x64xf32, #tpu.memory_space<vmem>>, vector<1x64xf32>
    %41 = vector.broadcast %40 : vector<1x64xf32> to vector<8x64xf32>
    %42 = arith.addf %39, %41 : vector<8x64xf32>
    %cst_23 = arith.constant 0.000000e+00 : f32
    %43 = vector.broadcast %cst_23 : f32 to vector<8x64xf32>
    %44 = arith.maximumf %42, %43 : vector<8x64xf32>
    %45 = math.absf %42 : vector<8x64xf32>
    %cst_24 = arith.constant 0.000000e+00 : f32
    %46 = vector.broadcast %cst_24 : f32 to vector<8x64xf32>
    %47 = arith.subf %46, %45 : vector<8x64xf32>
    %48 = math.exp %47 : vector<8x64xf32>
    %49 = math.log1p %48 : vector<8x64xf32>
    %50 = arith.addf %44, %49 : vector<8x64xf32>
    %51 = arith.truncf %50 : vector<8x64xf32> to vector<8x64xbf16>
    %c0_25 = arith.constant 0 : index
    %c0_26 = arith.constant 0 : index
    %52 = vector.load %arg37[%c0_25, %c0_26] : memref<64x32xbf16, #tpu.memory_space<vmem>>, vector<64x32xbf16>
    %cst_27 = arith.constant dense<0.000000e+00> : vector<8x32xf32>
    %53 = tpu.matmul %51, %52, %cst_27 {dimension_numbers = #tpu.dot_dimension_numbers<[1], [0], [0], [1], [0, 0, 1, 1], [], []>} : vector<8x64xbf16>, vector<64x32xbf16>, vector<8x32xf32> -> vector<8x32xf32>
    %c0_28 = arith.constant 0 : index
    %c0_29 = arith.constant 0 : index
    %54 = vector.load %arg16[%c0_28, %c0_29] : memref<1x32xf32, #tpu.memory_space<vmem>>, vector<1x32xf32>
    %55 = vector.broadcast %54 : vector<1x32xf32> to vector<8x32xf32>
    %56 = arith.addf %53, %55 : vector<8x32xf32>
    %cst_30 = arith.constant 0.000000e+00 : f32
    %57 = vector.broadcast %cst_30 : f32 to vector<8x32xf32>
    %58 = arith.maximumf %56, %57 : vector<8x32xf32>
    %59 = math.absf %56 : vector<8x32xf32>
    %cst_31 = arith.constant 0.000000e+00 : f32
    %60 = vector.broadcast %cst_31 : f32 to vector<8x32xf32>
    %61 = arith.subf %60, %59 : vector<8x32xf32>
    %62 = math.exp %61 : vector<8x32xf32>
    %63 = math.log1p %62 : vector<8x32xf32>
    %64 = arith.addf %58, %63 : vector<8x32xf32>
    %65 = arith.addf %64, %3 : vector<8x32xf32>
    %c0_32 = arith.constant 0 : index
    %c0_33 = arith.constant 0 : index
    %66 = vector.load %arg25[%c0_32, %c0_33] : memref<8x32xf32, #tpu.memory_space<vmem>>, vector<8x32xf32>
    tpu.vector_store %arg25[%c0_32, %c0_33], %65 {strides = array<i32>} : memref<8x32xf32, #tpu.memory_space<vmem>>, vector<8x32xf32>,
    %c0_34 = arith.constant 0 : index
    %c0_35 = arith.constant 0 : index
    %67 = vector.load %arg3[%c0_34, %c0_35] : memref<8x1xf32, #tpu.memory_space<vmem>>, vector<8x1xf32>
    %68 = vector.broadcast %67 : vector<8x1xf32> to vector<8x32xf32>
    %69 = arith.mulf %64, %68 : vector<8x32xf32>
    %70 = arith.truncf %69 : vector<8x32xf32> to vector<8x32xbf16>
    %c0_36 = arith.constant 0 : index
    %c0_37 = arith.constant 0 : index
    %71 = vector.load %arg33[%c0_36, %c0_37] : memref<8x32xf32, #tpu.memory_space<vmem>>, vector<8x32xf32>
    %cst_38 = arith.constant dense<0.000000e+00> : vector<8x32xf32>
    %72 = tpu.matmul %30, %70, %cst_38 {dimension_numbers = #tpu.dot_dimension_numbers<[0], [0], [1], [1], [0, 1, 1, 1], [], []>} : vector<8x8xbf16>, vector<8x32xbf16>, vector<8x32xf32> -> vector<8x32xf32>
    %73 = arith.addf %71, %72 : vector<8x32xf32>
    %c0_39 = arith.constant 0 : index
    %c0_40 = arith.constant 0 : index
    %74 = vector.load %arg33[%c0_39, %c0_40] : memref<8x32xf32, #tpu.memory_space<vmem>>, vector<8x32xf32>
    tpu.vector_store %arg33[%c0_39, %c0_40], %73 {strides = array<i32>} : memref<8x32xf32, #tpu.memory_space<vmem>>, vector<8x32xf32>,
    %c0_41 = arith.constant 0 : index
    %c0_42 = arith.constant 0 : index
    %75 = vector.load %arg34[%c0_41, %c0_42] : memref<1x32xf32, #tpu.memory_space<vmem>>, vector<1x32xf32>
    %cst_43 = arith.constant dense<0.000000e+00> : vector<32xf32>
    %76 = vector.multi_reduction <add>, %64, %cst_43 [0] : vector<8x32xf32> to vector<32xf32>
    %77 = vector.shape_cast %76 : vector<32xf32> to vector<1x32xf32>
    %78 = arith.addf %75, %77 : vector<1x32xf32>
    %c0_44 = arith.constant 0 : index
    %c0_45 = arith.constant 0 : index
    %79 = vector.load %arg34[%c0_44, %c0_45] : memref<1x32xf32, #tpu.memory_space<vmem>>, vector<1x32xf32>
    tpu.vector_store %arg34[%c0_44, %c0_45], %78 {strides = array<i32>} : memref<1x32xf32, #tpu.memory_space<vmem>>, vector<1x32xf32>,
    %c1_i32 = arith.constant 1 : i32
    %80 = arith.cmpi eq, %arg0, %c1_i32 : i32
    %81 = arith.extui %80 : i1 to i32
    %c0_i32_46 = arith.constant 0 : i32
    %82 = arith.cmpi ne, %81, %c0_i32_46 : i32
    scf.if %82 {
      %c0_47 = arith.constant 0 : index
      %c0_48 = arith.constant 0 : index
      %83 = vector.load %arg33[%c0_47, %c0_48] : memref<8x32xf32, #tpu.memory_space<vmem>>, vector<8x32xf32>
      %c0_49 = arith.constant 0 : index
      %c0_50 = arith.constant 0 : index
      %84 = vector.load %arg17[%c0_49, %c0_50] : memref<96x64xf32, #tpu.memory_space<vmem>>, vector<96x64xf32>
      %85 = vector.extract_strided_slice %84 {offsets = [32, 0], sizes = [32, 64], strides = [1, 1]} : vector<96x64xf32> to vector<32x64xf32>
      %86 = arith.truncf %83 : vector<8x32xf32> to vector<8x32xbf16>
      %87 = arith.truncf %85 : vector<32x64xf32> to vector<32x64xbf16>
      %cst_51 = arith.constant dense<0.000000e+00> : vector<8x64xf32>
      %88 = tpu.matmul %86, %87, %cst_51 {dimension_numbers = #tpu.dot_dimension_numbers<[1], [0], [0], [1], [0, 0, 1, 1], [], []>} : vector<8x32xbf16>, vector<32x64xbf16>, vector<8x64xf32> -> vector<8x64xf32>
      %c0_52 = arith.constant 0 : index
      %c0_53 = arith.constant 0 : index
      %89 = vector.load %arg31[%c0_52, %c0_53] : memref<8x64xf32, #tpu.memory_space<vmem>>, vector<8x64xf32>
      %90 = arith.addf %88, %89 : vector<8x64xf32>
      %cst_54 = arith.constant 0.000000e+00 : f32
      %91 = vector.broadcast %cst_54 : f32 to vector<8x64xf32>
      %92 = arith.maximumf %90, %91 : vector<8x64xf32>
      %93 = math.absf %90 : vector<8x64xf32>
      %cst_55 = arith.constant 0.000000e+00 : f32
      %94 = vector.broadcast %cst_55 : f32 to vector<8x64xf32>
      %95 = arith.subf %94, %93 : vector<8x64xf32>
      %96 = math.exp %95 : vector<8x64xf32>
      %97 = math.log1p %96 : vector<8x64xf32>
      %98 = arith.addf %92, %97 : vector<8x64xf32>
      %99 = arith.truncf %98 : vector<8x64xf32> to vector<8x64xbf16>
      %c0_56 = arith.constant 0 : index
      %c0_57 = arith.constant 0 : index
      %100 = vector.load %arg19[%c0_56, %c0_57] : memref<64x32xf32, #tpu.memory_space<vmem>>, vector<64x32xf32>
      %101 = arith.truncf %100 : vector<64x32xf32> to vector<64x32xbf16>
      %cst_58 = arith.constant dense<0.000000e+00> : vector<8x32xf32>
      %102 = tpu.matmul %99, %101, %cst_58 {dimension_numbers = #tpu.dot_dimension_numbers<[1], [0], [0], [1], [0, 0, 1, 1], [], []>} : vector<8x64xbf16>, vector<64x32xbf16>, vector<8x32xf32> -> vector<8x32xf32>
      %c0_59 = arith.constant 0 : index
      %c0_60 = arith.constant 0 : index
      %103 = vector.load %arg20[%c0_59, %c0_60] : memref<1x32xf32, #tpu.memory_space<vmem>>, vector<1x32xf32>
      %104 = vector.broadcast %103 : vector<1x32xf32> to vector<8x32xf32>
      %105 = arith.addf %102, %104 : vector<8x32xf32>
      %cst_61 = arith.constant 0.000000e+00 : f32
      %106 = vector.broadcast %cst_61 : f32 to vector<8x32xf32>
      %107 = arith.maximumf %105, %106 : vector<8x32xf32>
      %108 = math.absf %105 : vector<8x32xf32>
      %cst_62 = arith.constant 0.000000e+00 : f32
      %109 = vector.broadcast %cst_62 : f32 to vector<8x32xf32>
      %110 = arith.subf %109, %108 : vector<8x32xf32>
      %111 = math.exp %110 : vector<8x32xf32>
      %112 = math.log1p %111 : vector<8x32xf32>
      %113 = arith.addf %107, %112 : vector<8x32xf32>
      %c0_63 = arith.constant 0 : index
      %c0_64 = arith.constant 0 : index
      %114 = vector.load %arg5[%c0_63, %c0_64] : memref<8x32xf32, #tpu.memory_space<vmem>>, vector<8x32xf32>
      %115 = arith.addf %113, %114 : vector<8x32xf32>
      %c0_65 = arith.constant 0 : index
      %c0_66 = arith.constant 0 : index
      %116 = vector.load %arg26[%c0_65, %c0_66] : memref<8x32xf32, #tpu.memory_space<vmem>>, vector<8x32xf32>
      tpu.vector_store %arg26[%c0_65, %c0_66], %115 {strides = array<i32>} : memref<8x32xf32, #tpu.memory_space<vmem>>, vector<8x32xf32>,
      %c0_67 = arith.constant 0 : index
      %c0_68 = arith.constant 0 : index
      %117 = vector.load %arg34[%c0_67, %c0_68] : memref<1x32xf32, #tpu.memory_space<vmem>>, vector<1x32xf32>
      %cst_69 = arith.constant 6.250000e-02 : f32
      %118 = vector.broadcast %cst_69 : f32 to vector<1x32xf32>
      %119 = arith.mulf %117, %118 : vector<1x32xf32>
      %cst_70 = arith.constant dense<0.000000e+00> : vector<32xf32>
      %120 = vector.multi_reduction <add>, %113, %cst_70 [0] : vector<8x32xf32> to vector<32xf32>
      %121 = vector.shape_cast %120 : vector<32xf32> to vector<1x32xf32>
      %cst_71 = arith.constant 1.250000e-01 : f32
      %122 = vector.broadcast %cst_71 : f32 to vector<1x32xf32>
      %123 = arith.mulf %121, %122 : vector<1x32xf32>
      %c0_72 = arith.constant 0 : index
      %c0_73 = arith.constant 0 : index
      %124 = vector.load %arg21[%c0_72, %c0_73] : memref<96x64xf32, #tpu.memory_space<vmem>>, vector<96x64xf32>
      %125 = vector.extract_strided_slice %124 {offsets = [32, 0], sizes = [32, 64], strides = [1, 1]} : vector<96x64xf32> to vector<32x64xf32>
      %cst_74 = arith.constant dense<0.000000e+00> : vector<1x64xf32>
      %126 = tpu.matmul %119, %125, %cst_74 {dimension_numbers = #tpu.dot_dimension_numbers<[1], [0], [0], [1], [0, 0, 1, 1], [], []>} : vector<1x32xf32>, vector<32x64xf32>, vector<1x64xf32> -> vector<1x64xf32>
      %127 = vector.extract_strided_slice %124 {offsets = [64, 0], sizes = [32, 64], strides = [1, 1]} : vector<96x64xf32> to vector<32x64xf32>
      %cst_75 = arith.constant dense<0.000000e+00> : vector<1x64xf32>
      %128 = tpu.matmul %123, %127, %cst_75 {dimension_numbers = #tpu.dot_dimension_numbers<[1], [0], [0], [1], [0, 0, 1, 1], [], []>} : vector<1x32xf32>, vector<32x64xf32>, vector<1x64xf32> -> vector<1x64xf32>
      %129 = arith.addf %126, %128 : vector<1x64xf32>
      %c0_76 = arith.constant 0 : index
      %c0_77 = arith.constant 0 : index
      %130 = vector.load %arg32[%c0_76, %c0_77] : memref<1x64xf32, #tpu.memory_space<vmem>>, vector<1x64xf32>
      %131 = arith.addf %129, %130 : vector<1x64xf32>
      %cst_78 = arith.constant 0.000000e+00 : f32
      %132 = vector.broadcast %cst_78 : f32 to vector<1x64xf32>
      %133 = arith.maximumf %131, %132 : vector<1x64xf32>
      %134 = math.absf %131 : vector<1x64xf32>
      %cst_79 = arith.constant 0.000000e+00 : f32
      %135 = vector.broadcast %cst_79 : f32 to vector<1x64xf32>
      %136 = arith.subf %135, %134 : vector<1x64xf32>
      %137 = math.exp %136 : vector<1x64xf32>
      %138 = math.log1p %137 : vector<1x64xf32>
      %139 = arith.addf %133, %138 : vector<1x64xf32>
      %c0_80 = arith.constant 0 : index
      %c0_81 = arith.constant 0 : index
      %140 = vector.load %arg23[%c0_80, %c0_81] : memref<64x32xf32, #tpu.memory_space<vmem>>, vector<64x32xf32>
      %cst_82 = arith.constant dense<0.000000e+00> : vector<1x32xf32>
      %141 = tpu.matmul %139, %140, %cst_82 {dimension_numbers = #tpu.dot_dimension_numbers<[1], [0], [0], [1], [0, 0, 1, 1], [], []>} : vector<1x64xf32>, vector<64x32xf32>, vector<1x32xf32> -> vector<1x32xf32>
      %c0_83 = arith.constant 0 : index
      %c0_84 = arith.constant 0 : index
      %142 = vector.load %arg24[%c0_83, %c0_84] : memref<1x32xf32, #tpu.memory_space<vmem>>, vector<1x32xf32>
      %143 = arith.addf %141, %142 : vector<1x32xf32>
      %cst_85 = arith.constant 0.000000e+00 : f32
      %144 = vector.broadcast %cst_85 : f32 to vector<1x32xf32>
      %145 = arith.maximumf %143, %144 : vector<1x32xf32>
      %146 = math.absf %143 : vector<1x32xf32>
      %cst_86 = arith.constant 0.000000e+00 : f32
      %147 = vector.broadcast %cst_86 : f32 to vector<1x32xf32>
      %148 = arith.subf %147, %146 : vector<1x32xf32>
      %149 = math.exp %148 : vector<1x32xf32>
      %150 = math.log1p %149 : vector<1x32xf32>
      %151 = arith.addf %145, %150 : vector<1x32xf32>
      %c0_87 = arith.constant 0 : index
      %c0_88 = arith.constant 0 : index
      %152 = vector.load %arg6[%c0_87, %c0_88] : memref<1x32xf32, #tpu.memory_space<vmem>>, vector<1x32xf32>
      %153 = arith.addf %151, %152 : vector<1x32xf32>
      %c0_89 = arith.constant 0 : index
      %c0_90 = arith.constant 0 : index
      %154 = vector.load %arg27[%c0_89, %c0_90] : memref<1x32xf32, #tpu.memory_space<vmem>>, vector<1x32xf32>
      tpu.vector_store %arg27[%c0_89, %c0_90], %153 {strides = array<i32>} : memref<1x32xf32, #tpu.memory_space<vmem>>, vector<1x32xf32>,
    } else {
    }
    return
  }
  func.func @transform_0(%arg0: i32) -> (i32, i32) {
    %c0_i32 = arith.constant 0 : i32
    %c0_i32_0 = arith.constant 0 : i32
    return %arg0, %c0_i32 : i32, i32
  }
  func.func @transform_1(%arg0: i32) -> (i32, i32) {
    %c0_i32 = arith.constant 0 : i32
    %c0_i32_0 = arith.constant 0 : i32
    return %arg0, %c0_i32 : i32, i32
  }
  func.func @transform_2(%arg0: i32) -> (i32, i32) {
    %c0_i32 = arith.constant 0 : i32
    %c0_i32_0 = arith.constant 0 : i32
    return %arg0, %c0_i32 : i32, i32
  }
  func.func @transform_3(%arg0: i32) -> (i32, i32) {
    %c0_i32 = arith.constant 0 : i32
    %c0_i32_0 = arith.constant 0 : i32
    return %arg0, %c0_i32 : i32, i32
  }
  func.func @transform_4(%arg0: i32) -> (i32, i32) {
    %c0_i32 = arith.constant 0 : i32
    %c0_i32_0 = arith.constant 0 : i32
    %c0_i32_1 = arith.constant 0 : i32
    return %c0_i32, %c0_i32_0 : i32, i32
  }
  func.func @transform_5(%arg0: i32) -> (i32, i32) {
    %c0_i32 = arith.constant 0 : i32
    %c0_i32_0 = arith.constant 0 : i32
    %c0_i32_1 = arith.constant 0 : i32
    return %c0_i32, %c0_i32_0 : i32, i32
  }
  func.func @transform_6(%arg0: i32) -> (i32, i32) {
    %c0_i32 = arith.constant 0 : i32
    %c0_i32_0 = arith.constant 0 : i32
    %c0_i32_1 = arith.constant 0 : i32
    return %c0_i32, %c0_i32_0 : i32, i32
  }
  func.func @transform_7(%arg0: i32) -> (i32, i32) {
    %c0_i32 = arith.constant 0 : i32
    %c0_i32_0 = arith.constant 0 : i32
    %c0_i32_1 = arith.constant 0 : i32
    return %c0_i32, %c0_i32_0 : i32, i32
  }
  func.func @transform_8(%arg0: i32) -> (i32, i32) {
    %c0_i32 = arith.constant 0 : i32
    %c0_i32_0 = arith.constant 0 : i32
    %c0_i32_1 = arith.constant 0 : i32
    return %c0_i32, %c0_i32_0 : i32, i32
  }
  func.func @transform_9(%arg0: i32) -> (i32, i32) {
    %c0_i32 = arith.constant 0 : i32
    %c0_i32_0 = arith.constant 0 : i32
    %c0_i32_1 = arith.constant 0 : i32
    return %c0_i32, %c0_i32_0 : i32, i32
  }
  func.func @transform_10(%arg0: i32) -> (i32, i32) {
    %c0_i32 = arith.constant 0 : i32
    %c0_i32_0 = arith.constant 0 : i32
    %c0_i32_1 = arith.constant 0 : i32
    return %c0_i32, %c0_i32_0 : i32, i32
  }
  func.func @transform_11(%arg0: i32) -> (i32, i32) {
    %c0_i32 = arith.constant 0 : i32
    %c0_i32_0 = arith.constant 0 : i32
    %c0_i32_1 = arith.constant 0 : i32
    return %c0_i32, %c0_i32_0 : i32, i32
  }
  func.func @transform_12(%arg0: i32) -> (i32, i32) {
    %c0_i32 = arith.constant 0 : i32
    %c0_i32_0 = arith.constant 0 : i32
    %c0_i32_1 = arith.constant 0 : i32
    return %c0_i32, %c0_i32_0 : i32, i32
  }
  func.func @transform_13(%arg0: i32) -> (i32, i32) {
    %c0_i32 = arith.constant 0 : i32
    %c0_i32_0 = arith.constant 0 : i32
    %c0_i32_1 = arith.constant 0 : i32
    return %c0_i32, %c0_i32_0 : i32, i32
  }
  func.func @transform_14(%arg0: i32) -> (i32, i32) {
    %c0_i32 = arith.constant 0 : i32
    %c0_i32_0 = arith.constant 0 : i32
    %c0_i32_1 = arith.constant 0 : i32
    return %c0_i32, %c0_i32_0 : i32, i32
  }
  func.func @transform_15(%arg0: i32) -> (i32, i32) {
    %c0_i32 = arith.constant 0 : i32
    %c0_i32_0 = arith.constant 0 : i32
    %c0_i32_1 = arith.constant 0 : i32
    return %c0_i32, %c0_i32_0 : i32, i32
  }
  func.func @transform_16(%arg0: i32) -> (i32, i32) {
    %c0_i32 = arith.constant 0 : i32
    %c0_i32_0 = arith.constant 0 : i32
    %c0_i32_1 = arith.constant 0 : i32
    return %c0_i32, %c0_i32_0 : i32, i32
  }
  func.func @transform_17(%arg0: i32) -> (i32, i32) {
    %c0_i32 = arith.constant 0 : i32
    %c0_i32_0 = arith.constant 0 : i32
    %c0_i32_1 = arith.constant 0 : i32
    return %c0_i32, %c0_i32_0 : i32, i32
  }
  func.func @transform_18(%arg0: i32) -> (i32, i32) {
    %c0_i32 = arith.constant 0 : i32
    %c0_i32_0 = arith.constant 0 : i32
    %c0_i32_1 = arith.constant 0 : i32
    return %c0_i32, %c0_i32_0 : i32, i32
  }
  func.func @transform_19(%arg0: i32) -> (i32, i32) {
    %c0_i32 = arith.constant 0 : i32
    %c0_i32_0 = arith.constant 0 : i32
    %c0_i32_1 = arith.constant 0 : i32
    return %c0_i32, %c0_i32_0 : i32, i32
  }
  func.func @transform_20(%arg0: i32) -> (i32, i32) {
    %c0_i32 = arith.constant 0 : i32
    %c0_i32_0 = arith.constant 0 : i32
    %c0_i32_1 = arith.constant 0 : i32
    return %c0_i32, %c0_i32_0 : i32, i32
  }
  func.func @transform_21(%arg0: i32) -> (i32, i32) {
    %c0_i32 = arith.constant 0 : i32
    %c0_i32_0 = arith.constant 0 : i32
    %c0_i32_1 = arith.constant 0 : i32
    return %c0_i32, %c0_i32_0 : i32, i32
  }
  func.func @transform_22(%arg0: i32) -> (i32, i32) {
    %c0_i32 = arith.constant 0 : i32
    %c0_i32_0 = arith.constant 0 : i32
    %c0_i32_1 = arith.constant 0 : i32
    return %c0_i32, %c0_i32_0 : i32, i32
  }
  func.func @transform_23(%arg0: i32) -> (i32, i32) {
    %c0_i32 = arith.constant 0 : i32
    %c0_i32_0 = arith.constant 0 : i32
    %c0_i32_1 = arith.constant 0 : i32
    return %c0_i32, %c0_i32_0 : i32, i32
  }
  func.func @transform_24(%arg0: i32) -> (i32, i32) {
    %c0_i32 = arith.constant 0 : i32
    %c0_i32_0 = arith.constant 0 : i32
    return %arg0, %c0_i32 : i32, i32
  }
  func.func @transform_25(%arg0: i32) -> (i32, i32) {
    %c0_i32 = arith.constant 0 : i32
    %c0_i32_0 = arith.constant 0 : i32
    %c0_i32_1 = arith.constant 0 : i32
    return %c0_i32, %c0_i32_0 : i32, i32
  }
  func.func @transform_26(%arg0: i32) -> (i32, i32) {
    %c0_i32 = arith.constant 0 : i32
    %c0_i32_0 = arith.constant 0 : i32
    %c0_i32_1 = arith.constant 0 : i32
    return %c0_i32, %c0_i32_0 : i32, i32
  }
}

</mosaic_0001>

<bundles_post_ra>
// kernel: megnet_block_forward.1
= control target key start
LH: loop header
LB: loop body
LE: loop exit
PB: predicated region body
PF: predicated region fallthrough
CT: control target
= control target key end

     0   :  { %s3896_s0 = inlined_call_operand.vmem [shape: s32[16,1], index: 0, kind: input, shape index: {}]   ;;  %s3897_s1 = inlined_call_operand.vmem [shape: s32[16,1], index: 1, kind: input, shape index: {}]   ;;  %s3898_s2 = inlined_call_operand.vmem [shape: f32[16,1], index: 2, kind: input, shape index: {}]   ;;  %s3899_s3 = inlined_call_operand.vmem [shape: f32[16,32], index: 3, kind: input, shape index: {}]   ;;  %s3900_s4 = inlined_call_operand.vmem [shape: f32[8,32], index: 4, kind: input, shape index: {}]   ;;  %s3901_s5 = inlined_call_operand.vmem [shape: f32[1,32], index: 5, kind: input, shape index: {}]   ;;  %s3902_s6 = inlined_call_operand.vmem [shape: f32[32,32], index: 6, kind: input, shape index: {}]   ;;  %s3903_s7 = inlined_call_operand.vmem [shape: f32[1,32], index: 7, kind: input, shape index: {}]   ;;  %s3904_s8 = inlined_call_operand.vmem [shape: f32[32,32], index: 8, kind: input, shape index: {}]   ;;  %s3905_s9 = inlined_call_operand.vmem [shape: f32[1,32], index: 9, kind: input, shape index: {}]   ;;  %s3906_s10 = inlined_call_operand.vmem [shape: f32[32,32], index: 10, kind: input, shape index: {}]   ;;  %s3907_s11 = inlined_call_operand.vmem [shape: f32[1,32], index: 11, kind: input, shape index: {}]   ;;  %s3908_s12 = inlined_call_operand.vmem [shape: f32[128,64], index: 12, kind: input, shape index: {}]   ;;  %s3909_s13 = inlined_call_operand.vmem [shape: f32[1,64], index: 13, kind: input, shape index: {}]   ;;  %s3910_s14 = inlined_call_operand.vmem [shape: f32[64,32], index: 14, kind: input, shape index: {}]   ;;  %s3911_s15 = inlined_call_operand.vmem [shape: f32[1,32], index: 15, kind: input, shape index: {}]   ;;  %s3912_s16 = inlined_call_operand.vmem [shape: f32[96,64], index: 16, kind: input, shape index: {}]   ;;  %s3913_s17 = inlined_call_operand.vmem [shape: f32[1,64], index: 17, kind: input, shape index: {}]   ;;  %s3914_s18 = inlined_call_operand.vmem [shape: f32[64,32], index: 18, kind: input, shape index: {}]   ;;  %s3915_s19 = inlined_call_operand.vmem [shape: f32[1,32], index: 19, kind: input, shape index: {}]   ;;  %s3916_s20 = inlined_call_operand.vmem [shape: f32[96,64], index: 20, kind: input, shape index: {}]   ;;  %s3917_s21 = inlined_call_operand.vmem [shape: f32[1,64], index: 21, kind: input, shape index: {}]   ;;  %s3918_s22 = inlined_call_operand.vmem [shape: f32[64,32], index: 22, kind: input, shape index: {}]   ;;  %s3919_s23 = inlined_call_operand.vmem [shape: f32[1,32], index: 23, kind: input, shape index: {}]   ;;  %s3920_s24 = inlined_call_operand.hbm [shape: f32[16,32], index: 24, kind: output, shape index: {0}]   ;;  %s3921_s25 = inlined_call_operand.hbm [shape: f32[8,32], index: 25, kind: output, shape index: {1}]   ;;  %s3922_s26 = inlined_call_operand.hbm [shape: f32[1,32], index: 26, kind: output, shape index: {2}]  }
   0x1   :  { %3940 = sst [smem:[#allocation27_spill]] %s3896_s0 }
   0x2   :  { %3941 = sst [smem:[#allocation28_spill]] %s3897_s1 }
   0x3   :  { %3942 = sst [smem:[#allocation29_spill]] %s3898_s2 }
   0x4   :  { %3943 = sst [smem:[#allocation30_spill]] %s3899_s3 }
   0x5   :  { %3944 = sst [smem:[#allocation31_spill]] %s3900_s4 }
   0x6   :  { %3945 = sst [smem:[#allocation32_spill]] %s3901_s5 }
   0x7   :  { %3946 = sst [smem:[#allocation33_spill]] %s3902_s6 }
   0x8   :  { %3947 = sst [smem:[#allocation34_spill]] %s3903_s7 }
   0x9   :  { %3948 = sst [smem:[#allocation35_spill]] %s3904_s8 }
   0xa   :  { %3949 = sst [smem:[#allocation36_spill]] %s3905_s9 }
   0xb   :  { %3950 = sst [smem:[#allocation37_spill]] %s3906_s10 }
   0xc   :  { %3951 = sst [smem:[#allocation38_spill]] %s3915_s19 }
   0xd   :  { %3952 = sst [smem:[#allocation39_spill]] %s3918_s22 }
   0xe   :  { %3953 = sst [smem:[#allocation40_spill]] %s3919_s23 }
   0xf   :  { %3954 = sst [smem:[#allocation41_spill]] %s3920_s24 }
  0x10   :  { %3955 = sst [smem:[#allocation42_spill]] %s3921_s25 }
  0x11   :  { %3956 = sst [smem:[#allocation43_spill]] %s3922_s26 }
  0x12   :  { %32 = vsyncpa [#allocation13], 0 }
  0x13   :  { %34 = vsyncpa [#allocation13 + $0x1], 0 }
  0x14   :  { %35 = vsyncpa [#allocation15], 0  ;;  %s3303_s27 = smov 0   ;;  %s3305_s3 = smov 0  }
  0x15   :  { %s3307_s7 = smov 0   ;;  %s3309_s28 = smov 0  }
  0x16 LB: > { %3957 = sst [smem:[#allocation19_spill]] %s3142_s27  ;;  %s3324_s8 = sadd.s32 4294967295, %s3154_s28   ;;  %s3154_s28 = sphi %s3309_s28, %s3998_s28   ;;  %s3150_s7 = sphi %s3307_s7, %s4001_s7   ;;  %s3146_s3 = sphi %s3305_s3, %s4000_s3   ;;  %s3142_s27 = sphi %s3303_s27, %s3999_s27  }
  0x17   : > { %3958 = sst [smem:[#allocation20_spill]] %s3146_s3  ;;  %s2539_s4 = sadd.s32 4294967294, %s3154_s28  }
  0x18   : > { %3959 = sst [smem:[#allocation21_spill]] %s3150_s7  ;;  %s3328_s29 = sadd.s32 1, %s3154_s28  }
  0x19   : > { %3960 = sst [smem:[#allocation22_spill]] %s3154_s28  ;;  %s572_s0 = sadd.s32 1, %s3150_s7 }
  0x1a   : > { %3961 = sst [smem:[#allocation23_spill]] %s3328_s29  ;;  %s569_s9 = ssub.s32 %s3154_s28, %s3328_s29 }
  0x1b   : > { %p582_p0 = scmp.ne.s32.totalorder %s3150_s7, %s3146_s3  ;;  %p570_p1 = scmp.eq.s32.totalorder %s569_s9, 0 }
  0x1c   : > { %p583_p2 = scmp.eq.s32.totalorder %s3324_s8, 1  ;;  %p588_p3 = scmp.ne.s32.totalorder %s3146_s3, %s3142_s27 }
  0x1d   : > { %p589_p4 = scmp.eq.s32.totalorder %s2539_s4, 1  ;;  %p2542_p7 = scmp.ge.s32.totalorder %s3154_s28, 1 }
  0x1e   : > { %s3339_s30 = scalar_select %p570_p1, %s3150_s7, %s572_s0  }
  0x1f   : > { %p3343_p5 = por %p583_p2, %p582_p0  ;;  %p3347_p6 = por %p589_p4, %p588_p3 }
  0x20   : > { %3962 = sst [smem:[#allocation24_spill]] %s3339_s30  ;;  %p737_p8 = scmp.lt.s32.totalorder %s3154_s28, 3 }
  0x21   : > { %s3963_s2 = scalar_select %p3343_p5, 1, 0 }
  0x22   : > { %s3965_s5 = scalar_select %p3347_p6, 1, 0 }
  0x23   : > { %3964 = sst [smem:[#allocation25_spill]] %s3963_s2  ;;  %p738_p9 = pnand %p2542_p7, %p737_p8 }
  0x24   : > { %3966 = sst [smem:[#allocation26_spill]] %s3965_s5  ;;  %s3935_s10 = sand.u32 (!%p738_p9), 1, %s3146_s3  }
  0x25   : > { %741 = sbr.rel (%p738_p9) target bundleno = 2647 (0xa57), region = 116  ;;  %p818_p10 = scmp.lt.s32.totalorder (!%p738_p9), %s3324_s8, 1 }
  0x26   : > { %s3357_s6 = sshll.u32 (!%p738_p9), %s3935_s10, 3  ;;  %s3968_s27 = sld [smem:[#allocation28_spill]] (!%p738_p9) }
  0x27   : > { %s3969_s10 = sld [smem:[#allocation29_spill]] (!%p738_p9)  ;;  %s813_s22 = scalar_lea.vmem (!%p738_p9), [#allocation12], %s3357_s6 }
  0x28   : > { %p2548_p11 = scmp.ne.s32.totalorder (!%p738_p9), %s3324_s8, 0 }
  0x2c   : > { %s819_s1 = scalar_select %p818_p10, %s3324_s8, 1 }
  0x2d   : > { %s3971_s19 = sld [smem:[#allocation35_spill]] (!%p2548_p11)  ;;  %s3972_s26 = sld [smem:[#allocation37_spill]] (!%p2548_p11)  ;;  %v3156_v3 = vmov (!%p2548_p11), 0.0|0.0   ;;  %vm851_vm0 = vcmask (!%p2548_p11), 261120   ;;  %vm1541_vm1 = vcmask (!%p2548_p11), 253952   ;;  %vm3157_vm2 = vmmov (!%p2548_p11), 0  }
  0x2e   : > { %s3360_s4 = sshll.u32 %s819_s1, 3  ;;  %s3970_s1 = sld [smem:[#allocation30_spill]]  ;;  %2864 = vmatprep.subr.bf16.mxu0 (!%p2548_p11), %v3156_v3  ;;  %2870 = vmatprep.subr.bf16.mxu1 (!%p2548_p11), %v3156_v3  ;;  %v3158_v11 = vmov (!%p2548_p11), 0.0   ;;  %v1524_v20 = vld [vmem:[%s3910_s14] sm:$0xff] (!%p2548_p11)  ;;  %v1525_v21 = vld [vmem:[%s3910_s14 + $0x8] sm:$0xff] (!%p2548_p11)  ;;  %v1526_v22 = vld [vmem:[%s3910_s14 + $0x10] sm:$0xff] (!%p2548_p11) }
  0x2f   : > { %s825_s28 = scalar_lea.vmem %s3968_s27, %s3360_s4  ;;  %s829_s3 = scalar_lea.vmem %s3969_s10, %s3360_s4  ;;  %2677 = vmatprep.mubr.msk.f32.mxu0 (!%p2548_p11), %vm3157_vm2, %v3158_v11  ;;  %1540 = vst.msk [vmem:[#allocation7] sm:$0xff] (!%p2548_p11), %vm851_vm0, %v3158_v11  ;;  %2688 = vmatprep.mubr.msk.f32.mxu1 (!%p2548_p11), %vm3157_vm2, %v3158_v11  ;;  %v1527_v23 = vld [vmem:[%s3910_s14 + $0x18] sm:$0xff] (!%p2548_p11)  ;;  %v1528_v24 = vld [vmem:[%s3910_s14 + $0x20] sm:$0xff] (!%p2548_p11)  ;;  %v1529_v25 = vld [vmem:[%s3910_s14 + $0x28] sm:$0xff] (!%p2548_p11)  ;;  %v1532_v26 = vpack.c.bf16 (!%p2548_p11), %v1525_v21, %v1524_v20  ;;  %vm1434_vm5 = vcmask (!%p2548_p11), 523264   ;;  %vm1124_vm6 = vcmask (!%p2548_p11), 519168  }
  0x30   : > { %838 = sbr.rel (%p2548_p11) target bundleno = 543 (0x21f), region = 120  ;;  %s3973_s24 = sld [smem:[#allocation33_spill]] (!%p2548_p11)  ;;  %1542 = vst.msk [vmem:[#allocation8] sm:$0x1] (!%p2548_p11), %vm1541_vm1, %v3158_v11  ;;  %v1530_v27 = vld [vmem:[%s3910_s14 + $0x30] sm:$0xff] (!%p2548_p11)  ;;  %v1531_v28 = vld [vmem:[%s3910_s14 + $0x38] sm:$0xff] (!%p2548_p11)  ;;  %v1533_v29 = vpack.c.bf16 (!%p2548_p11), %v1527_v23, %v1526_v22  ;;  %v1534_v30 = vpack.c.bf16 (!%p2548_p11), %v1529_v25, %v1528_v24 }
  0x31   : > { %v1535_v31 = vpack.c.bf16 (!%p2548_p11), %v1531_v28, %v1530_v27  ;;  %1536 = vst.msk [vmem:[#allocation11] sm:$0xff] (!%p2548_p11), %vm851_vm0, %v1532_v26  ;;  %s3974_s5 = sld [smem:[#allocation31_spill]] (!%p2548_p11)  ;;  %v1034_v34 = vld [vmem:[%s3908_s12] sm:$0xff] (!%p2548_p11)  ;;  %v1035_v35 = vld [vmem:[%s3908_s12 + $0x8] sm:$0xff] (!%p2548_p11)  ;;  %v1036_v40 = vld [vmem:[%s3908_s12 + $0x10] sm:$0xff] (!%p2548_p11)  ;;  %vm1272_vm7 = vcmask (!%p2548_p11), 516096  }
  0x32   : > { %1537 = vst.msk [vmem:[#allocation11 + $0x8] sm:$0xff] (!%p2548_p11), %vm851_vm0, %v1533_v29  ;;  %1538 = vst.msk [vmem:[#allocation11 + $0x10] sm:$0xff] (!%p2548_p11), %vm851_vm0, %v1534_v30  ;;  %v1038_v36 = vld [vmem:[%s3908_s12 + $0x20] sm:$0xff] (!%p2548_p11)  ;;  %v2877_v37 = vpack.c.bf16 (!%p2548_p11), %v1035_v35, %v1034_v34  ;;  %v1039_v38 = vld [vmem:[%s3908_s12 + $0x28] sm:$0xff] (!%p2548_p11) }
  0x33   : > { %v840_v0 = vld [vmem:[%s3971_s19] sm:$0xff] (!%p2548_p11)  ;;  %v841_v1 = vld [vmem:[%s3971_s19 + $0x8] sm:$0xff] (!%p2548_p11)  ;;  %v842_v6 = vld [vmem:[%s3971_s19 + $0x10] sm:$0xff] (!%p2548_p11)  ;;  %1539 = vst.msk [vmem:[#allocation11 + $0x18] sm:$0xff] (!%p2548_p11), %vm851_vm0, %v1535_v31  ;;  %v2883_v39 = vpack.c.bf16 (!%p2548_p11), %v1039_v38, %v1038_v36 }
  0x34   : > { %s833_s23 = scalar_lea.vmem %s3970_s1, %s3360_s4  ;;  %v941_v2 = vld [vmem:[%s3972_s26] sm:$0xff] (!%p2548_p11)  ;;  %v2865_v4 = vpack.c.bf16 (!%p2548_p11), %v841_v1, %v840_v0  ;;  %v942_v5 = vld [vmem:[%s3972_s26 + $0x8] sm:$0xff] (!%p2548_p11)  ;;  %v843_v7 = vld [vmem:[%s3971_s19 + $0x18] sm:$0xff] (!%p2548_p11)  ;;  %s3975_s1 = sld [smem:[#allocation32_spill]] (!%p2548_p11) }
  0x35   : > { %v2871_v8 = vpack.c.bf16 (!%p2548_p11), %v942_v5, %v941_v2  ;;  %v943_v9 = vld [vmem:[%s3972_s26 + $0x10] sm:$0xff] (!%p2548_p11)  ;;  %v944_v10 = vld [vmem:[%s3972_s26 + $0x18] sm:$0xff] (!%p2548_p11)  ;;  %v2868_v13 = vpack.c.bf16 (!%p2548_p11), %v843_v7, %v842_v6  ;;  %v945_v47 = vld [vmem:[%s3907_s11] sm:$0x1] (!%p2548_p11) }
  0x36   : > { %v1512_v12 = vld [vmem:[%s3973_s24] sm:$0xff] (!%p2548_p11)  ;;  %2866 = vmatpush3.bf16.msra.mxu0 (!%p2548_p11), %v2865_v4  ;;  %v1513_v14 = vld [vmem:[%s3973_s24 + $0x8] sm:$0xff] (!%p2548_p11)  ;;  %v1514_v15 = vld [vmem:[%s3973_s24 + $0x10] sm:$0xff] (!%p2548_p11)  ;;  %v2874_v17 = vpack.c.bf16 (!%p2548_p11), %v944_v10, %v943_v9 }
  0x37   : > { %v1515_v16 = vld [vmem:[%s3973_s24 + $0x18] sm:$0xff]  ;;  %2872 = vmatpush3.bf16.msra.mxu1 %v2871_v8  ;;  %2867 = vmatprep.subr.bf16.mxu0 %v3156_v3  ;;  %v1516_v18 = vpack.c.bf16 %v1513_v14, %v1512_v12  ;;  %v839_v32 = vld [vmem:[%s3974_s5] sm:$0xff]  ;;  %v1040_v42 = vld [vmem:[%s3908_s12 + $0x30] sm:$0xff]  ;;  %s3976_s5 = sld [smem:[#allocation36_spill]] }
  0x38   : > { %v1517_v19 = vpack.c.bf16 %v1515_v16, %v1514_v15  ;;  %2873 = vmatprep.subr.bf16.mxu1 %v3156_v3  ;;  %v1037_v41 = vld [vmem:[%s3908_s12 + $0x18] sm:$0xff]  ;;  %v1046_v5 = vld [vmem:[%s3908_s12 + $0x60] sm:$0xff]  ;;  %v1047_v7 = vld [vmem:[%s3908_s12 + $0x68] sm:$0xff] }
  0x39   : > { %1518 = vst.msk [vmem:[#allocation9] sm:$0xff] %vm851_vm0, %v1516_v18  ;;  %v2880_v43 = vpack.c.bf16 %v1037_v41, %v1036_v40  ;;  %v1041_v44 = vld [vmem:[%s3908_s12 + $0x38] sm:$0xff]  ;;  %v1278_v8 = vld [vmem:[%s3912_s16 + $0x40] sm:$0xff]  ;;  %v1279_v9 = vld [vmem:[%s3912_s16 + $0x48] sm:$0xff] }
  0x3a   : > { %1519 = vst.msk [vmem:[#allocation9 + $0x8] sm:$0xff] %vm851_vm0, %v1517_v19  ;;  %2869 = vmatpush3.bf16.msra.mxu0 %v2868_v13  ;;  %v940_v33 = vld [vmem:[%s3975_s1] sm:$0x1]  ;;  %v2886_v45 = vpack.c.bf16 %v1041_v44, %v1040_v42  ;;  %v2895_v18 = vpack.c.bf16 %v1279_v9, %v1278_v8  ;;  %v1048_v19 = vld [vmem:[%s3908_s12 + $0x70] sm:$0xff]  ;;  %v1049_v22 = vld [vmem:[%s3908_s12 + $0x78] sm:$0xff] }
  0x3b   : > { %2875 = vmatpush3.bf16.msra.mxu1 %v2874_v17  ;;  %2876 = vmatprep.subr.bf16.mxu0 %v3156_v3  ;;  %v2889_v17 = vpack.c.bf16 %v1047_v7, %v1046_v5  ;;  %v1280_v23 = vld [vmem:[%s3912_s16 + $0x50] sm:$0xff]  ;;  %v1281_v24 = vld [vmem:[%s3912_s16 + $0x58] sm:$0xff]  ;;  %v2892_v27 = vpack.c.bf16 %v1049_v22, %v1048_v19  ;;  %v1274_v29 = vld [vmem:[%s3912_s16] sm:$0xff] }
  0x3c   : > { %2882 = vmatprep.subr.bf16.mxu1 %v3156_v3  ;;  %v2898_v28 = vpack.c.bf16 %v1281_v24, %v1280_v23  ;;  %v1275_v30 = vld [vmem:[%s3912_s16 + $0x8] sm:$0xff]  ;;  %v1436_v31 = vld [vmem:[%s3916_s20] sm:$0xff]  ;;  %v1438_v40 = vld [vmem:[%s3916_s20 + $0x10] sm:$0xff] }
  0x3d   : > { %2678 = vmatmul.mubr.msk.f32.vlgmr.msra.gmra.mrb[0].mxu0 %vm851_vm0, %v839_v32  ;;  %v2549_v46 = vld [vmem:[%s3976_s5] ss:$0 sm:$0xff]  ;;  %v1437_v32 = vld [vmem:[%s3916_s20 + $0x8] sm:$0xff]  ;;  %v2901_v35 = vpack.c.bf16 %v1275_v30, %v1274_v29  ;;  %v1439_v41 = vld [vmem:[%s3916_s20 + $0x18] sm:$0xff] }
  0x3e   : > { %2689 = vmatmul.mubr.msk.f32.vlgmr.msra.gmra.mrb[0].mxu1 %vm851_vm0, %v940_v33  ;;  %2699 = vmatprep.mubr.msk.f32.mxu0 %vm3157_vm2, %v3158_v11  ;;  %v2907_v36 = vpack.c.bf16 %v1437_v32, %v1436_v31  ;;  %v1042_v44 = vld [vmem:[%s3908_s12 + $0x40] sm:$0xff] }
  0x3f   : > { %2710 = vmatprep.mubr.msk.f32.mxu1 %vm3157_vm2, %v3158_v11  ;;  %2878 = vmatpush3.bf16.msra.mxu0 %v2877_v37  ;;  %v1276_v37 = vld [vmem:[%s3912_s16 + $0x10] sm:$0xff] }
  0x40   : > { %2884 = vmatpush3.bf16.msra.mxu1 %v2883_v39  ;;  %2879 = vmatprep.subr.bf16.mxu0 %v3156_v3  ;;  %v1277_v39 = vld [vmem:[%s3912_s16 + $0x18] sm:$0xff] }
  0x41   : > { %2885 = vmatprep.subr.bf16.mxu1 %v3156_v3  ;;  %v2904_v42 = vpack.c.bf16 %v1277_v39, %v1276_v37 }
  0x43   : > { %2881 = vmatpush3.bf16.msra.mxu0 %v2880_v43  ;;  %v2910_v43 = vpack.c.bf16 %v1439_v41, %v1438_v40 }
  0x44   : > { %2887 = vmatpush3.bf16.msra.mxu1 %v2886_v45  ;;  %2888 = vmatprep.subr.bf16.mxu0 %v3156_v3  ;;  %v1044_v45 = vld [vmem:[%s3908_s12 + $0x50] sm:$0xff] }
  0x45   : > { %2894 = vmatprep.subr.bf16.mxu1 %v3156_v3 }
 0x110   : > { %v921_v48 = vpop.f32.mrb[0].mxu0 }
 0x111   : > { %v922_v49 = vadd.f32 %v2549_v46, %v921_v48  ;;  %v1015_v50 = vpop.f32.mrb[0].mxu1  ;;  %v2679_v51 = vpop.f32.mrb[1].mxu0 }
 0x112   : > { %v3505_v52 = vadd.f32 %v1015_v50, %v945_v47  ;;  %v2690_v53 = vpop.f32.mrb[1].mxu1 }
 0x113   : > { %v926_v54 = vand.u32 2147483647, %v922_v49  ;;  %v925_v14 = vmax.f32 %v922_v49, 0.0 }
 0x114   : > { %v1020_v55 = vand.u32 2147483647, %v3505_v52  ;;  %v1019_v34 = vmax.f32 %v3505_v52, 0.0 }
 0x115   : > { %v927_v56 = vsub.f32 0.0, %v926_v54  ;;  %v1352_v54 = vlaneseq }
 0x116   : > { %v1021_v57 = vsub.f32 0.0, %v1020_v55  ;;  %v1198_v55 = vld [vmem:[%s3909_s13] sm:$0x1] }
 0x117   : > { %v928_v58 = vmul.f32 1.442695, %v927_v56  ;;  %v1353_v56 = vshrl.u32 %v1352_v54, 7 }
 0x118   : > { %v1022_v59 = vmul.f32 1.442695, %v1021_v57 }
 0x119   : > { %2998 = vpow2.f32 %v928_v58 }
 0x11a   : > { %3000 = vpow2.f32 %v1022_v59 }
 0x123   : > { %v2999_v60 = vpop.eup %2998 }
 0x124   : > { %v3001_v61 = vpop.eup %3000  ;;  %v930_v62 = vadd.f32 1.0, %v2999_v60  ;;  %v933_v0 = vmul.f32 -0.5, %v2999_v60  ;;  %v936_v2 = vand.u32 2147483647, %v2999_v60 }
 0x125   : > { %v1024_v63 = vadd.f32 1.0, %v3001_v61  ;;  %v1027_v4 = vmul.f32 -0.5, %v3001_v61  ;;  %v1030_v21 = vand.u32 2147483647, %v3001_v61 }
 0x126   : > { %3002 = vlog2.f32 %v930_v62  ;;  %v934_v1 = vadd.f32 1.0, %v933_v0  ;;  %vm937_vm3 = vcmp.lt.f32.partialorder %v936_v2, 0.0004427343  ;;  %v1354_v62 = vsub.s32 0, %v1353_v56  ;;  %v2557_v2 = vld [vmem:[%s3913_s17] ss:$0 sm:$0xff] }
 0x127   : > { %3004 = vlog2.f32 %v1024_v63  ;;  %v1028_v16 = vadd.f32 1.0, %v1027_v4  ;;  %vm1031_vm4 = vcmp.lt.f32.partialorder %v1030_v21, 0.0004427343  ;;  %v1440_v63 = vld [vmem:[%s3917_s21] sm:$0x1] }
 0x128   : > { %v935_v12 = vmul.f32 %v2999_v60, %v934_v1 }
 0x129   : > { %v1029_v26 = vmul.f32 %v3001_v61, %v1028_v16 }
 0x130   : > { %v3003_v6 = vpop.eup %3002 }
 0x131   : > { %v932_v10 = vmul.f32 0.6931472, %v3003_v6  ;;  %v3005_v13 = vpop.eup %3004 }
 0x132   : > { %v1026_v25 = vmul.f32 0.6931472, %v3005_v13 }
 0x133   : > { %v938_v15 = vsel %vm937_vm3, %v935_v12, %v932_v10 }
 0x134   : > { %v939_v20 = vadd.f32 %v938_v15, %v925_v14  ;;  %v1032_v33 = vsel %vm1031_vm4, %v1029_v26, %v1026_v25 }
 0x135   : > { %v1033_v38 = vadd.f32 %v1032_v33, %v1019_v34 }
 0x136   : > { %2700 = vmatmul.mubr.msk.f32.vlgmr.msra.gmra.mrb[2].mxu0 %vm851_vm0, %v939_v20  ;;  %2711 = vmatmul.mubr.msk.f32.vlgmr.msra.gmra.mrb[2].mxu1 %vm851_vm0, %v939_v20 }
 0x137   : > { %2890 = vmatpush3.bf16.msra.mxu0 %v2889_v17  ;;  %2896 = vmatpush3.bf16.msra.mxu1 %v2895_v18 }
 0x138   : > { %2891 = vmatprep.subr.bf16.mxu0 %v3156_v3  ;;  %2897 = vmatprep.subr.bf16.mxu1 %v3156_v3 }
 0x139   : > { %2721 = vmatprep.mubr.msk.f32.mxu0 %vm3157_vm2, %v3158_v11  ;;  %2732 = vmatprep.mubr.msk.f32.mxu1 %vm3157_vm2, %v3158_v11 }
 0x13b   : > { %2893 = vmatpush3.bf16.msra.mxu0 %v2892_v27  ;;  %2899 = vmatpush3.bf16.msra.mxu1 %v2898_v28 }
 0x13c   : > { %2900 = vmatprep.subr.bf16.mxu0 %v3156_v3  ;;  %2906 = vmatprep.subr.bf16.mxu1 %v3156_v3 }
 0x13e   : > { %2722 = vmatmul.mubr.msk.f32.vlgmr.msra.gmra.mrb[4].mxu0 %vm851_vm0, %v1033_v38  ;;  %2733 = vmatmul.mubr.msk.f32.vlgmr.msra.gmra.mrb[4].mxu1 %vm851_vm0, %v1033_v38 }
 0x13f   : > { %2902 = vmatpush3.bf16.msra.mxu0 %v2901_v35  ;;  %2908 = vmatpush3.bf16.msra.mxu1 %v2907_v36 }
 0x140   : > { %2903 = vmatprep.subr.bf16.mxu0 %v3156_v3  ;;  %2909 = vmatprep.subr.bf16.mxu1 %v3156_v3  ;;  %v1043_v3 = vld [vmem:[%s3908_s12 + $0x48] sm:$0xff] }
 0x141   : > { %2743 = vmatprep.mubr.msk.f32.mxu0 %vm3157_vm2, %v3158_v11  ;;  %2754 = vmatprep.mubr.msk.f32.mxu1 %vm3157_vm2, %v3158_v11  ;;  %v1045_v11 = vld [vmem:[%s3908_s12 + $0x58] sm:$0xff]  ;;  %v1520_v46 = vpack.c.bf16 %v1043_v3, %v1042_v44 }
 0x142   : > { %v1521_v47 = vpack.c.bf16 %v1045_v11, %v1044_v45 }
 0x143   : > { %2905 = vmatpush3.bf16.msra.mxu0 %v2904_v42  ;;  %2911 = vmatpush3.bf16.msra.mxu1 %v2910_v43  ;;  %1522 = vst.msk [vmem:[#allocation10] sm:$0xff] %vm1434_vm5, %v1520_v46 }
 0x144   : > { %1523 = vst.msk [vmem:[#allocation10 + $0x8] sm:$0xff] %vm1434_vm5, %v1521_v47 }
 0x146   : > { %2744 = vmatmul.mubr.msk.f32.vlgmr.msra.gmra.mrb[6].mxu0 %vm851_vm0, %v939_v20  ;;  %2755 = vmatmul.mubr.msk.f32.vlgmr.msra.gmra.mrb[6].mxu1 %vm851_vm0, %v1033_v38 }
 0x209   : > { %v1119_v48 = vpop.f32.mrb[2].mxu0  ;;  %v1192_v49 = vpop.f32.mrb[2].mxu1 }
 0x20a   : > { %v1123_v50 = vpack.c.bf16 %v1119_v48, %v1119_v48  ;;  %v1196_v51 = vpack.c.bf16 %v1192_v49, %v1192_v49  ;;  %v2701_v52 = vpop.f32.mrb[3].mxu0  ;;  %v2712_v53 = vpop.f32.mrb[3].mxu1 }
 0x20c   : > { %1125 = vst.msk [vmem:[#allocation2] sm:$0xf] %vm1124_vm6, %v1123_v50  ;;  %1197 = vst.msk [vmem:[#allocation3] sm:$0xf] %vm1124_vm6, %v1196_v51 }
 0x211   : > { %v1268_v57 = vpop.f32.mrb[4].mxu0  ;;  %v1348_v58 = vpop.f32.mrb[4].mxu1 }
 0x212   : > { %v1269_v59 = vadd.f32 %v1268_v57, %v1198_v55  ;;  %v2723_v60 = vpop.f32.mrb[5].mxu0  ;;  %v2734_v61 = vpop.f32.mrb[5].mxu1  ;;  %v1355_v0 = vrot.slane %v1348_v58, %v1354_v62 }
 0x214   : > { %1273 = vst.msk [vmem:[#allocation4] sm:$0x1] %vm1272_vm7, %v1269_v59 }
 0x219   : > { %v1422_v1 = vpop.f32.mrb[6].mxu0  ;;  %v1507_v4 = vpop.f32.mrb[6].mxu1 }
 0x21a   : > { %v1423_v5 = vadd.f32 %v1422_v1, %v1355_v0  ;;  %v1508_v6 = vadd.f32 %v1507_v4, %v1440_v63  ;;  %v2745_v7 = vpop.f32.mrb[7].mxu0  ;;  %v2756_v8 = vpop.f32.mrb[7].mxu1 }
 0x21c   : > { %v1433_v9 = vadd.f32 %v2557_v2, %v1423_v5  ;;  %1511 = vst.msk [vmem:[#allocation6] sm:$0x1] %vm1272_vm7, %v1508_v6 }
 0x21e   : > { %1435 = vst.msk [vmem:[#allocation5] sm:$0xff] %vm1434_vm5, %v1433_v9 }
 0x21f PF: > { %v1545_v10 = vld [vmem:[#allocation9] sm:$0xff]  ;;  %v3159_v12 = vmov 0.0   ;;  %vm3160_vm8 = vmmov 0   ;;  %v3161_v15 = vmov 0   ;;  %v1546_v17 = vld [vmem:[#allocation9 + $0x8] sm:$0xff]  ;;  %s3980_s0 = sld [smem:[#allocation27_spill]]  ;;  %v1613_v22 = vlaneseq }
 0x220   : > { %2757 = vmatprep.subr.bf16.mxu0 %v3159_v12  ;;  %2761 = vmatprep.mubr.msk.bf16.mxu0 %vm3160_vm8, %v3159_v12  ;;  %v1623_v13 = vld [vmem:[%s825_s28] sm:$0xff]  ;;  %vm1554_vm9 = vcmask 261120   ;;  %vm1637_vm10 = vcmask 1043456   ;;  %v1728_v23 = vld [vmem:[#allocation10] sm:$0xff]  ;;  %v1729_v25 = vld [vmem:[#allocation10 + $0x8] sm:$0xff]  ;;  %vm1633_vm12 = vcmask 64512  }
 0x221   : > { %2758 = vmatpush3.bf16.msra.mxu0 %v1545_v10  ;;  %v3616_v14 = vld [vmem:[%s833_s23] sm:$0xff]  ;;  %3006 = vset.pattern.permute.xlu0 %v3161_v15  ;;  %v1614_v24 = vand.u32 127, %v1613_v22  ;;  %v1800_v0 = vld [vmem:[#allocation11 + $0x10] sm:$0xff]  ;;  %v2566_v4 = vld [vmem:[#allocation4] ss:$0 sm:$0xff]  ;;  %vm1809_vm0 = vcmask 523264  }
 0x222   : > { %v1870_v16 = vld [vmem:[%s829_s3] sm:$0xff]  ;;  %2759 = vmatprep.subr.bf16.mxu0 %v3159_v12  ;;  %1625 = vperm.xlu0 %3006, %v1623_v13   ;;  %v1544_v19 = vpack.c.bf16 %v3616_v14, %v3616_v14  ;;  %v1801_v1 = vld [vmem:[#allocation11 + $0x18] sm:$0xff]  ;;  %vm1952_vm2 = vcmask 253952   ;;  %p2570_p12 = scmp.ne.s32.totalorder %s3324_s8, 1 }
 0x223   : > { %3007 = vset.pattern.permute.xlu1 %v3161_v15  ;;  %2765 = vmatprep.subr.bf16.mxu1 %v3159_v12  ;;  %v1632_v20 = vld [vmem:[#allocation3] sm:$0xf]  ;;  %v1631_v27 = vld [vmem:[#allocation2] sm:$0xf]  ;;  %vm3163_vm3 = vmmov (!%p2570_p12), 0   ;;  %s3983_s7 = sld [smem:[#allocation38_spill]] (!%p2570_p12) }
 0x224   : > { %1873 = vperm.xlu1 %3007, %v1870_v16   ;;  %2767 = vmatprep.mubr.msk.bf16.mxu1 %vm3160_vm8, %v3159_v12  ;;  %v1639_v21 = vsel %vm1637_vm10, %v1632_v20, 0  ;;  %v1685_v30 = vsel %vm1637_vm10, %v1631_v27, 0  ;;  %v1798_v62 = vld [vmem:[#allocation11] sm:$0xff]  ;;  %v1799_v63 = vld [vmem:[#allocation11 + $0x8] sm:$0xff]  ;;  %s3984_s28 = sld [smem:[#allocation31_spill]] (!%p2570_p12)  ;;  %s3986_s1 = sld [smem:[#allocation40_spill]] (!%p2570_p12) }
 0x225   : > { %s3981_s9 = scalar_lea.vmem %s3980_s0, %s3360_s4  ;;  %2760 = vmatpush3.bf16.msra.mxu0 %v1546_v17  ;;  %2766 = vmatpush3.bf16.msra.mxu1 %v1639_v21  ;;  %s3982_s4 = sld [smem:[#allocation34_spill]]  ;;  %v2567_v27 = vld [vmem:[%s3911_s15] ss:$0 sm:$0xff] }
 0x226   : > { %v1615_v18 = vld [vmem:[%s3981_s9] sm:$0xff]  ;;  %2777 = vmatprep.subr.bf16.mxu0 %v3159_v12  ;;  %2771 = vmatprep.subr.bf16.mxu1 %v3159_v12  ;;  %s3985_s5 = sld [smem:[#allocation39_spill]] (!%p2570_p12)  ;;  %s3987_s9 = sld [smem:[#allocation32_spill]] (!%p2570_p12) }
 0x227   : > { %1617 = vperm.xlu0 %3006, %v1615_v18  }
 0x228   : > { %2762 = vmatmul.mubr.msk.bf16.vlgmr.msra.gmra.mrb[0].mxu0 %vm1554_vm9, %v1544_v19 }
 0x229   : > { %2781 = vmatprep.mubr.msk.bf16.mxu0 %vm3160_vm8, %v3159_v12  ;;  %2778 = vmatpush3.bf16.msra.mxu0 %v1728_v23 }
 0x22a   : > { %2779 = vmatprep.subr.bf16.mxu0 %v3159_v12 }
 0x22b   : > { %v2559_v34 = vld [vmem:[%s3982_s4] ss:$0 sm:$0xff] }
 0x22d   : > { %2780 = vmatpush3.bf16.msra.mxu0 %v1729_v25 }
 0x22e   : > { %2797 = vmatprep.subr.bf16.mxu0 %v3159_v12 }
 0x2a1   : > { %v1626_v26 = vpop.permute.xlu0 %1625 }
 0x2a2   : > { %vm1627_vm11 = vcmp.eq.s32.totalorder %v1626_v26, %v1614_v24 }
 0x2a3   : > { %v2562_v28 = vsel %vm1627_vm11, 1.0, %v3159_v12 }
 0x2a4   : > { %v1630_v29 = vpack.c.bf16 %v2562_v28, %v2562_v28 }
 0x2a6   : > { %v1618_v31 = vpop.permute.xlu0 %1617  ;;  %2768 = vmatmul.mubr.msk.bf16.vlgmr.msra.gmra.mrb[0].mxu1 %vm1633_vm12, %v1630_v29  ;;  %1879 = vxpose.xlu1.c.b16.start.end [1/1] (short) (narrow) %v1630_v29, 16 }
 0x2a7   : > { %vm1619_vm13 = vcmp.eq.s32.totalorder %v1618_v31, %v1614_v24  ;;  %2772 = vmatpush3.bf16.msra.mxu1 %v1685_v30  ;;  %2773 = vmatprep.mubr.msk.bf16.mxu1 %vm3160_vm8, %v3159_v12 }
 0x2a8   : > { %v2561_v32 = vsel %vm1619_vm13, 1.0, %v3159_v12  ;;  %2785 = vmatprep.subr.bf16.mxu1 %v3159_v12 }
 0x2a9   : > { %v1622_v33 = vpack.c.bf16 %v2561_v32, %v2561_v32 }
 0x2ae   : > { %2774 = vmatmul.mubr.msk.bf16.vlgmr.msra.gmra.mrb[4].mxu1 %vm1633_vm12, %v1622_v33 }
 0x2af   : > { %2793 = vmatprep.mubr.msk.bf16.mxu1 %vm3160_vm8, %v3159_v12  ;;  %2786 = vmatpush3.bf16.msra.mxu1 %v1798_v62 }
 0x2b0   : > { %2787 = vmatprep.subr.bf16.mxu1 %v3159_v12 }
 0x2b3   : > { %2788 = vmatpush3.bf16.msra.mxu1 %v1799_v63 }
 0x2b4   : > { %2789 = vmatprep.subr.bf16.mxu1 %v3159_v12 }
 0x2b7   : > { %2790 = vmatpush3.bf16.msra.mxu1 %v1800_v0 }
 0x2b8   : > { %2791 = vmatprep.subr.bf16.mxu1 %v3159_v12 }
 0x2bb   : > { %2792 = vmatpush3.bf16.msra.mxu1 %v1801_v1  ;;  %v1959_v1 = vld [vmem:[%s3912_s16 + $0x20] sm:$0xff] (!%p2570_p12) }
 0x2fb   : > { %v1592_v35 = vpop.f32.mrb[0].mxu0 }
 0x2fc   : > { %v1593_v36 = vadd.f32 %v2559_v34, %v1592_v35  ;;  %v2763_v37 = vpop.f32.mrb[1].mxu0 }
 0x2fd   : > { %v1595_v38 = vpop.f32.mrb[2].mxu0 }
 0x2fe   : > { %v1599_v39 = vand.u32 2147483647, %v1593_v36  ;;  %v2764_v40 = vpop.f32.mrb[3].mxu0  ;;  %v1598_v49 = vmax.f32 %v1593_v36, 0.0 }
 0x300   : > { %v1600_v41 = vsub.f32 0.0, %v1599_v39 }
 0x302   : > { %v1601_v42 = vmul.f32 1.442695, %v1600_v41 }
 0x304   : > { %3008 = vpow2.f32 %v1601_v42 }
 0x30e   : > { %v3009_v43 = vpop.eup %3008 }
 0x30f   : > { %v1603_v44 = vadd.f32 1.0, %v3009_v43  ;;  %v1606_v3 = vmul.f32 -0.5, %v3009_v43  ;;  %v1609_v11 = vand.u32 2147483647, %v3009_v43 }
 0x311   : > { %3010 = vlog2.f32 %v1603_v44  ;;  %v1607_v45 = vadd.f32 1.0, %v1606_v3  ;;  %vm1610_vm14 = vcmp.lt.f32.partialorder %v1609_v11, 0.0004427343  ;;  %v1874_v11 = vpop.permute.xlu1 %1873 }
 0x313   : > { %v1608_v48 = vmul.f32 %v3009_v43, %v1607_v45 }
 0x31b   : > { %v3011_v46 = vpop.eup %3010 }
 0x31c   : > { %v1605_v47 = vmul.f32 0.6931472, %v3011_v46 }
 0x31e   : > { %v1611_v50 = vsel %vm1610_vm14, %v1608_v48, %v1605_v47 }
 0x31f   : > { %v1612_v51 = vadd.f32 %v1611_v50, %v1598_v49 }
 0x321   : > { %v1727_v52 = vpack.c.bf16 %v1612_v51, %v1612_v51 }
 0x323   : > { %2782 = vmatmul.mubr.msk.bf16.vlgmr.msra.gmra.mrb[4].mxu0 %vm1554_vm9, %v1727_v52 }
 0x324   : > { %2799 = vmatprep.mubr.msk.bf16.mxu0 %vm3160_vm8, %v3159_v12 }
 0x379   : > { %v1675_v53 = vpop.f32.mrb[0].mxu1 }
 0x37a   : > { %v2769_v54 = vpop.f32.mrb[1].mxu1 }
 0x37b   : > { %v1678_v55 = vpop.f32.mrb[2].mxu1  ;;  %v1887_v54 = vpop.trf.xlu1 }
 0x37c   : > { %v2770_v56 = vpop.f32.mrb[3].mxu1 }
 0x381   : > { %v1721_v57 = vpop.f32.mrb[4].mxu1 }
 0x382   : > { %v1722_v58 = vadd.f32 %v1721_v57, %v1675_v53  ;;  %v2775_v59 = vpop.f32.mrb[5].mxu1  ;;  %v1943_v57 = vld [vmem:[#allocation8] sm:$0x1] }
 0x383   : > { %v1724_v60 = vpop.f32.mrb[6].mxu1  ;;  %v1878_v59 = vld [vmem:[#allocation7] sm:$0xff] }
 0x384   : > { %v2776_v61 = vpop.f32.mrb[7].mxu1 }
 0x3f6   : > { %v1767_v2 = vpop.f32.mrb[4].mxu0 }
 0x3f7   : > { %v1773_v5 = vadd.f32 %v1767_v2, %v1722_v58  ;;  %v2783_v6 = vpop.f32.mrb[5].mxu0  ;;  %v1960_v2 = vld [vmem:[%s3912_s16 + $0x28] sm:$0xff] (!%p2570_p12) }
 0x3f8   : > { %v1770_v7 = vpop.f32.mrb[6].mxu0  ;;  %v1964_v6 = vpack.c.bf16 (!%p2570_p12), %v1960_v2, %v1959_v1 }
 0x3f9   : > { %v1781_v8 = vadd.f32 %v2566_v4, %v1773_v5  ;;  %v2784_v9 = vpop.f32.mrb[7].mxu0  ;;  %v1961_v4 = vld [vmem:[%s3912_s16 + $0x30] sm:$0xff] (!%p2570_p12)  ;;  %v3162_v5 = vmov (!%p2570_p12), 0.0   ;;  %v1962_v7 = vld [vmem:[%s3912_s16 + $0x38] sm:$0xff] (!%p2570_p12) }
 0x3fa   : > { %2811 = vmatprep.subr.bf16.mxu1 (!%p2570_p12), %v3162_v5 }
 0x3fb   : > { %v1783_v10 = vand.u32 2147483647, %v1781_v8  ;;  %v1782_v23 = vmax.f32 %v1781_v8, 0.0  ;;  %v1965_v8 = vpack.c.bf16 (!%p2570_p12), %v1962_v7, %v1961_v4  ;;  %v2103_v7 = vld [vmem:[%s3984_s28] sm:$0xff] (!%p2570_p12) }
 0x3fd   : > { %v1784_v13 = vsub.f32 0.0, %v1783_v10 }
 0x3ff   : > { %v1785_v15 = vmul.f32 1.442695, %v1784_v13  ;;  %v2026_v13 = vld [vmem:[%s3914_s18] sm:$0xff] (!%p2570_p12) }
 0x401   : > { %3012 = vpow2.f32 %v1785_v15  ;;  %v2027_v15 = vld [vmem:[%s3914_s18 + $0x8] sm:$0xff] (!%p2570_p12) }
 0x40b   : > { %v3013_v16 = vpop.eup %3012 }
 0x40c   : > { %v1787_v17 = vadd.f32 1.0, %v3013_v16  ;;  %v1790_v18 = vmul.f32 -0.5, %v3013_v16  ;;  %v1793_v20 = vand.u32 2147483647, %v3013_v16 }
 0x40e   : > { %3014 = vlog2.f32 %v1787_v17  ;;  %v1791_v19 = vadd.f32 1.0, %v1790_v18  ;;  %vm1794_vm15 = vcmp.lt.f32.partialorder %v1793_v20, 0.0004427343  ;;  %v2034_v17 = vpack.c.bf16 (!%p2570_p12), %v2027_v15, %v2026_v13  ;;  %v2029_v18 = vld [vmem:[%s3914_s18 + $0x18] sm:$0xff] (!%p2570_p12)  ;;  %v2030_v20 = vld [vmem:[%s3914_s18 + $0x20] sm:$0xff] (!%p2570_p12) }
 0x410   : > { %v1792_v22 = vmul.f32 %v3013_v16, %v1791_v19  ;;  %v2028_v16 = vld [vmem:[%s3914_s18 + $0x10] sm:$0xff] (!%p2570_p12) }
 0x411   : > { %v2035_v19 = vpack.c.bf16 (!%p2570_p12), %v2029_v18, %v2028_v16 }
 0x418   : > { %v3015_v12 = vpop.eup %3014 }
 0x419   : > { %v1789_v21 = vmul.f32 0.6931472, %v3015_v12  ;;  %v2031_v12 = vld [vmem:[%s3914_s18 + $0x28] sm:$0xff] (!%p2570_p12) }
 0x41b   : > { %v1795_v24 = vsel %vm1794_vm15, %v1792_v22, %v1789_v21  ;;  %v2036_v21 = vpack.c.bf16 (!%p2570_p12), %v2031_v12, %v2030_v20  ;;  %v2032_v22 = vld [vmem:[%s3914_s18 + $0x30] sm:$0xff] (!%p2570_p12)  ;;  %v2117_v20 = vld [vmem:[%s3916_s20 + $0x28] sm:$0xff] (!%p2570_p12) }
 0x41c   : > { %v1796_v25 = vadd.f32 %v1795_v24, %v1782_v23  ;;  %v2033_v23 = vld [vmem:[%s3914_s18 + $0x38] sm:$0xff] (!%p2570_p12) }
 0x41d   : > { %v2037_v24 = vpack.c.bf16 (!%p2570_p12), %v2033_v23, %v2032_v22  ;;  %v2118_v23 = vld [vmem:[%s3916_s20 + $0x30] sm:$0xff] (!%p2570_p12) }
 0x41e   : > { %v1797_v26 = vpack.c.bf16 %v1796_v25, %v1796_v25  ;;  %v1966_v25 = vld [vmem:[#allocation5] sm:$0xff] (!%p2570_p12) }
 0x420   : > { %2794 = vmatmul.mubr.msk.bf16.vlgmr.msra.gmra.mrb[8].mxu1 %vm1809_vm0, %v1797_v26 }
 0x421   : > { %2819 = vmatprep.mubr.msk.bf16.mxu1 (!%p2570_p12), %vm3163_vm3, %v3162_v5  ;;  %2812 = vmatpush3.bf16.msra.mxu1 (!%p2570_p12), %v2034_v17 }
 0x422   : > { %2813 = vmatprep.subr.bf16.mxu1 (!%p2570_p12), %v3162_v5 }
 0x425   : > { %2814 = vmatpush3.bf16.msra.mxu1 (!%p2570_p12), %v2035_v19  ;;  %v2116_v19 = vld [vmem:[%s3916_s20 + $0x20] sm:$0xff] (!%p2570_p12) }
 0x426   : > { %2815 = vmatprep.subr.bf16.mxu1 (!%p2570_p12), %v3162_v5 }
 0x429   : > { %2816 = vmatpush3.bf16.msra.mxu1 (!%p2570_p12), %v2036_v21  ;;  %v2919_v21 = vpack.c.bf16 (!%p2570_p12), %v2117_v20, %v2116_v19 }
 0x42a   : > { %2817 = vmatprep.subr.bf16.mxu1 (!%p2570_p12), %v3162_v5 }
 0x42d   : > { %2818 = vmatpush3.bf16.msra.mxu1 (!%p2570_p12), %v2037_v24  ;;  %v2119_v24 = vld [vmem:[%s3916_s20 + $0x38] sm:$0xff] (!%p2570_p12) }
 0x4f3   : > { %v1847_v28 = vpop.f32.mrb[8].mxu1 }
 0x4f4   : > { %v1848_v29 = vadd.f32 %v2567_v27, %v1847_v28  ;;  %v2795_v30 = vpop.f32.mrb[9].mxu1 }
 0x4f5   : > { %v1850_v31 = vpop.f32.mrb[10].mxu1 }
 0x4f6   : > { %v1854_v32 = vand.u32 2147483647, %v1848_v29  ;;  %v2796_v33 = vpop.f32.mrb[11].mxu1  ;;  %v1853_v44 = vmax.f32 %v1848_v29, 0.0 }
 0x4f8   : > { %v1855_v34 = vsub.f32 0.0, %v1854_v32 }
 0x4fa   : > { %v1856_v35 = vmul.f32 1.442695, %v1855_v34 }
 0x4fc   : > { %3016 = vpow2.f32 %v1856_v35 }
 0x506   : > { %v3017_v36 = vpop.eup %3016 }
 0x507   : > { %v1858_v37 = vadd.f32 1.0, %v3017_v36  ;;  %v1861_v38 = vmul.f32 -0.5, %v3017_v36  ;;  %v1864_v40 = vand.u32 2147483647, %v3017_v36 }
 0x509   : > { %3018 = vlog2.f32 %v1858_v37  ;;  %v1862_v39 = vadd.f32 1.0, %v1861_v38  ;;  %vm1865_vm1 = vcmp.lt.f32.partialorder %v1864_v40, 0.0004427343 }
 0x50b   : > { %v1863_v43 = vmul.f32 %v3017_v36, %v1862_v39 }
 0x513   : > { %v3019_v41 = vpop.eup %3018 }
 0x514   : > { %v1860_v42 = vmul.f32 0.6931472, %v3019_v41 }
 0x516   : > { %v1866_v3 = vsel %vm1865_vm1, %v1863_v43, %v1860_v42 }
 0x517   : > { %v1867_v45 = vadd.f32 %v1866_v3, %v1853_v44 }
 0x519   : > { %v1868_v46 = vadd.f32 %v1867_v45, %v3616_v14  ;;  %v1944_v47 = vsel %vm1554_vm9, %v1867_v45, 0.0  ;;  %v1876_v48 = vmul.f32 %v1874_v11, %v1867_v45  ;;  %v2120_v45 = vld [vmem:[%s3916_s20 + $0x40] sm:$0xff] (!%p2570_p12)  ;;  %v2121_v11 = vld [vmem:[%s3916_s20 + $0x48] sm:$0xff] (!%p2570_p12) }
 0x51a   : > { %v1945_v49 = vrot.slane %v1944_v47, 4 }
 0x51b   : > { %1869 = vst.msk [vmem:[%s813_s22] sm:$0xff] %vm1554_vm9, %v1868_v46  ;;  %v1877_v50 = vpack.c.bf16 %v1876_v48, %v1876_v48  ;;  %v2913_v46 = vpack.c.bf16 (!%p2570_p12), %v2121_v11, %v2120_v45  ;;  %v2122_v48 = vld [vmem:[%s3916_s20 + $0x50] sm:$0xff] (!%p2570_p12) }
 0x51c   : > { %v1946_v51 = vadd.f32 %v1945_v49, %v1944_v47  ;;  %v3164_v47 = vmov (!%p2570_p12), 0.0|0.0   ;;  %v2123_v49 = vld [vmem:[%s3916_s20 + $0x58] sm:$0xff] (!%p2570_p12) }
 0x51d   : > { %v1899_v52 = vsel %vm1637_vm10, %v1877_v50, 0  ;;  %2924 = vmatprep.subr.bf16.mxu1 (!%p2570_p12), %v3164_v47  ;;  %v2916_v50 = vpack.c.bf16 (!%p2570_p12), %v2123_v49, %v2122_v48 }
 0x51e   : > { %v1947_v53 = vrot.slane %v1946_v51, 2  ;;  %2798 = vmatpush3.bf16.msra.mxu0 %v1899_v52 }
 0x51f   : > { %2803 = vmatprep.subr.bf16.mxu0 (!%p2570_p12), %v3162_v5 }
 0x520   : > { %v1948_v55 = vadd.f32 %v1947_v53, %v1946_v51  ;;  %v2572_v51 = vld [vmem:[%s3983_s7] ss:$0 sm:$0xff] (!%p2570_p12) }
 0x521   : > { %2800 = vmatmul.mubr.msk.bf16.vlgmr.msra.gmra.mrb[8].mxu0 %vm1633_vm12, %v1887_v54 }
 0x522   : > { %v1949_v56 = vrot.slane %v1948_v55, 1  ;;  %2807 = vmatprep.mubr.msk.bf16.mxu0 (!%p2570_p12), %vm3163_vm3, %v3162_v5  ;;  %2804 = vmatpush3.bf16.msra.mxu0 (!%p2570_p12), %v1964_v6 }
 0x523   : > { %2805 = vmatprep.subr.bf16.mxu0 (!%p2570_p12), %v3162_v5 }
 0x524   : > { %v1950_v14 = vadd.f32 %v1949_v56, %v1948_v55 }
 0x526   : > { %v1951_v58 = vadd.f32 %v1950_v14, %v1943_v57  ;;  %2806 = vmatpush3.bf16.msra.mxu0 (!%p2570_p12), %v1965_v8 }
 0x527   : > { %2912 = vmatprep.subr.bf16.mxu0 (!%p2570_p12), %v3164_v47 }
 0x528   : > { %1953 = vst.msk [vmem:[#allocation8] sm:$0x1] %vm1952_vm2, %v1951_v58 }
 0x5f1   : > { %1957 = sbr.rel (%p2570_p12) target bundleno = 2563 (0xa03), region = 124 }
 0x5f4   : > { %v1935_v60 = vpop.f32.mrb[8].mxu0 }
 0x5f5   : > { %v1941_v61 = vadd.f32 %v1935_v60, %v1878_v59  ;;  %v2801_v62 = vpop.f32.mrb[9].mxu0 }
 0x5f6   : > { %v1938_v63 = vpop.f32.mrb[10].mxu0 }
 0x5f7   : > { %1942 = vst.msk [vmem:[#allocation7] sm:$0xff] %vm1554_vm9, %v1941_v61  ;;  %v2802_v0 = vpop.f32.mrb[11].mxu0 }
 0x5fe   : > { %v1958_v9 = vld [vmem:[#allocation7] sm:$0xff] }
 0x5ff   : > { %v1963_v10 = vpack.c.bf16 %v1958_v9, %v1958_v9 }
 0x601   : > { %2808 = vmatmul.mubr.msk.bf16.vlgmr.msra.gmra.mrb[0].mxu0 %vm1554_vm9, %v1963_v10 }
 0x602   : > { %2831 = vmatprep.mubr.msk.f32.mxu0 %vm3163_vm3, %v3162_v5  ;;  %2914 = vmatpush3.bf16.msra.mxu0 %v2913_v46 }
 0x603   : > { %2915 = vmatprep.subr.bf16.mxu0 %v3164_v47 }
 0x606   : > { %2917 = vmatpush3.bf16.msra.mxu0 %v2916_v50 }
 0x607   : > { %2918 = vmatprep.subr.bf16.mxu0 %v3164_v47 }
 0x6d4   : > { %v2004_v26 = vpop.f32.mrb[0].mxu0 }
 0x6d5   : > { %v2005_v27 = vadd.f32 %v2004_v26, %v1966_v25  ;;  %v2809_v28 = vpop.f32.mrb[1].mxu0  ;;  %v2922_v25 = vpack.c.bf16 %v2119_v24, %v2118_v23  ;;  %v2106_v26 = vld [vmem:[#allocation8] sm:$0x1] }
 0x6d6   : > { %v2007_v29 = vpop.f32.mrb[2].mxu0  ;;  %v2287_v28 = vld [vmem:[%s3985_s5] sm:$0xff] }
 0x6d7   : > { %v2011_v30 = vand.u32 2147483647, %v2005_v27  ;;  %v2810_v31 = vpop.f32.mrb[3].mxu0  ;;  %v2010_v42 = vmax.f32 %v2005_v27, 0.0  ;;  %v2107_v27 = vmul.f32 0.0625, %v2106_v26  ;;  %v2288_v29 = vld [vmem:[%s3985_s5 + $0x8] sm:$0xff] }
 0x6d8   : > { %v2290_v31 = vld [vmem:[%s3985_s5 + $0x18] sm:$0xff] }
 0x6d9   : > { %v2012_v32 = vsub.f32 0.0, %v2011_v30  ;;  %v2925_v30 = vpack.c.bf16 %v2288_v29, %v2287_v28 }
 0x6db   : > { %v2013_v33 = vmul.f32 1.442695, %v2012_v32 }
 0x6dd   : > { %3020 = vpow2.f32 %v2013_v33  ;;  %v2291_v33 = vld [vmem:[%s3985_s5 + $0x20] sm:$0xff] }
 0x6e7   : > { %v3021_v34 = vpop.eup %3020 }
 0x6e8   : > { %v2015_v35 = vadd.f32 1.0, %v3021_v34  ;;  %v2018_v36 = vmul.f32 -0.5, %v3021_v34  ;;  %v2021_v38 = vand.u32 2147483647, %v3021_v34 }
 0x6ea   : > { %3022 = vlog2.f32 %v2015_v35  ;;  %v2019_v37 = vadd.f32 1.0, %v2018_v36  ;;  %vm2022_vm4 = vcmp.lt.f32.partialorder %v2021_v38, 0.0004427343  ;;  %v2293_v36 = vld [vmem:[%s3985_s5 + $0x30] sm:$0xff] }
 0x6ec   : > { %v2020_v41 = vmul.f32 %v3021_v34, %v2019_v37  ;;  %v2292_v34 = vld [vmem:[%s3985_s5 + $0x28] sm:$0xff]  ;;  %v2294_v37 = vld [vmem:[%s3985_s5 + $0x38] sm:$0xff] }
 0x6ed   : > { %v2931_v35 = vpack.c.bf16 %v2292_v34, %v2291_v33  ;;  %v2934_v38 = vpack.c.bf16 %v2294_v37, %v2293_v36 }
 0x6f4   : > { %v3023_v39 = vpop.eup %3022 }
 0x6f5   : > { %v2017_v40 = vmul.f32 0.6931472, %v3023_v39 }
 0x6f7   : > { %v2023_v43 = vsel %vm2022_vm4, %v2020_v41, %v2017_v40 }
 0x6f8   : > { %v2024_v44 = vadd.f32 %v2023_v43, %v2010_v42  ;;  %v2270_v42 = vld [vmem:[#allocation6] sm:$0x1] }
 0x6fa   : > { %v2025_v3 = vpack.c.bf16 %v2024_v44, %v2024_v44 }
 0x6fc   : > { %2820 = vmatmul.mubr.msk.bf16.vlgmr.msra.gmra.mrb[0].mxu1 %vm1809_vm0, %v2025_v3 }
 0x6fd   : > { %2861 = vmatprep.mubr.msk.f32.mxu1 %vm3163_vm3, %v3162_v5  ;;  %2926 = vmatpush3.bf16.msra.mxu1 %v2925_v30 }
 0x6fe   : > { %2927 = vmatprep.subr.bf16.mxu1 %v3164_v47 }
 0x7cf   : > { %v2082_v52 = vpop.f32.mrb[0].mxu1 }
 0x7d0   : > { %v2083_v53 = vadd.f32 %v2572_v51, %v2082_v52  ;;  %v2821_v54 = vpop.f32.mrb[1].mxu1 }
 0x7d1   : > { %v2085_v55 = vpop.f32.mrb[2].mxu1 }
 0x7d2   : > { %v2089_v56 = vand.u32 2147483647, %v2083_v53  ;;  %v2822_v57 = vpop.f32.mrb[3].mxu1  ;;  %v2088_v4 = vmax.f32 %v2083_v53, 0.0 }
 0x7d4   : > { %v2090_v14 = vsub.f32 0.0, %v2089_v56 }
 0x7d6   : > { %v2091_v58 = vmul.f32 1.442695, %v2090_v14  ;;  %v2295_v14 = vld [vmem:[%s3986_s1] sm:$0x1] }
 0x7d8   : > { %3024 = vpow2.f32 %v2091_v58 }
 0x7e2   : > { %v3025_v59 = vpop.eup %3024 }
 0x7e3   : > { %v2093_v60 = vadd.f32 1.0, %v3025_v59  ;;  %v2096_v61 = vmul.f32 -0.5, %v3025_v59  ;;  %v2099_v63 = vand.u32 2147483647, %v3025_v59 }
 0x7e5   : > { %3026 = vlog2.f32 %v2093_v60  ;;  %v2097_v62 = vadd.f32 1.0, %v2096_v61  ;;  %vm2100_vm5 = vcmp.lt.f32.partialorder %v2099_v63, 0.0004427343 }
 0x7e7   : > { %v2098_v2 = vmul.f32 %v3025_v59, %v2097_v62 }
 0x7ef   : > { %v3027_v0 = vpop.eup %3026 }
 0x7f0   : > { %v2095_v1 = vmul.f32 0.6931472, %v3027_v0 }
 0x7f2   : > { %v2101_v6 = vsel %vm2100_vm5, %v2098_v2, %v2095_v1 }
 0x7f3   : > { %v2102_v8 = vadd.f32 %v2101_v6, %v2088_v4 }
 0x7f5   : > { %v2104_v9 = vadd.f32 %v2103_v7, %v2102_v8  ;;  %v2108_v10 = vsel %vm1554_vm9, %v2102_v8, 0.0 }
 0x7f6   : > { %v2109_v13 = vrot.slane %v2108_v10, 4 }
 0x7f7   : > { %2105 = vst.msk [vmem:[#allocation14] sm:$0xff] %vm1554_vm9, %v2104_v9 }
 0x7f8   : > { %v2110_v15 = vadd.f32 %v2109_v13, %v2108_v10 }
 0x7fa   : > { %v2111_v16 = vrot.slane %v2110_v15, 2 }
 0x7fc   : > { %v2112_v17 = vadd.f32 %v2111_v16, %v2110_v15  ;;  %v2384_v15 = vld [vmem:[%s3987_s9] sm:$0x1] }
 0x7fe   : > { %v2113_v18 = vrot.slane %v2112_v17, 1 }
 0x800   : > { %v2114_v12 = vadd.f32 %v2113_v18, %v2112_v17 }
 0x802   : > { %v2115_v22 = vmul.f32 0.125, %v2114_v12 }
 0x804   : > { %2832 = vmatmul.mubr.msk.f32.vlgmr.msra.gmra.mrb[4].mxu0 %vm1554_vm9, %v2115_v22 }
 0x805   : > { %2920 = vmatpush3.bf16.msra.mxu0 %v2919_v21  ;;  %2842 = vmatprep.mubr.msk.f32.mxu0 %vm3163_vm3, %v3162_v5  ;;  %v2289_v5 = vld [vmem:[%s3985_s5 + $0x10] sm:$0xff] }
 0x806   : > { %2921 = vmatprep.subr.bf16.mxu0 %v3164_v47  ;;  %v2928_v32 = vpack.c.bf16 %v2290_v31, %v2289_v5 }
 0x808   : > { %2929 = vmatpush3.bf16.msra.mxu1 %v2928_v32 }
 0x809   : > { %2923 = vmatpush3.bf16.msra.mxu0 %v2922_v25  ;;  %2930 = vmatprep.subr.bf16.mxu1 %v3164_v47 }
 0x80c   : > { %2843 = vmatmul.mubr.msk.f32.vlgmr.msra.gmra.mrb[6].mxu0 %vm1554_vm9, %v2107_v27  ;;  %2932 = vmatpush3.bf16.msra.mxu1 %v2931_v35 }
 0x80d   : > { %2933 = vmatprep.subr.bf16.mxu1 %v3164_v47 }
 0x810   : > { %2935 = vmatpush3.bf16.msra.mxu1 %v2934_v38 }
 0x8d7   : > { %v2193_v39 = vpop.f32.mrb[4].mxu0 }
 0x8d8   : > { %v2833_v40 = vpop.f32.mrb[5].mxu0 }
 0x8df   : > { %v2266_v41 = vpop.f32.mrb[6].mxu0 }
 0x8e0   : > { %v2267_v43 = vadd.f32 %v2266_v41, %v2193_v39  ;;  %v2844_v44 = vpop.f32.mrb[7].mxu0 }
 0x8e2   : > { %v2271_v3 = vadd.f32 %v2270_v42, %v2267_v43 }
 0x8e4   : > { %v2273_v45 = vand.u32 2147483647, %v2271_v3  ;;  %v2272_v55 = vmax.f32 %v2271_v3, 0.0 }
 0x8e6   : > { %v2274_v11 = vsub.f32 0.0, %v2273_v45 }
 0x8e8   : > { %v2275_v46 = vmul.f32 1.442695, %v2274_v11 }
 0x8ea   : > { %3028 = vpow2.f32 %v2275_v46 }
 0x8f4   : > { %v3029_v47 = vpop.eup %3028 }
 0x8f5   : > { %v2277_v48 = vadd.f32 1.0, %v3029_v47  ;;  %v2280_v49 = vmul.f32 -0.5, %v3029_v47  ;;  %v2283_v51 = vand.u32 2147483647, %v3029_v47 }
 0x8f7   : > { %3030 = vlog2.f32 %v2277_v48  ;;  %v2281_v50 = vadd.f32 1.0, %v2280_v49  ;;  %vm2284_vm6 = vcmp.lt.f32.partialorder %v2283_v51, 0.0004427343 }
 0x8f9   : > { %v2282_v54 = vmul.f32 %v3029_v47, %v2281_v50 }
 0x901   : > { %v3031_v52 = vpop.eup %3030 }
 0x902   : > { %v2279_v53 = vmul.f32 0.6931472, %v3031_v52 }
 0x904   : > { %v2285_v56 = vsel %vm2284_vm6, %v2282_v54, %v2279_v53 }
 0x905   : > { %v2286_v57 = vadd.f32 %v2285_v56, %v2272_v55 }
 0x907   : > { %2862 = vmatmul.mubr.msk.f32.vlgmr.msra.gmra.mrb[4].mxu1 %vm1809_vm0, %v2286_v57 }
 0x9da   : > { %v2365_v58 = vpop.f32.mrb[4].mxu1 }
 0x9db   : > { %v2366_v59 = vadd.f32 %v2365_v58, %v2295_v14  ;;  %v2863_v60 = vpop.f32.mrb[5].mxu1 }
 0x9dd   : > { %v2370_v61 = vand.u32 2147483647, %v2366_v59  ;;  %v2369_v10 = vmax.f32 %v2366_v59, 0.0 }
 0x9df   : > { %v2371_v62 = vsub.f32 0.0, %v2370_v61 }
 0x9e1   : > { %v2372_v63 = vmul.f32 1.442695, %v2371_v62 }
 0x9e3   : > { %3032 = vpow2.f32 %v2372_v63 }
 0x9ed   : > { %v3033_v0 = vpop.eup %3032 }
 0x9ee   : > { %v2374_v1 = vadd.f32 1.0, %v3033_v0  ;;  %v2377_v2 = vmul.f32 -0.5, %v3033_v0  ;;  %v2380_v6 = vand.u32 2147483647, %v3033_v0 }
 0x9f0   : > { %3034 = vlog2.f32 %v2374_v1  ;;  %v2378_v4 = vadd.f32 1.0, %v2377_v2  ;;  %vm2381_vm7 = vcmp.lt.f32.partialorder %v2380_v6, 0.0004427343 }
 0x9f2   : > { %v2379_v9 = vmul.f32 %v3033_v0, %v2378_v4 }
 0x9fa   : > { %v3035_v7 = vpop.eup %3034 }
 0x9fb   : > { %v2376_v8 = vmul.f32 0.6931472, %v3035_v7 }
 0x9fd   : > { %v2382_v13 = vsel %vm2381_vm7, %v2379_v9, %v2376_v8 }
 0x9fe   : > { %v2383_v16 = vadd.f32 %v2382_v13, %v2369_v10 }
 0xa00   : > { %v2385_v17 = vadd.f32 %v2384_v15, %v2383_v16 }
 0xa02   : > { %2386 = vst.msk [vmem:[#allocation16] sm:$0x1] %vm1952_vm2, %v2385_v17 }
 0xa03 PF: > { %s3165_s23 = smov [#allocation14]   ;;  %s2578_s4 = sshll.u32 %s3324_s8, 7 }
 0xa04   : > { %s2412_s3 = sshll.u32 %s3165_s23, 4  ;;  %s3988_s29 = sld [smem:[#allocation41_spill]]  ;;  %s2413_s3 = int_to_ptr.vmem [resolvable:$true] %s2412_s3 }
 0xa05   : > { %s3036_s2 = scalar_lea.vmem %s2413_s3, 128  ;;  %p3043_p3 = scmp.lt.s32.totalorder %s2413_s3, %s2413_s3 }
 0xa06   : > { %p3037_p13 = scmp.ne.s32.totalorder %s2413_s3, %s3036_s2  ;;  %p3044_p4 = scmp.lt.s32.totalorder %s3036_s2, %s3036_s2 }
 0xa08   : > { %p3038_p0 = pnand %p3037_p13, %p583_p2  ;;  %p3045_p7 = por %p3044_p4, %p3043_p3 }
 0xa0a   : > { %s3807_s25 = scalar_lea.hbm %s3988_s29, %s2578_s4  ;;  %p3039_p1 = pneg %p3038_p0 }
 0xa0c   : > { %p3046_p8 = pnand %p3045_p7, %p3039_p1 }
 0xa0e   : > { %3049 = shalt.err (!%p3046_p8)
}
 0xa0f   : > { %s3989_s1 = sld [smem:[#allocation42_spill]] }
 0xa15   : > { %s3050_s28 = scalar_lea.hbm %s3989_s1, 128 }
 0xa16   : > { %p3051_p9 = scmp.ne.s32.totalorder %s3989_s1, %s3050_s28  ;;  %p3056_p12 = scmp.lt.u32.totalorder %s3050_s28, %s3989_s1 }
 0xa18   : > { %p3052_p10 = pnand %p3051_p9, %p583_p2 }
 0xa1a   : > { %p3053_p11 = pneg %p3052_p10 }
 0xa1c   : > { %p3058_p13 = pnand %p3056_p12, %p3053_p11 }
 0xa1e   : > { %3061 = shalt.err (!%p3058_p13)
}
 0xa1f   : > { %s3990_s2 = sld [smem:[#allocation20_spill]]  ;;  %s2401_s10 = sshll.u32 %s813_s22, 4  ;;  %s3829_s10 = int_to_ptr.vmem [resolvable:$true] %s2401_s10 }
 0xa20   : > { %2938 = dma.vmem_to_hbm [thread:$0]  (%p583_p2), %s2413_s3, 128, %s3989_s1, [#allocation15]  }
 0xa21   : > { %s3166_s0 = smov [#allocation16]   ;;  %s3062_s4 = scalar_lea.vmem %s3829_s10, 128 }
 0xa22   : > { %s3831_s28 = sshll.u32 %s3166_s0, 4  ;;  %p3063_p0 = scmp.ne.s32.totalorder %s3829_s10, %s3062_s4  ;;  %s2424_s28 = int_to_ptr.vmem [resolvable:$true] %s3831_s28 }
 0xa23   : > { %s3167_s30 = smov [#allocation12]  }
 0xa24   : > { %p3064_p1 = pnand %p3063_p0, %p3343_p5  ;;  %s3066_s27 = sshll.u32 %s3167_s30, 4  ;;  %s3067_s27 = int_to_ptr.vmem [resolvable:$false] %s3066_s27 }
 0xa25   : > { %s3992_s9 = sand.u32 1, %s3990_s2   ;;  %s3068_s6 = scalar_lea.vmem %s3067_s27, 256 }
 0xa26   : > { %s2388_s23 = scalar_lea.sflag [#allocation13], %s3992_s9  ;;  %p3065_p3 = pneg %p3064_p1 }
 0xa27   : > { %p3069_p4 = scmp.lt.s32.totalorder %s3829_s10, %s3067_s27  ;;  %p3070_p7 = scmp.lt.s32.totalorder %s3068_s6, %s3062_s4 }
 0xa29   : > { %p3071_p8 = por %p3070_p7, %p3069_p4 }
 0xa2b   : > { %p3072_p9 = pnand %p3071_p8, %p3065_p3 }
 0xa2d   : > { %3075 = shalt.err (!%p3072_p9)
}
 0xa2e   : > { %s3076_s22 = scalar_lea.hbm %s3807_s25, 128  ;;  %s3080_s0 = scalar_lea.hbm %s3988_s29, 256 }
 0xa2f   : > { %p3077_p10 = scmp.ne.s32.totalorder %s3807_s25, %s3076_s22  ;;  %p3081_p13 = scmp.lt.u32.totalorder %s3807_s25, %s3988_s29 }
 0xa30   : > { %p3082_p0 = scmp.lt.u32.totalorder %s3080_s0, %s3076_s22  ;;  %p3084_p3 = scmp.lt.u32.totalorder %s3076_s22, %s3807_s25 }
 0xa31   : > { %p3078_p11 = pnand %p3077_p10, %p3343_p5 }
 0xa32   : > { %p3083_p1 = por %p3082_p0, %p3081_p13 }
 0xa33   : > { %p3079_p12 = pneg %p3078_p11 }
 0xa34   : > { %p3085_p4 = por %p3084_p3, %p3083_p1 }
 0xa36   : > { %p3086_p7 = pnand %p3085_p4, %p3079_p12 }
 0xa38   : > { %3089 = shalt.err (!%p3086_p7)
}
 0xa39   : > { %2936 = dma.vmem_to_hbm [thread:$0]  (%p3343_p5), %s3829_s10, 128, %s3807_s25, %s2388_s23  }
 0xa3a   : > { %s3090_s4 = scalar_lea.vmem %s2424_s28, 16  ;;  %s3096_s27 = scalar_lea.vmem %s2424_s28, 32 }
 0xa3b   : > { %p3091_p8 = scmp.ne.s32.totalorder %s2424_s28, %s3090_s4  ;;  %p3097_p11 = scmp.lt.s32.totalorder %s2424_s28, %s2424_s28 }
 0xa3c   : > { %p3098_p13 = scmp.lt.s32.totalorder %s3096_s27, %s3090_s4 }
 0xa3d   : > { %p3092_p9 = pnand %p3091_p8, %p583_p2 }
 0xa3e   : > { %p3099_p0 = por %p3098_p13, %p3097_p11 }
 0xa3f   : > { %p3093_p10 = pneg %p3092_p9 }
 0xa41   : > { %p3100_p1 = pnand %p3099_p0, %p3093_p10 }
 0xa43   : > { %3103 = shalt.err (!%p3100_p1)
}
 0xa44   : > { %s3993_s7 = sld [smem:[#allocation43_spill]] }
 0xa4a   : > { %s3994_s2 = smov %s3993_s7  ;;  %s3104_s3 = scalar_lea.hbm %s3993_s7, 16 }
 0xa4b   : > { %p3105_p5 = scmp.ne.s32.totalorder %s3994_s2, %s3104_s3  ;;  %p3110_p4 = scmp.lt.u32.totalorder %s3104_s3, %s3994_s2 }
 0xa4d   : > { %p3106_p12 = pnand %p3105_p5, %p583_p2 }
 0xa4f   : > { %p3107_p3 = pneg %p3106_p12 }
 0xa51   : > { %p3112_p7 = pnand %p3110_p4, %p3107_p3 }
 0xa53   : > { %3115 = shalt.err (!%p3112_p7)
}
 0xa54   : > { %2940 = dma.vmem_to_hbm [thread:$0]  (%p583_p2), %s2424_s28, 16, %s3994_s2, [#allocation15]  }
 0xa55   : > { %3133 = dma.done.wait (%p583_p2), [#allocation15], 144  }
 0xa56   : > { %3135 = vsyncadd (%p583_p2), [#allocation15], 4294967152 }
 0xa57 PF: > { %s3995_s4 = sld [smem:[#allocation22_spill]]  ;;  %s3996_s27 = sld [smem:[#allocation19_spill]] }
 0xa5d   : > { %p2954_p8 = scmp.ge.s32.totalorder %s3995_s4, 2  ;;  %s2443_s22 = sand.u32 1, %s3996_s27  }
 0xa5e   : > { %s2444_s7 = scalar_lea.sflag [#allocation13], %s2443_s22 }
 0xa5f   : > { %p2947_p9 = pnand %p2954_p8, %p3347_p6 }
 0xa61   : > { %3137 = dma.done.wait (!%p2947_p9), %s2444_s7, 128  }
 0xa62   : > { %3139 = vsyncadd (!%p2947_p9), %s2444_s7, 4294967168  ;;  %s3998_s28 = sld [smem:[#allocation23_spill]]  ;;  %s3999_s27 = sld [smem:[#allocation20_spill]] }
 0xa63   : > { %s4000_s3 = sld [smem:[#allocation21_spill]]  ;;  %s4001_s7 = sld [smem:[#allocation24_spill]] }
 0xa68   : > { %p38_p10 = scmp.ge.s32.totalorder %s3998_s28, 4  }
 0xa6a   :  { %40 = sbr.rel (!%p38_p10) target bundleno = 22 (0x16), region = 184 }
 0xa71   :  { %2449 = vsyncpa [#allocation13], 1 }
 0xa72   :  { %2451 = vsyncpa [#allocation13 + $0x1], 1 }
 0xa73   :  { %2452 = vsyncpa [#allocation15], 1 }

// kernel: megnet_block_forward.1
= control target key start
LH: loop header
LB: loop body
LE: loop exit
PB: predicated region body
PF: predicated region fallthrough
CT: control target
= control target key end

     0   :  { %s3896_s0 = inlined_call_operand.vmem [shape: s32[16,1], index: 0, kind: input, shape index: {}]   ;;  %s3897_s1 = inlined_call_operand.vmem [shape: s32[16,1], index: 1, kind: input, shape index: {}]   ;;  %s3898_s2 = inlined_call_operand.vmem [shape: f32[16,1], index: 2, kind: input, shape index: {}]   ;;  %s3899_s3 = inlined_call_operand.vmem [shape: f32[16,32], index: 3, kind: input, shape index: {}]   ;;  %s3900_s4 = inlined_call_operand.vmem [shape: f32[8,32], index: 4, kind: input, shape index: {}]   ;;  %s3901_s5 = inlined_call_operand.vmem [shape: f32[1,32], index: 5, kind: input, shape index: {}]   ;;  %s3902_s6 = inlined_call_operand.vmem [shape: f32[32,32], index: 6, kind: input, shape index: {}]   ;;  %s3903_s7 = inlined_call_operand.vmem [shape: f32[1,32], index: 7, kind: input, shape index: {}]   ;;  %s3904_s8 = inlined_call_operand.vmem [shape: f32[32,32], index: 8, kind: input, shape index: {}]   ;;  %s3905_s9 = inlined_call_operand.vmem [shape: f32[1,32], index: 9, kind: input, shape index: {}]   ;;  %s3906_s10 = inlined_call_operand.vmem [shape: f32[32,32], index: 10, kind: input, shape index: {}]   ;;  %s3907_s11 = inlined_call_operand.vmem [shape: f32[1,32], index: 11, kind: input, shape index: {}]   ;;  %s3908_s12 = inlined_call_operand.vmem [shape: f32[128,64], index: 12, kind: input, shape index: {}]   ;;  %s3909_s13 = inlined_call_operand.vmem [shape: f32[1,64], index: 13, kind: input, shape index: {}]   ;;  %s3910_s14 = inlined_call_operand.vmem [shape: f32[64,32], index: 14, kind: input, shape index: {}]   ;;  %s3911_s15 = inlined_call_operand.vmem [shape: f32[1,32], index: 15, kind: input, shape index: {}]   ;;  %s3912_s16 = inlined_call_operand.vmem [shape: f32[96,64], index: 16, kind: input, shape index: {}]   ;;  %s3913_s17 = inlined_call_operand.vmem [shape: f32[1,64], index: 17, kind: input, shape index: {}]   ;;  %s3914_s18 = inlined_call_operand.vmem [shape: f32[64,32], index: 18, kind: input, shape index: {}]   ;;  %s3915_s19 = inlined_call_operand.vmem [shape: f32[1,32], index: 19, kind: input, shape index: {}]   ;;  %s3916_s20 = inlined_call_operand.vmem [shape: f32[96,64], index: 20, kind: input, shape index: {}]   ;;  %s3917_s21 = inlined_call_operand.vmem [shape: f32[1,64], index: 21, kind: input, shape index: {}]   ;;  %s3918_s22 = inlined_call_operand.vmem [shape: f32[64,32], index: 22, kind: input, shape index: {}]   ;;  %s3919_s23 = inlined_call_operand.vmem [shape: f32[1,32], index: 23, kind: input, shape index: {}]   ;;  %s3920_s24 = inlined_call_operand.hbm [shape: f32[16,32], index: 24, kind: output, shape index: {0}]   ;;  %s3921_s25 = inlined_call_operand.hbm [shape: f32[8,32], index: 25, kind: output, shape index: {1}]   ;;  %s3922_s26 = inlined_call_operand.hbm [shape: f32[1,32], index: 26, kind: output, shape index: {2}]  }
   0x1   :  { %3940 = sst [smem:[#allocation27_spill]] %s3896_s0 }
   0x2   :  { %3941 = sst [smem:[#allocation28_spill]] %s3897_s1 }
   0x3   :  { %3942 = sst [smem:[#allocation29_spill]] %s3898_s2 }
   0x4   :  { %3943 = sst [smem:[#allocation30_spill]] %s3899_s3 }
   0x5   :  { %3944 = sst [smem:[#allocation31_spill]] %s3900_s4 }
   0x6   :  { %3945 = sst [smem:[#allocation32_spill]] %s3901_s5 }
   0x7   :  { %3946 = sst [smem:[#allocation33_spill]] %s3902_s6 }
   0x8   :  { %3947 = sst [smem:[#allocation34_spill]] %s3903_s7 }
   0x9   :  { %3948 = sst [smem:[#allocation35_spill]] %s3904_s8 }
   0xa   :  { %3949 = sst [smem:[#allocation36_spill]] %s3905_s9 }
   0xb   :  { %3950 = sst [smem:[#allocation37_spill]] %s3906_s10 }
   0xc   :  { %3951 = sst [smem:[#allocation38_spill]] %s3915_s19 }
   0xd   :  { %3952 = sst [smem:[#allocation39_spill]] %s3918_s22 }
   0xe   :  { %3953 = sst [smem:[#allocation40_spill]] %s3919_s23 }
   0xf   :  { %3954 = sst [smem:[#allocation41_spill]] %s3920_s24 }
  0x10   :  { %3955 = sst [smem:[#allocation42_spill]] %s3921_s25 }
  0x11   :  { %3956 = sst [smem:[#allocation43_spill]] %s3922_s26 }
  0x12   :  { %32 = vsyncpa [#allocation13], 0 }
  0x13   :  { %34 = vsyncpa [#allocation13 + $0x1], 0 }
  0x14   :  { %35 = vsyncpa [#allocation15], 0  ;;  %s3303_s27 = smov 0   ;;  %s3305_s3 = smov 0  }
  0x15   :  { %s3307_s7 = smov 0   ;;  %s3309_s28 = smov 0  }
  0x16 LB: > { %3957 = sst [smem:[#allocation19_spill]] %s3142_s27  ;;  %s3324_s8 = sadd.s32 4294967295, %s3154_s28   ;;  %s3154_s28 = sphi %s3309_s28, %s3998_s28   ;;  %s3150_s7 = sphi %s3307_s7, %s4001_s7   ;;  %s3146_s3 = sphi %s3305_s3, %s4000_s3   ;;  %s3142_s27 = sphi %s3303_s27, %s3999_s27  }
  0x17   : > { %3958 = sst [smem:[#allocation20_spill]] %s3146_s3  ;;  %s2539_s4 = sadd.s32 4294967294, %s3154_s28  }
  0x18   : > { %3959 = sst [smem:[#allocation21_spill]] %s3150_s7  ;;  %s3328_s29 = sadd.s32 1, %s3154_s28  }
  0x19   : > { %3960 = sst [smem:[#allocation22_spill]] %s3154_s28  ;;  %s572_s0 = sadd.s32 1, %s3150_s7 }
  0x1a   : > { %3961 = sst [smem:[#allocation23_spill]] %s3328_s29  ;;  %s569_s9 = ssub.s32 %s3154_s28, %s3328_s29 }
  0x1b   : > { %p582_p0 = scmp.ne.s32.totalorder %s3150_s7, %s3146_s3  ;;  %p570_p1 = scmp.eq.s32.totalorder %s569_s9, 0 }
  0x1c   : > { %p583_p2 = scmp.eq.s32.totalorder %s3324_s8, 1  ;;  %p588_p3 = scmp.ne.s32.totalorder %s3146_s3, %s3142_s27 }
  0x1d   : > { %p589_p4 = scmp.eq.s32.totalorder %s2539_s4, 1  ;;  %p2542_p7 = scmp.ge.s32.totalorder %s3154_s28, 1 }
  0x1e   : > { %s3339_s30 = scalar_select %p570_p1, %s3150_s7, %s572_s0  }
  0x1f   : > { %p3343_p5 = por %p583_p2, %p582_p0  ;;  %p3347_p6 = por %p589_p4, %p588_p3 }
  0x20   : > { %3962 = sst [smem:[#allocation24_spill]] %s3339_s30  ;;  %p737_p8 = scmp.lt.s32.totalorder %s3154_s28, 3 }
  0x21   : > { %s3963_s2 = scalar_select %p3343_p5, 1, 0 }
  0x22   : > { %s3965_s5 = scalar_select %p3347_p6, 1, 0 }
  0x23   : > { %3964 = sst [smem:[#allocation25_spill]] %s3963_s2  ;;  %p738_p9 = pnand %p2542_p7, %p737_p8 }
  0x24   : > { %3966 = sst [smem:[#allocation26_spill]] %s3965_s5  ;;  %s3935_s10 = sand.u32 (!%p738_p9), 1, %s3146_s3  }
  0x25   : > { %741 = sbr.rel (%p738_p9) target bundleno = 2647 (0xa57), region = 116  ;;  %p818_p10 = scmp.lt.s32.totalorder (!%p738_p9), %s3324_s8, 1 }
  0x26   : > { %s3357_s6 = sshll.u32 (!%p738_p9), %s3935_s10, 3  ;;  %s3968_s27 = sld [smem:[#allocation28_spill]] (!%p738_p9) }
  0x27   : > { %s3969_s10 = sld [smem:[#allocation29_spill]] (!%p738_p9)  ;;  %s813_s22 = scalar_lea.vmem (!%p738_p9), [#allocation12], %s3357_s6 }
  0x28   : > { %p2548_p11 = scmp.ne.s32.totalorder (!%p738_p9), %s3324_s8, 0 }
  0x2c   : > { %s819_s1 = scalar_select %p818_p10, %s3324_s8, 1 }
  0x2d   : > { %s3971_s19 = sld [smem:[#allocation35_spill]] (!%p2548_p11)  ;;  %s3972_s26 = sld [smem:[#allocation37_spill]] (!%p2548_p11)  ;;  %v3156_v3 = vmov (!%p2548_p11), 0.0|0.0   ;;  %vm851_vm0 = vcmask (!%p2548_p11), 261120   ;;  %vm1541_vm1 = vcmask (!%p2548_p11), 253952   ;;  %vm3157_vm2 = vmmov (!%p2548_p11), 0  }
  0x2e   : > { %s3360_s4 = sshll.u32 %s819_s1, 3  ;;  %s3970_s1 = sld [smem:[#allocation30_spill]]  ;;  %2864 = vmatprep.subr.bf16.mxu0 (!%p2548_p11), %v3156_v3  ;;  %2870 = vmatprep.subr.bf16.mxu1 (!%p2548_p11), %v3156_v3  ;;  %v3158_v11 = vmov (!%p2548_p11), 0.0   ;;  %v1524_v20 = vld [vmem:[%s3910_s14] sm:$0xff] (!%p2548_p11)  ;;  %v1525_v21 = vld [vmem:[%s3910_s14 + $0x8] sm:$0xff] (!%p2548_p11)  ;;  %v1526_v22 = vld [vmem:[%s3910_s14 + $0x10] sm:$0xff] (!%p2548_p11) }
  0x2f   : > { %s825_s28 = scalar_lea.vmem %s3968_s27, %s3360_s4  ;;  %s829_s3 = scalar_lea.vmem %s3969_s10, %s3360_s4  ;;  %2677 = vmatprep.mubr.msk.f32.mxu0 (!%p2548_p11), %vm3157_vm2, %v3158_v11  ;;  %1540 = vst.msk [vmem:[#allocation7] sm:$0xff] (!%p2548_p11), %vm851_vm0, %v3158_v11  ;;  %2688 = vmatprep.mubr.msk.f32.mxu1 (!%p2548_p11), %vm3157_vm2, %v3158_v11  ;;  %v1527_v23 = vld [vmem:[%s3910_s14 + $0x18] sm:$0xff] (!%p2548_p11)  ;;  %v1528_v24 = vld [vmem:[%s3910_s14 + $0x20] sm:$0xff] (!%p2548_p11)  ;;  %v1529_v25 = vld [vmem:[%s3910_s14 + $0x28] sm:$0xff] (!%p2548_p11)  ;;  %v1532_v26 = vpack.c.bf16 (!%p2548_p11), %v1525_v21, %v1524_v20  ;;  %vm1434_vm5 = vcmask (!%p2548_p11), 523264   ;;  %vm1124_vm6 = vcmask (!%p2548_p11), 519168  }
  0x30   : > { %838 = sbr.rel (%p2548_p11) target bundleno = 543 (0x21f), region = 120  ;;  %s3973_s24 = sld [smem:[#allocation33_spill]] (!%p2548_p11)  ;;  %1542 = vst.msk [vmem:[#allocation8] sm:$0x1] (!%p2548_p11), %vm1541_vm1, %v3158_v11  ;;  %v1530_v27 = vld [vmem:[%s3910_s14 + $0x30] sm:$0xff] (!%p2548_p11)  ;;  %v1531_v28 = vld [vmem:[%s3910_s14 + $0x38] sm:$0xff] (!%p2548_p11)  ;;  %v1533_v29 = vpack.c.bf16 (!%p2548_p11), %v1527_v23, %v1526_v22  ;;  %v1534_v30 = vpack.c.bf16 (!%p2548_p11), %v1529_v25, %v1528_v24 }
  0x31   : > { %v1535_v31 = vpack.c.bf16 (!%p2548_p11), %v1531_v28, %v1530_v27  ;;  %1536 = vst.msk [vmem:[#allocation11] sm:$0xff] (!%p2548_p11), %vm851_vm0, %v1532_v26  ;;  %s3974_s5 = sld [smem:[#allocation31_spill]] (!%p2548_p11)  ;;  %v1034_v34 = vld [vmem:[%s3908_s12] sm:$0xff] (!%p2548_p11)  ;;  %v1035_v35 = vld [vmem:[%s3908_s12 + $0x8] sm:$0xff] (!%p2548_p11)  ;;  %v1036_v40 = vld [vmem:[%s3908_s12 + $0x10] sm:$0xff] (!%p2548_p11)  ;;  %vm1272_vm7 = vcmask (!%p2548_p11), 516096  }
  0x32   : > { %1537 = vst.msk [vmem:[#allocation11 + $0x8] sm:$0xff] (!%p2548_p11), %vm851_vm0, %v1533_v29  ;;  %1538 = vst.msk [vmem:[#allocation11 + $0x10] sm:$0xff] (!%p2548_p11), %vm851_vm0, %v1534_v30  ;;  %v1038_v36 = vld [vmem:[%s3908_s12 + $0x20] sm:$0xff] (!%p2548_p11)  ;;  %v2877_v37 = vpack.c.bf16 (!%p2548_p11), %v1035_v35, %v1034_v34  ;;  %v1039_v38 = vld [vmem:[%s3908_s12 + $0x28] sm:$0xff] (!%p2548_p11) }
  0x33   : > { %v840_v0 = vld [vmem:[%s3971_s19] sm:$0xff] (!%p2548_p11)  ;;  %v841_v1 = vld [vmem:[%s3971_s19 + $0x8] sm:$0xff] (!%p2548_p11)  ;;  %v842_v6 = vld [vmem:[%s3971_s19 + $0x10] sm:$0xff] (!%p2548_p11)  ;;  %1539 = vst.msk [vmem:[#allocation11 + $0x18] sm:$0xff] (!%p2548_p11), %vm851_vm0, %v1535_v31  ;;  %v2883_v39 = vpack.c.bf16 (!%p2548_p11), %v1039_v38, %v1038_v36 }
  0x34   : > { %s833_s23 = scalar_lea.vmem %s3970_s1, %s3360_s4  ;;  %v941_v2 = vld [vmem:[%s3972_s26] sm:$0xff] (!%p2548_p11)  ;;  %v2865_v4 = vpack.c.bf16 (!%p2548_p11), %v841_v1, %v840_v0  ;;  %v942_v5 = vld [vmem:[%s3972_s26 + $0x8] sm:$0xff] (!%p2548_p11)  ;;  %v843_v7 = vld [vmem:[%s3971_s19 + $0x18] sm:$0xff] (!%p2548_p11)  ;;  %s3975_s1 = sld [smem:[#allocation32_spill]] (!%p2548_p11) }
  0x35   : > { %v2871_v8 = vpack.c.bf16 (!%p2548_p11), %v942_v5, %v941_v2  ;;  %v943_v9 = vld [vmem:[%s3972_s26 + $0x10] sm:$0xff] (!%p2548_p11)  ;;  %v944_v10 = vld [vmem:[%s3972_s26 + $0x18] sm:$0xff] (!%p2548_p11)  ;;  %v2868_v13 = vpack.c.bf16 (!%p2548_p11), %v843_v7, %v842_v6  ;;  %v945_v47 = vld [vmem:[%s3907_s11] sm:$0x1] (!%p2548_p11) }
  0x36   : > { %v1512_v12 = vld [vmem:[%s3973_s24] sm:$0xff] (!%p2548_p11)  ;;  %2866 = vmatpush3.bf16.msra.mxu0 (!%p2548_p11), %v2865_v4  ;;  %v1513_v14 = vld [vmem:[%s3973_s24 + $0x8] sm:$0xff] (!%p2548_p11)  ;;  %v1514_v15 = vld [vmem:[%s3973_s24 + $0x10] sm:$0xff] (!%p2548_p11)  ;;  %v2874_v17 = vpack.c.bf16 (!%p2548_p11), %v944_v10, %v943_v9 }
  0x37   : > { %v1515_v16 = vld [vmem:[%s3973_s24 + $0x18] sm:$0xff]  ;;  %2872 = vmatpush3.bf16.msra.mxu1 %v2871_v8  ;;  %2867 = vmatprep.subr.bf16.mxu0 %v3156_v3  ;;  %v1516_v18 = vpack.c.bf16 %v1513_v14, %v1512_v12  ;;  %v839_v32 = vld [vmem:[%s3974_s5] sm:$0xff]  ;;  %v1040_v42 = vld [vmem:[%s3908_s12 + $0x30] sm:$0xff]  ;;  %s3976_s5 = sld [smem:[#allocation36_spill]] }
  0x38   : > { %v1517_v19 = vpack.c.bf16 %v1515_v16, %v1514_v15  ;;  %2873 = vmatprep.subr.bf16.mxu1 %v3156_v3  ;;  %v1037_v41 = vld [vmem:[%s3908_s12 + $0x18] sm:$0xff]  ;;  %v1046_v5 = vld [vmem:[%s3908_s12 + $0x60] sm:$0xff]  ;;  %v1047_v7 = vld [vmem:[%s3908_s12 + $0x68] sm:$0xff] }
  0x39   : > { %1518 = vst.msk [vmem:[#allocation9] sm:$0xff] %vm851_vm0, %v1516_v18  ;;  %v2880_v43 = vpack.c.bf16 %v1037_v41, %v1036_v40  ;;  %v1041_v44 = vld [vmem:[%s3908_s12 + $0x38] sm:$0xff]  ;;  %v1278_v8 = vld [vmem:[%s3912_s16 + $0x40] sm:$0xff]  ;;  %v1279_v9 = vld [vmem:[%s3912_s16 + $0x48] sm:$0xff] }
  0x3a   : > { %1519 = vst.msk [vmem:[#allocation9 + $0x8] sm:$0xff] %vm851_vm0, %v1517_v19  ;;  %2869 = vmatpush3.bf16.msra.mxu0 %v2868_v13  ;;  %v940_v33 = vld [vmem:[%s3975_s1] sm:$0x1]  ;;  %v2886_v45 = vpack.c.bf16 %v1041_v44, %v1040_v42  ;;  %v2895_v18 = vpack.c.bf16 %v1279_v9, %v1278_v8  ;;  %v1048_v19 = vld [vmem:[%s3908_s12 + $0x70] sm:$0xff]  ;;  %v1049_v22 = vld [vmem:[%s3908_s12 + $0x78] sm:$0xff] }
  0x3b   : > { %2875 = vmatpush3.bf16.msra.mxu1 %v2874_v17  ;;  %2876 = vmatprep.subr.bf16.mxu0 %v3156_v3  ;;  %v2889_v17 = vpack.c.bf16 %v1047_v7, %v1046_v5  ;;  %v1280_v23 = vld [vmem:[%s3912_s16 + $0x50] sm:$0xff]  ;;  %v1281_v24 = vld [vmem:[%s3912_s16 + $0x58] sm:$0xff]  ;;  %v2892_v27 = vpack.c.bf16 %v1049_v22, %v1048_v19  ;;  %v1274_v29 = vld [vmem:[%s3912_s16] sm:$0xff] }
  0x3c   : > { %2882 = vmatprep.subr.bf16.mxu1 %v3156_v3  ;;  %v2898_v28 = vpack.c.bf16 %v1281_v24, %v1280_v23  ;;  %v1275_v30 = vld [vmem:[%s3912_s16 + $0x8] sm:$0xff]  ;;  %v1436_v31 = vld [vmem:[%s3916_s20] sm:$0xff]  ;;  %v1438_v40 = vld [vmem:[%s3916_s20 + $0x10] sm:$0xff] }
  0x3d   : > { %2678 = vmatmul.mubr.msk.f32.vlgmr.msra.gmra.mrb[0].mxu0 %vm851_vm0, %v839_v32  ;;  %v2549_v46 = vld [vmem:[%s3976_s5] ss:$0 sm:$0xff]  ;;  %v1437_v32 = vld [vmem:[%s3916_s20 + $0x8] sm:$0xff]  ;;  %v2901_v35 = vpack.c.bf16 %v1275_v30, %v1274_v29  ;;  %v1439_v41 = vld [vmem:[%s3916_s20 + $0x18] sm:$0xff] }
  0x3e   : > { %2689 = vmatmul.mubr.msk.f32.vlgmr.msra.gmra.mrb[0].mxu1 %vm851_vm0, %v940_v33  ;;  %2699 = vmatprep.mubr.msk.f32.mxu0 %vm3157_vm2, %v3158_v11  ;;  %v2907_v36 = vpack.c.bf16 %v1437_v32, %v1436_v31  ;;  %v1042_v44 = vld [vmem:[%s3908_s12 + $0x40] sm:$0xff] }
  0x3f   : > { %2710 = vmatprep.mubr.msk.f32.mxu1 %vm3157_vm2, %v3158_v11  ;;  %2878 = vmatpush3.bf16.msra.mxu0 %v2877_v37  ;;  %v1276_v37 = vld [vmem:[%s3912_s16 + $0x10] sm:$0xff] }
  0x40   : > { %2884 = vmatpush3.bf16.msra.mxu1 %v2883_v39  ;;  %2879 = vmatprep.subr.bf16.mxu0 %v3156_v3  ;;  %v1277_v39 = vld [vmem:[%s3912_s16 + $0x18] sm:$0xff] }
  0x41   : > { %2885 = vmatprep.subr.bf16.mxu1 %v3156_v3  ;;  %v2904_v42 = vpack.c.bf16 %v1277_v39, %v1276_v37 }
  0x43   : > { %2881 = vmatpush3.bf16.msra.mxu0 %v2880_v43  ;;  %v2910_v43 = vpack.c.bf16 %v1439_v41, %v1438_v40 }
  0x44   : > { %2887 = vmatpush3.bf16.msra.mxu1 %v2886_v45  ;;  %2888 = vmatprep.subr.bf16.mxu0 %v3156_v3  ;;  %v1044_v45 = vld [vmem:[%s3908_s12 + $0x50] sm:$0xff] }
  0x45   : > { %2894 = vmatprep.subr.bf16.mxu1 %v3156_v3 }
 0x110   : > { %v921_v48 = vpop.f32.mrb[0].mxu0 }
 0x111   : > { %v922_v49 = vadd.f32 %v2549_v46, %v921_v48  ;;  %v1015_v50 = vpop.f32.mrb[0].mxu1  ;;  %v2679_v51 = vpop.f32.mrb[1].mxu0 }
 0x112   : > { %v3505_v52 = vadd.f32 %v1015_v50, %v945_v47  ;;  %v2690_v53 = vpop.f32.mrb[1].mxu1 }
 0x113   : > { %v926_v54 = vand.u32 2147483647, %v922_v49  ;;  %v925_v14 = vmax.f32 %v922_v49, 0.0 }
 0x114   : > { %v1020_v55 = vand.u32 2147483647, %v3505_v52  ;;  %v1019_v34 = vmax.f32 %v3505_v52, 0.0 }
 0x115   : > { %v927_v56 = vsub.f32 0.0, %v926_v54  ;;  %v1352_v54 = vlaneseq }
 0x116   : > { %v1021_v57 = vsub.f32 0.0, %v1020_v55  ;;  %v1198_v55 = vld [vmem:[%s3909_s13] sm:$0x1] }
 0x117   : > { %v928_v58 = vmul.f32 1.442695, %v927_v56  ;;  %v1353_v56 = vshrl.u32 %v1352_v54, 7 }
 0x118   : > { %v1022_v59 = vmul.f32 1.442695, %v1021_v57 }
 0x119   : > { %2998 = vpow2.f32 %v928_v58 }
 0x11a   : > { %3000 = vpow2.f32 %v1022_v59 }
 0x123   : > { %v2999_v60 = vpop.eup %2998 }
 0x124   : > { %v3001_v61 = vpop.eup %3000  ;;  %v930_v62 = vadd.f32 1.0, %v2999_v60  ;;  %v933_v0 = vmul.f32 -0.5, %v2999_v60  ;;  %v936_v2 = vand.u32 2147483647, %v2999_v60 }
 0x125   : > { %v1024_v63 = vadd.f32 1.0, %v3001_v61  ;;  %v1027_v4 = vmul.f32 -0.5, %v3001_v61  ;;  %v1030_v21 = vand.u32 2147483647, %v3001_v61 }
 0x126   : > { %3002 = vlog2.f32 %v930_v62  ;;  %v934_v1 = vadd.f32 1.0, %v933_v0  ;;  %vm937_vm3 = vcmp.lt.f32.partialorder %v936_v2, 0.0004427343  ;;  %v1354_v62 = vsub.s32 0, %v1353_v56  ;;  %v2557_v2 = vld [vmem:[%s3913_s17] ss:$0 sm:$0xff] }
 0x127   : > { %3004 = vlog2.f32 %v1024_v63  ;;  %v1028_v16 = vadd.f32 1.0, %v1027_v4  ;;  %vm1031_vm4 = vcmp.lt.f32.partialorder %v1030_v21, 0.0004427343  ;;  %v1440_v63 = vld [vmem:[%s3917_s21] sm:$0x1] }
 0x128   : > { %v935_v12 = vmul.f32 %v2999_v60, %v934_v1 }
 0x129   : > { %v1029_v26 = vmul.f32 %v3001_v61, %v1028_v16 }
 0x130   : > { %v3003_v6 = vpop.eup %3002 }
 0x131   : > { %v932_v10 = vmul.f32 0.6931472, %v3003_v6  ;;  %v3005_v13 = vpop.eup %3004 }
 0x132   : > { %v1026_v25 = vmul.f32 0.6931472, %v3005_v13 }
 0x133   : > { %v938_v15 = vsel %vm937_vm3, %v935_v12, %v932_v10 }
 0x134   : > { %v939_v20 = vadd.f32 %v938_v15, %v925_v14  ;;  %v1032_v33 = vsel %vm1031_vm4, %v1029_v26, %v1026_v25 }
 0x135   : > { %v1033_v38 = vadd.f32 %v1032_v33, %v1019_v34 }
 0x136   : > { %2700 = vmatmul.mubr.msk.f32.vlgmr.msra.gmra.mrb[2].mxu0 %vm851_vm0, %v939_v20  ;;  %2711 = vmatmul.mubr.msk.f32.vlgmr.msra.gmra.mrb[2].mxu1 %vm851_vm0, %v939_v20 }
 0x137   : > { %2890 = vmatpush3.bf16.msra.mxu0 %v2889_v17  ;;  %2896 = vmatpush3.bf16.msra.mxu1 %v2895_v18 }
 0x138   : > { %2891 = vmatprep.subr.bf16.mxu0 %v3156_v3  ;;  %2897 = vmatprep.subr.bf16.mxu1 %v3156_v3 }
 0x139   : > { %2721 = vmatprep.mubr.msk.f32.mxu0 %vm3157_vm2, %v3158_v11  ;;  %2732 = vmatprep.mubr.msk.f32.mxu1 %vm3157_vm2, %v3158_v11 }
 0x13b   : > { %2893 = vmatpush3.bf16.msra.mxu0 %v2892_v27  ;;  %2899 = vmatpush3.bf16.msra.mxu1 %v2898_v28 }
 0x13c   : > { %2900 = vmatprep.subr.bf16.mxu0 %v3156_v3  ;;  %2906 = vmatprep.subr.bf16.mxu1 %v3156_v3 }
 0x13e   : > { %2722 = vmatmul.mubr.msk.f32.vlgmr.msra.gmra.mrb[4].mxu0 %vm851_vm0, %v1033_v38  ;;  %2733 = vmatmul.mubr.msk.f32.vlgmr.msra.gmra.mrb[4].mxu1 %vm851_vm0, %v1033_v38 }
 0x13f   : > { %2902 = vmatpush3.bf16.msra.mxu0 %v2901_v35  ;;  %2908 = vmatpush3.bf16.msra.mxu1 %v2907_v36 }
 0x140   : > { %2903 = vmatprep.subr.bf16.mxu0 %v3156_v3  ;;  %2909 = vmatprep.subr.bf16.mxu1 %v3156_v3  ;;  %v1043_v3 = vld [vmem:[%s3908_s12 + $0x48] sm:$0xff] }
 0x141   : > { %2743 = vmatprep.mubr.msk.f32.mxu0 %vm3157_vm2, %v3158_v11  ;;  %2754 = vmatprep.mubr.msk.f32.mxu1 %vm3157_vm2, %v3158_v11  ;;  %v1045_v11 = vld [vmem:[%s3908_s12 + $0x58] sm:$0xff]  ;;  %v1520_v46 = vpack.c.bf16 %v1043_v3, %v1042_v44 }
 0x142   : > { %v1521_v47 = vpack.c.bf16 %v1045_v11, %v1044_v45 }
 0x143   : > { %2905 = vmatpush3.bf16.msra.mxu0 %v2904_v42  ;;  %2911 = vmatpush3.bf16.msra.mxu1 %v2910_v43  ;;  %1522 = vst.msk [vmem:[#allocation10] sm:$0xff] %vm1434_vm5, %v1520_v46 }
 0x144   : > { %1523 = vst.msk [vmem:[#allocation10 + $0x8] sm:$0xff] %vm1434_vm5, %v1521_v47 }
 0x146   : > { %2744 = vmatmul.mubr.msk.f32.vlgmr.msra.gmra.mrb[6].mxu0 %vm851_vm0, %v939_v20  ;;  %2755 = vmatmul.mubr.msk.f32.vlgmr.msra.gmra.mrb[6].mxu1 %vm851_vm0, %v1033_v38 }
 0x209   : > { %v1119_v48 = vpop.f32.mrb[2].mxu0  ;;  %v1192_v49 = vpop.f32.mrb[2].mxu1 }
 0x20a   : > { %v1123_v50 = vpack.c.bf16 %v1119_v48, %v1119_v48  ;;  %v1196_v51 = vpack.c.bf16 %v1192_v49, %v1192_v49  ;;  %v2701_v52 = vpop.f32.mrb[3].mxu0  ;;  %v2712_v53 = vpop.f32.mrb[3].mxu1 }
 0x20c   : > { %1125 = vst.msk [vmem:[#allocation2] sm:$0xf] %vm1124_vm6, %v1123_v50  ;;  %1197 = vst.msk [vmem:[#allocation3] sm:$0xf] %vm1124_vm6, %v1196_v51 }
 0x211   : > { %v1268_v57 = vpop.f32.mrb[4].mxu0  ;;  %v1348_v58 = vpop.f32.mrb[4].mxu1 }
 0x212   : > { %v1269_v59 = vadd.f32 %v1268_v57, %v1198_v55  ;;  %v2723_v60 = vpop.f32.mrb[5].mxu0  ;;  %v2734_v61 = vpop.f32.mrb[5].mxu1  ;;  %v1355_v0 = vrot.slane %v1348_v58, %v1354_v62 }
 0x214   : > { %1273 = vst.msk [vmem:[#allocation4] sm:$0x1] %vm1272_vm7, %v1269_v59 }
 0x219   : > { %v1422_v1 = vpop.f32.mrb[6].mxu0  ;;  %v1507_v4 = vpop.f32.mrb[6].mxu1 }
 0x21a   : > { %v1423_v5 = vadd.f32 %v1422_v1, %v1355_v0  ;;  %v1508_v6 = vadd.f32 %v1507_v4, %v1440_v63  ;;  %v2745_v7 = vpop.f32.mrb[7].mxu0  ;;  %v2756_v8 = vpop.f32.mrb[7].mxu1 }
 0x21c   : > { %v1433_v9 = vadd.f32 %v2557_v2, %v1423_v5  ;;  %1511 = vst.msk [vmem:[#allocation6] sm:$0x1] %vm1272_vm7, %v1508_v6 }
 0x21e   : > { %1435 = vst.msk [vmem:[#allocation5] sm:$0xff] %vm1434_vm5, %v1433_v9 }
 0x21f PF: > { %v1545_v10 = vld [vmem:[#allocation9] sm:$0xff]  ;;  %v3159_v12 = vmov 0.0   ;;  %vm3160_vm8 = vmmov 0   ;;  %v3161_v15 = vmov 0   ;;  %v1546_v17 = vld [vmem:[#allocation9 + $0x8] sm:$0xff]  ;;  %s3980_s0 = sld [smem:[#allocation27_spill]]  ;;  %v1613_v22 = vlaneseq }
 0x220   : > { %2757 = vmatprep.subr.bf16.mxu0 %v3159_v12  ;;  %2761 = vmatprep.mubr.msk.bf16.mxu0 %vm3160_vm8, %v3159_v12  ;;  %v1623_v13 = vld [vmem:[%s825_s28] sm:$0xff]  ;;  %vm1554_vm9 = vcmask 261120   ;;  %vm1637_vm10 = vcmask 1043456   ;;  %v1728_v23 = vld [vmem:[#allocation10] sm:$0xff]  ;;  %v1729_v25 = vld [vmem:[#allocation10 + $0x8] sm:$0xff]  ;;  %vm1633_vm12 = vcmask 64512  }
 0x221   : > { %2758 = vmatpush3.bf16.msra.mxu0 %v1545_v10  ;;  %v3616_v14 = vld [vmem:[%s833_s23] sm:$0xff]  ;;  %3006 = vset.pattern.permute.xlu0 %v3161_v15  ;;  %v1614_v24 = vand.u32 127, %v1613_v22  ;;  %v1800_v0 = vld [vmem:[#allocation11 + $0x10] sm:$0xff]  ;;  %v2566_v4 = vld [vmem:[#allocation4] ss:$0 sm:$0xff]  ;;  %vm1809_vm0 = vcmask 523264  }
 0x222   : > { %v1870_v16 = vld [vmem:[%s829_s3] sm:$0xff]  ;;  %2759 = vmatprep.subr.bf16.mxu0 %v3159_v12  ;;  %1625 = vperm.xlu0 %3006, %v1623_v13   ;;  %v1544_v19 = vpack.c.bf16 %v3616_v14, %v3616_v14  ;;  %v1801_v1 = vld [vmem:[#allocation11 + $0x18] sm:$0xff]  ;;  %vm1952_vm2 = vcmask 253952   ;;  %p2570_p12 = scmp.ne.s32.totalorder %s3324_s8, 1 }
 0x223   : > { %3007 = vset.pattern.permute.xlu1 %v3161_v15  ;;  %2765 = vmatprep.subr.bf16.mxu1 %v3159_v12  ;;  %v1632_v20 = vld [vmem:[#allocation3] sm:$0xf]  ;;  %v1631_v27 = vld [vmem:[#allocation2] sm:$0xf]  ;;  %vm3163_vm3 = vmmov (!%p2570_p12), 0   ;;  %s3983_s7 = sld [smem:[#allocation38_spill]] (!%p2570_p12) }
 0x224   : > { %1873 = vperm.xlu1 %3007, %v1870_v16   ;;  %2767 = vmatprep.mubr.msk.bf16.mxu1 %vm3160_vm8, %v3159_v12  ;;  %v1639_v21 = vsel %vm1637_vm10, %v1632_v20, 0  ;;  %v1685_v30 = vsel %vm1637_vm10, %v1631_v27, 0  ;;  %v1798_v62 = vld [vmem:[#allocation11] sm:$0xff]  ;;  %v1799_v63 = vld [vmem:[#allocation11 + $0x8] sm:$0xff]  ;;  %s3984_s28 = sld [smem:[#allocation31_spill]] (!%p2570_p12)  ;;  %s3986_s1 = sld [smem:[#allocation40_spill]] (!%p2570_p12) }
 0x225   : > { %s3981_s9 = scalar_lea.vmem %s3980_s0, %s3360_s4  ;;  %2760 = vmatpush3.bf16.msra.mxu0 %v1546_v17  ;;  %2766 = vmatpush3.bf16.msra.mxu1 %v1639_v21  ;;  %s3982_s4 = sld [smem:[#allocation34_spill]]  ;;  %v2567_v27 = vld [vmem:[%s3911_s15] ss:$0 sm:$0xff] }
 0x226   : > { %v1615_v18 = vld [vmem:[%s3981_s9] sm:$0xff]  ;;  %2777 = vmatprep.subr.bf16.mxu0 %v3159_v12  ;;  %2771 = vmatprep.subr.bf16.mxu1 %v3159_v12  ;;  %s3985_s5 = sld [smem:[#allocation39_spill]] (!%p2570_p12)  ;;  %s3987_s9 = sld [smem:[#allocation32_spill]] (!%p2570_p12) }
 0x227   : > { %1617 = vperm.xlu0 %3006, %v1615_v18  }
 0x228   : > { %2762 = vmatmul.mubr.msk.bf16.vlgmr.msra.gmra.mrb[0].mxu0 %vm1554_vm9, %v1544_v19 }
 0x229   : > { %2781 = vmatprep.mubr.msk.bf16.mxu0 %vm3160_vm8, %v3159_v12  ;;  %2778 = vmatpush3.bf16.msra.mxu0 %v1728_v23 }
 0x22a   : > { %2779 = vmatprep.subr.bf16.mxu0 %v3159_v12 }
 0x22b   : > { %v2559_v34 = vld [vmem:[%s3982_s4] ss:$0 sm:$0xff] }
 0x22d   : > { %2780 = vmatpush3.bf16.msra.mxu0 %v1729_v25 }
 0x22e   : > { %2797 = vmatprep.subr.bf16.mxu0 %v3159_v12 }
 0x2a1   : > { %v1626_v26 = vpop.permute.xlu0 %1625 }
 0x2a2   : > { %vm1627_vm11 = vcmp.eq.s32.totalorder %v1626_v26, %v1614_v24 }
 0x2a3   : > { %v2562_v28 = vsel %vm1627_vm11, 1.0, %v3159_v12 }
 0x2a4   : > { %v1630_v29 = vpack.c.bf16 %v2562_v28, %v2562_v28 }
 0x2a6   : > { %v1618_v31 = vpop.permute.xlu0 %1617  ;;  %2768 = vmatmul.mubr.msk.bf16.vlgmr.msra.gmra.mrb[0].mxu1 %vm1633_vm12, %v1630_v29  ;;  %1879 = vxpose.xlu1.c.b16.start.end [1/1] (short) (narrow) %v1630_v29, 16 }
 0x2a7   : > { %vm1619_vm13 = vcmp.eq.s32.totalorder %v1618_v31, %v1614_v24  ;;  %2772 = vmatpush3.bf16.msra.mxu1 %v1685_v30  ;;  %2773 = vmatprep.mubr.msk.bf16.mxu1 %vm3160_vm8, %v3159_v12 }
 0x2a8   : > { %v2561_v32 = vsel %vm1619_vm13, 1.0, %v3159_v12  ;;  %2785 = vmatprep.subr.bf16.mxu1 %v3159_v12 }
 0x2a9   : > { %v1622_v33 = vpack.c.bf16 %v2561_v32, %v2561_v32 }
 0x2ae   : > { %2774 = vmatmul.mubr.msk.bf16.vlgmr.msra.gmra.mrb[4].mxu1 %vm1633_vm12, %v1622_v33 }
 0x2af   : > { %2793 = vmatprep.mubr.msk.bf16.mxu1 %vm3160_vm8, %v3159_v12  ;;  %2786 = vmatpush3.bf16.msra.mxu1 %v1798_v62 }
 0x2b0   : > { %2787 = vmatprep.subr.bf16.mxu1 %v3159_v12 }
 0x2b3   : > { %2788 = vmatpush3.bf16.msra.mxu1 %v1799_v63 }
 0x2b4   : > { %2789 = vmatprep.subr.bf16.mxu1 %v3159_v12 }
 0x2b7   : > { %2790 = vmatpush3.bf16.msra.mxu1 %v1800_v0 }
 0x2b8   : > { %2791 = vmatprep.subr.bf16.mxu1 %v3159_v12 }
 0x2bb   : > { %2792 = vmatpush3.bf16.msra.mxu1 %v1801_v1  ;;  %v1959_v1 = vld [vmem:[%s3912_s16 + $0x20] sm:$0xff] (!%p2570_p12) }
 0x2fb   : > { %v1592_v35 = vpop.f32.mrb[0].mxu0 }
 0x2fc   : > { %v1593_v36 = vadd.f32 %v2559_v34, %v1592_v35  ;;  %v2763_v37 = vpop.f32.mrb[1].mxu0 }
 0x2fd   : > { %v1595_v38 = vpop.f32.mrb[2].mxu0 }
 0x2fe   : > { %v1599_v39 = vand.u32 2147483647, %v1593_v36  ;;  %v2764_v40 = vpop.f32.mrb[3].mxu0  ;;  %v1598_v49 = vmax.f32 %v1593_v36, 0.0 }
 0x300   : > { %v1600_v41 = vsub.f32 0.0, %v1599_v39 }
 0x302   : > { %v1601_v42 = vmul.f32 1.442695, %v1600_v41 }
 0x304   : > { %3008 = vpow2.f32 %v1601_v42 }
 0x30e   : > { %v3009_v43 = vpop.eup %3008 }
 0x30f   : > { %v1603_v44 = vadd.f32 1.0, %v3009_v43  ;;  %v1606_v3 = vmul.f32 -0.5, %v3009_v43  ;;  %v1609_v11 = vand.u32 2147483647, %v3009_v43 }
 0x311   : > { %3010 = vlog2.f32 %v1603_v44  ;;  %v1607_v45 = vadd.f32 1.0, %v1606_v3  ;;  %vm1610_vm14 = vcmp.lt.f32.partialorder %v1609_v11, 0.0004427343  ;;  %v1874_v11 = vpop.permute.xlu1 %1873 }
 0x313   : > { %v1608_v48 = vmul.f32 %v3009_v43, %v1607_v45 }
 0x31b   : > { %v3011_v46 = vpop.eup %3010 }
 0x31c   : > { %v1605_v47 = vmul.f32 0.6931472, %v3011_v46 }
 0x31e   : > { %v1611_v50 = vsel %vm1610_vm14, %v1608_v48, %v1605_v47 }
 0x31f   : > { %v1612_v51 = vadd.f32 %v1611_v50, %v1598_v49 }
 0x321   : > { %v1727_v52 = vpack.c.bf16 %v1612_v51, %v1612_v51 }
 0x323   : > { %2782 = vmatmul.mubr.msk.bf16.vlgmr.msra.gmra.mrb[4].mxu0 %vm1554_vm9, %v1727_v52 }
 0x324   : > { %2799 = vmatprep.mubr.msk.bf16.mxu0 %vm3160_vm8, %v3159_v12 }
 0x379   : > { %v1675_v53 = vpop.f32.mrb[0].mxu1 }
 0x37a   : > { %v2769_v54 = vpop.f32.mrb[1].mxu1 }
 0x37b   : > { %v1678_v55 = vpop.f32.mrb[2].mxu1  ;;  %v1887_v54 = vpop.trf.xlu1 }
 0x37c   : > { %v2770_v56 = vpop.f32.mrb[3].mxu1 }
 0x381   : > { %v1721_v57 = vpop.f32.mrb[4].mxu1 }
 0x382   : > { %v1722_v58 = vadd.f32 %v1721_v57, %v1675_v53  ;;  %v2775_v59 = vpop.f32.mrb[5].mxu1  ;;  %v1943_v57 = vld [vmem:[#allocation8] sm:$0x1] }
 0x383   : > { %v1724_v60 = vpop.f32.mrb[6].mxu1  ;;  %v1878_v59 = vld [vmem:[#allocation7] sm:$0xff] }
 0x384   : > { %v2776_v61 = vpop.f32.mrb[7].mxu1 }
 0x3f6   : > { %v1767_v2 = vpop.f32.mrb[4].mxu0 }
 0x3f7   : > { %v1773_v5 = vadd.f32 %v1767_v2, %v1722_v58  ;;  %v2783_v6 = vpop.f32.mrb[5].mxu0  ;;  %v1960_v2 = vld [vmem:[%s3912_s16 + $0x28] sm:$0xff] (!%p2570_p12) }
 0x3f8   : > { %v1770_v7 = vpop.f32.mrb[6].mxu0  ;;  %v1964_v6 = vpack.c.bf16 (!%p2570_p12), %v1960_v2, %v1959_v1 }
 0x3f9   : > { %v1781_v8 = vadd.f32 %v2566_v4, %v1773_v5  ;;  %v2784_v9 = vpop.f32.mrb[7].mxu0  ;;  %v1961_v4 = vld [vmem:[%s3912_s16 + $0x30] sm:$0xff] (!%p2570_p12)  ;;  %v3162_v5 = vmov (!%p2570_p12), 0.0   ;;  %v1962_v7 = vld [vmem:[%s3912_s16 + $0x38] sm:$0xff] (!%p2570_p12) }
 0x3fa   : > { %2811 = vmatprep.subr.bf16.mxu1 (!%p2570_p12), %v3162_v5 }
 0x3fb   : > { %v1783_v10 = vand.u32 2147483647, %v1781_v8  ;;  %v1782_v23 = vmax.f32 %v1781_v8, 0.0  ;;  %v1965_v8 = vpack.c.bf16 (!%p2570_p12), %v1962_v7, %v1961_v4  ;;  %v2103_v7 = vld [vmem:[%s3984_s28] sm:$0xff] (!%p2570_p12) }
 0x3fd   : > { %v1784_v13 = vsub.f32 0.0, %v1783_v10 }
 0x3ff   : > { %v1785_v15 = vmul.f32 1.442695, %v1784_v13  ;;  %v2026_v13 = vld [vmem:[%s3914_s18] sm:$0xff] (!%p2570_p12) }
 0x401   : > { %3012 = vpow2.f32 %v1785_v15  ;;  %v2027_v15 = vld [vmem:[%s3914_s18 + $0x8] sm:$0xff] (!%p2570_p12) }
 0x40b   : > { %v3013_v16 = vpop.eup %3012 }
 0x40c   : > { %v1787_v17 = vadd.f32 1.0, %v3013_v16  ;;  %v1790_v18 = vmul.f32 -0.5, %v3013_v16  ;;  %v1793_v20 = vand.u32 2147483647, %v3013_v16 }
 0x40e   : > { %3014 = vlog2.f32 %v1787_v17  ;;  %v1791_v19 = vadd.f32 1.0, %v1790_v18  ;;  %vm1794_vm15 = vcmp.lt.f32.partialorder %v1793_v20, 0.0004427343  ;;  %v2034_v17 = vpack.c.bf16 (!%p2570_p12), %v2027_v15, %v2026_v13  ;;  %v2029_v18 = vld [vmem:[%s3914_s18 + $0x18] sm:$0xff] (!%p2570_p12)  ;;  %v2030_v20 = vld [vmem:[%s3914_s18 + $0x20] sm:$0xff] (!%p2570_p12) }
 0x410   : > { %v1792_v22 = vmul.f32 %v3013_v16, %v1791_v19  ;;  %v2028_v16 = vld [vmem:[%s3914_s18 + $0x10] sm:$0xff] (!%p2570_p12) }
 0x411   : > { %v2035_v19 = vpack.c.bf16 (!%p2570_p12), %v2029_v18, %v2028_v16 }
 0x418   : > { %v3015_v12 = vpop.eup %3014 }
 0x419   : > { %v1789_v21 = vmul.f32 0.6931472, %v3015_v12  ;;  %v2031_v12 = vld [vmem:[%s3914_s18 + $0x28] sm:$0xff] (!%p2570_p12) }
 0x41b   : > { %v1795_v24 = vsel %vm1794_vm15, %v1792_v22, %v1789_v21  ;;  %v2036_v21 = vpack.c.bf16 (!%p2570_p12), %v2031_v12, %v2030_v20  ;;  %v2032_v22 = vld [vmem:[%s3914_s18 + $0x30] sm:$0xff] (!%p2570_p12)  ;;  %v2117_v20 = vld [vmem:[%s3916_s20 + $0x28] sm:$0xff] (!%p2570_p12) }
 0x41c   : > { %v1796_v25 = vadd.f32 %v1795_v24, %v1782_v23  ;;  %v2033_v23 = vld [vmem:[%s3914_s18 + $0x38] sm:$0xff] (!%p2570_p12) }
 0x41d   : > { %v2037_v24 = vpack.c.bf16 (!%p2570_p12), %v2033_v23, %v2032_v22  ;;  %v2118_v23 = vld [vmem:[%s3916_s20 + $0x30] sm:$0xff] (!%p2570_p12) }
 0x41e   : > { %v1797_v26 = vpack.c.bf16 %v1796_v25, %v1796_v25  ;;  %v1966_v25 = vld [vmem:[#allocation5] sm:$0xff] (!%p2570_p12) }
 0x420   : > { %2794 = vmatmul.mubr.msk.bf16.vlgmr.msra.gmra.mrb[8].mxu1 %vm1809_vm0, %v1797_v26 }
 0x421   : > { %2819 = vmatprep.mubr.msk.bf16.mxu1 (!%p2570_p12), %vm3163_vm3, %v3162_v5  ;;  %2812 = vmatpush3.bf16.msra.mxu1 (!%p2570_p12), %v2034_v17 }
 0x422   : > { %2813 = vmatprep.subr.bf16.mxu1 (!%p2570_p12), %v3162_v5 }
 0x425   : > { %2814 = vmatpush3.bf16.msra.mxu1 (!%p2570_p12), %v2035_v19  ;;  %v2116_v19 = vld [vmem:[%s3916_s20 + $0x20] sm:$0xff] (!%p2570_p12) }
 0x426   : > { %2815 = vmatprep.subr.bf16.mxu1 (!%p2570_p12), %v3162_v5 }
 0x429   : > { %2816 = vmatpush3.bf16.msra.mxu1 (!%p2570_p12), %v2036_v21  ;;  %v2919_v21 = vpack.c.bf16 (!%p2570_p12), %v2117_v20, %v2116_v19 }
 0x42a   : > { %2817 = vmatprep.subr.bf16.mxu1 (!%p2570_p12), %v3162_v5 }
 0x42d   : > { %2818 = vmatpush3.bf16.msra.mxu1 (!%p2570_p12), %v2037_v24  ;;  %v2119_v24 = vld [vmem:[%s3916_s20 + $0x38] sm:$0xff] (!%p2570_p12) }
 0x4f3   : > { %v1847_v28 = vpop.f32.mrb[8].mxu1 }
 0x4f4   : > { %v1848_v29 = vadd.f32 %v2567_v27, %v1847_v28  ;;  %v2795_v30 = vpop.f32.mrb[9].mxu1 }
 0x4f5   : > { %v1850_v31 = vpop.f32.mrb[10].mxu1 }
 0x4f6   : > { %v1854_v32 = vand.u32 2147483647, %v1848_v29  ;;  %v2796_v33 = vpop.f32.mrb[11].mxu1  ;;  %v1853_v44 = vmax.f32 %v1848_v29, 0.0 }
 0x4f8   : > { %v1855_v34 = vsub.f32 0.0, %v1854_v32 }
 0x4fa   : > { %v1856_v35 = vmul.f32 1.442695, %v1855_v34 }
 0x4fc   : > { %3016 = vpow2.f32 %v1856_v35 }
 0x506   : > { %v3017_v36 = vpop.eup %3016 }
 0x507   : > { %v1858_v37 = vadd.f32 1.0, %v3017_v36  ;;  %v1861_v38 = vmul.f32 -0.5, %v3017_v36  ;;  %v1864_v40 = vand.u32 2147483647, %v3017_v36 }
 0x509   : > { %3018 = vlog2.f32 %v1858_v37  ;;  %v1862_v39 = vadd.f32 1.0, %v1861_v38  ;;  %vm1865_vm1 = vcmp.lt.f32.partialorder %v1864_v40, 0.0004427343 }
 0x50b   : > { %v1863_v43 = vmul.f32 %v3017_v36, %v1862_v39 }
 0x513   : > { %v3019_v41 = vpop.eup %3018 }
 0x514   : > { %v1860_v42 = vmul.f32 0.6931472, %v3019_v41 }
 0x516   : > { %v1866_v3 = vsel %vm1865_vm1, %v1863_v43, %v1860_v42 }
 0x517   : > { %v1867_v45 = vadd.f32 %v1866_v3, %v1853_v44 }
 0x519   : > { %v1868_v46 = vadd.f32 %v1867_v45, %v3616_v14  ;;  %v1944_v47 = vsel %vm1554_vm9, %v1867_v45, 0.0  ;;  %v1876_v48 = vmul.f32 %v1874_v11, %v1867_v45  ;;  %v2120_v45 = vld [vmem:[%s3916_s20 + $0x40] sm:$0xff] (!%p2570_p12)  ;;  %v2121_v11 = vld [vmem:[%s3916_s20 + $0x48] sm:$0xff] (!%p2570_p12) }
 0x51a   : > { %v1945_v49 = vrot.slane %v1944_v47, 4 }
 0x51b   : > { %1869 = vst.msk [vmem:[%s813_s22] sm:$0xff] %vm1554_vm9, %v1868_v46  ;;  %v1877_v50 = vpack.c.bf16 %v1876_v48, %v1876_v48  ;;  %v2913_v46 = vpack.c.bf16 (!%p2570_p12), %v2121_v11, %v2120_v45  ;;  %v2122_v48 = vld [vmem:[%s3916_s20 + $0x50] sm:$0xff] (!%p2570_p12) }
 0x51c   : > { %v1946_v51 = vadd.f32 %v1945_v49, %v1944_v47  ;;  %v3164_v47 = vmov (!%p2570_p12), 0.0|0.0   ;;  %v2123_v49 = vld [vmem:[%s3916_s20 + $0x58] sm:$0xff] (!%p2570_p12) }
 0x51d   : > { %v1899_v52 = vsel %vm1637_vm10, %v1877_v50, 0  ;;  %2924 = vmatprep.subr.bf16.mxu1 (!%p2570_p12), %v3164_v47  ;;  %v2916_v50 = vpack.c.bf16 (!%p2570_p12), %v2123_v49, %v2122_v48 }
 0x51e   : > { %v1947_v53 = vrot.slane %v1946_v51, 2  ;;  %2798 = vmatpush3.bf16.msra.mxu0 %v1899_v52 }
 0x51f   : > { %2803 = vmatprep.subr.bf16.mxu0 (!%p2570_p12), %v3162_v5 }
 0x520   : > { %v1948_v55 = vadd.f32 %v1947_v53, %v1946_v51  ;;  %v2572_v51 = vld [vmem:[%s3983_s7] ss:$0 sm:$0xff] (!%p2570_p12) }
 0x521   : > { %2800 = vmatmul.mubr.msk.bf16.vlgmr.msra.gmra.mrb[8].mxu0 %vm1633_vm12, %v1887_v54 }
 0x522   : > { %v1949_v56 = vrot.slane %v1948_v55, 1  ;;  %2807 = vmatprep.mubr.msk.bf16.mxu0 (!%p2570_p12), %vm3163_vm3, %v3162_v5  ;;  %2804 = vmatpush3.bf16.msra.mxu0 (!%p2570_p12), %v1964_v6 }
 0x523   : > { %2805 = vmatprep.subr.bf16.mxu0 (!%p2570_p12), %v3162_v5 }
 0x524   : > { %v1950_v14 = vadd.f32 %v1949_v56, %v1948_v55 }
 0x526   : > { %v1951_v58 = vadd.f32 %v1950_v14, %v1943_v57  ;;  %2806 = vmatpush3.bf16.msra.mxu0 (!%p2570_p12), %v1965_v8 }
 0x527   : > { %2912 = vmatprep.subr.bf16.mxu0 (!%p2570_p12), %v3164_v47 }
 0x528   : > { %1953 = vst.msk [vmem:[#allocation8] sm:$0x1] %vm1952_vm2, %v1951_v58 }
 0x5f1   : > { %1957 = sbr.rel (%p2570_p12) target bundleno = 2563 (0xa03), region = 124 }
 0x5f4   : > { %v1935_v60 = vpop.f32.mrb[8].mxu0 }
 0x5f5   : > { %v1941_v61 = vadd.f32 %v1935_v60, %v1878_v59  ;;  %v2801_v62 = vpop.f32.mrb[9].mxu0 }
 0x5f6   : > { %v1938_v63 = vpop.f32.mrb[10].mxu0 }
 0x5f7   : > { %1942 = vst.msk [vmem:[#allocation7] sm:$0xff] %vm1554_vm9, %v1941_v61  ;;  %v2802_v0 = vpop.f32.mrb[11].mxu0 }
 0x5fe   : > { %v1958_v9 = vld [vmem:[#allocation7] sm:$0xff] }
 0x5ff   : > { %v1963_v10 = vpack.c.bf16 %v1958_v9, %v1958_v9 }
 0x601   : > { %2808 = vmatmul.mubr.msk.bf16.vlgmr.msra.gmra.mrb[0].mxu0 %vm1554_vm9, %v1963_v10 }
 0x602   : > { %2831 = vmatprep.mubr.msk.f32.mxu0 %vm3163_vm3, %v3162_v5  ;;  %2914 = vmatpush3.bf16.msra.mxu0 %v2913_v46 }
 0x603   : > { %2915 = vmatprep.subr.bf16.mxu0 %v3164_v47 }
 0x606   : > { %2917 = vmatpush3.bf16.msra.mxu0 %v2916_v50 }
 0x607   : > { %2918 = vmatprep.subr.bf16.mxu0 %v3164_v47 }
 0x6d4   : > { %v2004_v26 = vpop.f32.mrb[0].mxu0 }
 0x6d5   : > { %v2005_v27 = vadd.f32 %v2004_v26, %v1966_v25  ;;  %v2809_v28 = vpop.f32.mrb[1].mxu0  ;;  %v2922_v25 = vpack.c.bf16 %v2119_v24, %v2118_v23  ;;  %v2106_v26 = vld [vmem:[#allocation8] sm:$0x1] }
 0x6d6   : > { %v2007_v29 = vpop.f32.mrb[2].mxu0  ;;  %v2287_v28 = vld [vmem:[%s3985_s5] sm:$0xff] }
 0x6d7   : > { %v2011_v30 = vand.u32 2147483647, %v2005_v27  ;;  %v2810_v31 = vpop.f32.mrb[3].mxu0  ;;  %v2010_v42 = vmax.f32 %v2005_v27, 0.0  ;;  %v2107_v27 = vmul.f32 0.0625, %v2106_v26  ;;  %v2288_v29 = vld [vmem:[%s3985_s5 + $0x8] sm:$0xff] }
 0x6d8   : > { %v2290_v31 = vld [vmem:[%s3985_s5 + $0x18] sm:$0xff] }
 0x6d9   : > { %v2012_v32 = vsub.f32 0.0, %v2011_v30  ;;  %v2925_v30 = vpack.c.bf16 %v2288_v29, %v2287_v28 }
 0x6db   : > { %v2013_v33 = vmul.f32 1.442695, %v2012_v32 }
 0x6dd   : > { %3020 = vpow2.f32 %v2013_v33  ;;  %v2291_v33 = vld [vmem:[%s3985_s5 + $0x20] sm:$0xff] }
 0x6e7   : > { %v3021_v34 = vpop.eup %3020 }
 0x6e8   : > { %v2015_v35 = vadd.f32 1.0, %v3021_v34  ;;  %v2018_v36 = vmul.f32 -0.5, %v3021_v34  ;;  %v2021_v38 = vand.u32 2147483647, %v3021_v34 }
 0x6ea   : > { %3022 = vlog2.f32 %v2015_v35  ;;  %v2019_v37 = vadd.f32 1.0, %v2018_v36  ;;  %vm2022_vm4 = vcmp.lt.f32.partialorder %v2021_v38, 0.0004427343  ;;  %v2293_v36 = vld [vmem:[%s3985_s5 + $0x30] sm:$0xff] }
 0x6ec   : > { %v2020_v41 = vmul.f32 %v3021_v34, %v2019_v37  ;;  %v2292_v34 = vld [vmem:[%s3985_s5 + $0x28] sm:$0xff]  ;;  %v2294_v37 = vld [vmem:[%s3985_s5 + $0x38] sm:$0xff] }
 0x6ed   : > { %v2931_v35 = vpack.c.bf16 %v2292_v34, %v2291_v33  ;;  %v2934_v38 = vpack.c.bf16 %v2294_v37, %v2293_v36 }
 0x6f4   : > { %v3023_v39 = vpop.eup %3022 }
 0x6f5   : > { %v2017_v40 = vmul.f32 0.6931472, %v3023_v39 }
 0x6f7   : > { %v2023_v43 = vsel %vm2022_vm4, %v2020_v41, %v2017_v40 }
 0x6f8   : > { %v2024_v44 = vadd.f32 %v2023_v43, %v2010_v42  ;;  %v2270_v42 = vld [vmem:[#allocation6] sm:$0x1] }
 0x6fa   : > { %v2025_v3 = vpack.c.bf16 %v2024_v44, %v2024_v44 }
 0x6fc   : > { %2820 = vmatmul.mubr.msk.bf16.vlgmr.msra.gmra.mrb[0].mxu1 %vm1809_vm0, %v2025_v3 }
 0x6fd   : > { %2861 = vmatprep.mubr.msk.f32.mxu1 %vm3163_vm3, %v3162_v5  ;;  %2926 = vmatpush3.bf16.msra.mxu1 %v2925_v30 }
 0x6fe   : > { %2927 = vmatprep.subr.bf16.mxu1 %v3164_v47 }
 0x7cf   : > { %v2082_v52 = vpop.f32.mrb[0].mxu1 }
 0x7d0   : > { %v2083_v53 = vadd.f32 %v2572_v51, %v2082_v52  ;;  %v2821_v54 = vpop.f32.mrb[1].mxu1 }
 0x7d1   : > { %v2085_v55 = vpop.f32.mrb[2].mxu1 }
 0x7d2   : > { %v2089_v56 = vand.u32 2147483647, %v2083_v53  ;;  %v2822_v57 = vpop.f32.mrb[3].mxu1  ;;  %v2088_v4 = vmax.f32 %v2083_v53, 0.0 }
 0x7d4   : > { %v2090_v14 = vsub.f32 0.0, %v2089_v56 }
 0x7d6   : > { %v2091_v58 = vmul.f32 1.442695, %v2090_v14  ;;  %v2295_v14 = vld [vmem:[%s3986_s1] sm:$0x1] }
 0x7d8   : > { %3024 = vpow2.f32 %v2091_v58 }
 0x7e2   : > { %v3025_v59 = vpop.eup %3024 }
 0x7e3   : > { %v2093_v60 = vadd.f32 1.0, %v3025_v59  ;;  %v2096_v61 = vmul.f32 -0.5, %v3025_v59  ;;  %v2099_v63 = vand.u32 2147483647, %v3025_v59 }
 0x7e5   : > { %3026 = vlog2.f32 %v2093_v60  ;;  %v2097_v62 = vadd.f32 1.0, %v2096_v61  ;;  %vm2100_vm5 = vcmp.lt.f32.partialorder %v2099_v63, 0.0004427343 }
 0x7e7   : > { %v2098_v2 = vmul.f32 %v3025_v59, %v2097_v62 }
 0x7ef   : > { %v3027_v0 = vpop.eup %3026 }
 0x7f0   : > { %v2095_v1 = vmul.f32 0.6931472, %v3027_v0 }
 0x7f2   : > { %v2101_v6 = vsel %vm2100_vm5, %v2098_v2, %v2095_v1 }
 0x7f3   : > { %v2102_v8 = vadd.f32 %v2101_v6, %v2088_v4 }
 0x7f5   : > { %v2104_v9 = vadd.f32 %v2103_v7, %v2102_v8  ;;  %v2108_v10 = vsel %vm1554_vm9, %v2102_v8, 0.0 }
 0x7f6   : > { %v2109_v13 = vrot.slane %v2108_v10, 4 }
 0x7f7   : > { %2105 = vst.msk [vmem:[#allocation14] sm:$0xff] %vm1554_vm9, %v2104_v9 }
 0x7f8   : > { %v2110_v15 = vadd.f32 %v2109_v13, %v2108_v10 }
 0x7fa   : > { %v2111_v16 = vrot.slane %v2110_v15, 2 }
 0x7fc   : > { %v2112_v17 = vadd.f32 %v2111_v16, %v2110_v15  ;;  %v2384_v15 = vld [vmem:[%s3987_s9] sm:$0x1] }
 0x7fe   : > { %v2113_v18 = vrot.slane %v2112_v17, 1 }
 0x800   : > { %v2114_v12 = vadd.f32 %v2113_v18, %v2112_v17 }
 0x802   : > { %v2115_v22 = vmul.f32 0.125, %v2114_v12 }
 0x804   : > { %2832 = vmatmul.mubr.msk.f32.vlgmr.msra.gmra.mrb[4].mxu0 %vm1554_vm9, %v2115_v22 }
 0x805   : > { %2920 = vmatpush3.bf16.msra.mxu0 %v2919_v21  ;;  %2842 = vmatprep.mubr.msk.f32.mxu0 %vm3163_vm3, %v3162_v5  ;;  %v2289_v5 = vld [vmem:[%s3985_s5 + $0x10] sm:$0xff] }
 0x806   : > { %2921 = vmatprep.subr.bf16.mxu0 %v3164_v47  ;;  %v2928_v32 = vpack.c.bf16 %v2290_v31, %v2289_v5 }
 0x808   : > { %2929 = vmatpush3.bf16.msra.mxu1 %v2928_v32 }
 0x809   : > { %2923 = vmatpush3.bf16.msra.mxu0 %v2922_v25  ;;  %2930 = vmatprep.subr.bf16.mxu1 %v3164_v47 }
 0x80c   : > { %2843 = vmatmul.mubr.msk.f32.vlgmr.msra.gmra.mrb[6].mxu0 %vm1554_vm9, %v2107_v27  ;;  %2932 = vmatpush3.bf16.msra.mxu1 %v2931_v35 }
 0x80d   : > { %2933 = vmatprep.subr.bf16.mxu1 %v3164_v47 }
 0x810   : > { %2935 = vmatpush3.bf16.msra.mxu1 %v2934_v38 }
 0x8d7   : > { %v2193_v39 = vpop.f32.mrb[4].mxu0 }
 0x8d8   : > { %v2833_v40 = vpop.f32.mrb[5].mxu0 }
 0x8df   : > { %v2266_v41 = vpop.f32.mrb[6].mxu0 }
 0x8e0   : > { %v2267_v43 = vadd.f32 %v2266_v41, %v2193_v39  ;;  %v2844_v44 = vpop.f32.mrb[7].mxu0 }
 0x8e2   : > { %v2271_v3 = vadd.f32 %v2270_v42, %v2267_v43 }
 0x8e4   : > { %v2273_v45 = vand.u32 2147483647, %v2271_v3  ;;  %v2272_v55 = vmax.f32 %v2271_v3, 0.0 }
 0x8e6   : > { %v2274_v11 = vsub.f32 0.0, %v2273_v45 }
 0x8e8   : > { %v2275_v46 = vmul.f32 1.442695, %v2274_v11 }
 0x8ea   : > { %3028 = vpow2.f32 %v2275_v46 }
 0x8f4   : > { %v3029_v47 = vpop.eup %3028 }
 0x8f5   : > { %v2277_v48 = vadd.f32 1.0, %v3029_v47  ;;  %v2280_v49 = vmul.f32 -0.5, %v3029_v47  ;;  %v2283_v51 = vand.u32 2147483647, %v3029_v47 }
 0x8f7   : > { %3030 = vlog2.f32 %v2277_v48  ;;  %v2281_v50 = vadd.f32 1.0, %v2280_v49  ;;  %vm2284_vm6 = vcmp.lt.f32.partialorder %v2283_v51, 0.0004427343 }
 0x8f9   : > { %v2282_v54 = vmul.f32 %v3029_v47, %v2281_v50 }
 0x901   : > { %v3031_v52 = vpop.eup %3030 }
 0x902   : > { %v2279_v53 = vmul.f32 0.6931472, %v3031_v52 }
 0x904   : > { %v2285_v56 = vsel %vm2284_vm6, %v2282_v54, %v2279_v53 }
 0x905   : > { %v2286_v57 = vadd.f32 %v2285_v56, %v2272_v55 }
 0x907   : > { %2862 = vmatmul.mubr.msk.f32.vlgmr.msra.gmra.mrb[4].mxu1 %vm1809_vm0, %v2286_v57 }
 0x9da   : > { %v2365_v58 = vpop.f32.mrb[4].mxu1 }
 0x9db   : > { %v2366_v59 = vadd.f32 %v2365_v58, %v2295_v14  ;;  %v2863_v60 = vpop.f32.mrb[5].mxu1 }
 0x9dd   : > { %v2370_v61 = vand.u32 2147483647, %v2366_v59  ;;  %v2369_v10 = vmax.f32 %v2366_v59, 0.0 }
 0x9df   : > { %v2371_v62 = vsub.f32 0.0, %v2370_v61 }
 0x9e1   : > { %v2372_v63 = vmul.f32 1.442695, %v2371_v62 }
 0x9e3   : > { %3032 = vpow2.f32 %v2372_v63 }
 0x9ed   : > { %v3033_v0 = vpop.eup %3032 }
 0x9ee   : > { %v2374_v1 = vadd.f32 1.0, %v3033_v0  ;;  %v2377_v2 = vmul.f32 -0.5, %v3033_v0  ;;  %v2380_v6 = vand.u32 2147483647, %v3033_v0 }
 0x9f0   : > { %3034 = vlog2.f32 %v2374_v1  ;;  %v2378_v4 = vadd.f32 1.0, %v2377_v2  ;;  %vm2381_vm7 = vcmp.lt.f32.partialorder %v2380_v6, 0.0004427343 }
 0x9f2   : > { %v2379_v9 = vmul.f32 %v3033_v0, %v2378_v4 }
 0x9fa   : > { %v3035_v7 = vpop.eup %3034 }
 0x9fb   : > { %v2376_v8 = vmul.f32 0.6931472, %v3035_v7 }
 0x9fd   : > { %v2382_v13 = vsel %vm2381_vm7, %v2379_v9, %v2376_v8 }
 0x9fe   : > { %v2383_v16 = vadd.f32 %v2382_v13, %v2369_v10 }
 0xa00   : > { %v2385_v17 = vadd.f32 %v2384_v15, %v2383_v16 }
 0xa02   : > { %2386 = vst.msk [vmem:[#allocation16] sm:$0x1] %vm1952_vm2, %v2385_v17 }
 0xa03 PF: > { %s3165_s23 = smov [#allocation14]   ;;  %s2578_s4 = sshll.u32 %s3324_s8, 7 }
 0xa04   : > { %s2412_s3 = sshll.u32 %s3165_s23, 4  ;;  %s3988_s29 = sld [smem:[#allocation41_spill]]  ;;  %s2413_s3 = int_to_ptr.vmem [resolvable:$true] %s2412_s3 }
 0xa05   : > { %s3036_s2 = scalar_lea.vmem %s2413_s3, 128  ;;  %p3043_p3 = scmp.lt.s32.totalorder %s2413_s3, %s2413_s3 }
 0xa06   : > { %p3037_p13 = scmp.ne.s32.totalorder %s2413_s3, %s3036_s2  ;;  %p3044_p4 = scmp.lt.s32.totalorder %s3036_s2, %s3036_s2 }
 0xa08   : > { %p3038_p0 = pnand %p3037_p13, %p583_p2  ;;  %p3045_p7 = por %p3044_p4, %p3043_p3 }
 0xa0a   : > { %s3807_s25 = scalar_lea.hbm %s3988_s29, %s2578_s4  ;;  %p3039_p1 = pneg %p3038_p0 }
 0xa0c   : > { %p3046_p8 = pnand %p3045_p7, %p3039_p1 }
 0xa0e   : > { %3049 = shalt.err (!%p3046_p8)
}
 0xa0f   : > { %s3989_s1 = sld [smem:[#allocation42_spill]] }
 0xa15   : > { %s3050_s28 = scalar_lea.hbm %s3989_s1, 128 }
 0xa16   : > { %p3051_p9 = scmp.ne.s32.totalorder %s3989_s1, %s3050_s28  ;;  %p3056_p12 = scmp.lt.u32.totalorder %s3050_s28, %s3989_s1 }
 0xa18   : > { %p3052_p10 = pnand %p3051_p9, %p583_p2 }
 0xa1a   : > { %p3053_p11 = pneg %p3052_p10 }
 0xa1c   : > { %p3058_p13 = pnand %p3056_p12, %p3053_p11 }
 0xa1e   : > { %3061 = shalt.err (!%p3058_p13)
}
 0xa1f   : > { %s3990_s2 = sld [smem:[#allocation20_spill]]  ;;  %s2401_s10 = sshll.u32 %s813_s22, 4  ;;  %s3829_s10 = int_to_ptr.vmem [resolvable:$true] %s2401_s10 }
 0xa20   : > { %2938 = dma.vmem_to_hbm [thread:$0]  (%p583_p2), %s2413_s3, 128, %s3989_s1, [#allocation15]  }
 0xa21   : > { %s3166_s0 = smov [#allocation16]   ;;  %s3062_s4 = scalar_lea.vmem %s3829_s10, 128 }
 0xa22   : > { %s3831_s28 = sshll.u32 %s3166_s0, 4  ;;  %p3063_p0 = scmp.ne.s32.totalorder %s3829_s10, %s3062_s4  ;;  %s2424_s28 = int_to_ptr.vmem [resolvable:$true] %s3831_s28 }
 0xa23   : > { %s3167_s30 = smov [#allocation12]  }
 0xa24   : > { %p3064_p1 = pnand %p3063_p0, %p3343_p5  ;;  %s3066_s27 = sshll.u32 %s3167_s30, 4  ;;  %s3067_s27 = int_to_ptr.vmem [resolvable:$false] %s3066_s27 }
 0xa25   : > { %s3992_s9 = sand.u32 1, %s3990_s2   ;;  %s3068_s6 = scalar_lea.vmem %s3067_s27, 256 }
 0xa26   : > { %s2388_s23 = scalar_lea.sflag [#allocation13], %s3992_s9  ;;  %p3065_p3 = pneg %p3064_p1 }
 0xa27   : > { %p3069_p4 = scmp.lt.s32.totalorder %s3829_s10, %s3067_s27  ;;  %p3070_p7 = scmp.lt.s32.totalorder %s3068_s6, %s3062_s4 }
 0xa29   : > { %p3071_p8 = por %p3070_p7, %p3069_p4 }
 0xa2b   : > { %p3072_p9 = pnand %p3071_p8, %p3065_p3 }
 0xa2d   : > { %3075 = shalt.err (!%p3072_p9)
}
 0xa2e   : > { %s3076_s22 = scalar_lea.hbm %s3807_s25, 128  ;;  %s3080_s0 = scalar_lea.hbm %s3988_s29, 256 }
 0xa2f   : > { %p3077_p10 = scmp.ne.s32.totalorder %s3807_s25, %s3076_s22  ;;  %p3081_p13 = scmp.lt.u32.totalorder %s3807_s25, %s3988_s29 }
 0xa30   : > { %p3082_p0 = scmp.lt.u32.totalorder %s3080_s0, %s3076_s22  ;;  %p3084_p3 = scmp.lt.u32.totalorder %s3076_s22, %s3807_s25 }
 0xa31   : > { %p3078_p11 = pnand %p3077_p10, %p3343_p5 }
 0xa32   : > { %p3083_p1 = por %p3082_p0, %p3081_p13 }
 0xa33   : > { %p3079_p12 = pneg %p3078_p11 }
 0xa34   : > { %p3085_p4 = por %p3084_p3, %p3083_p1 }
 0xa36   : > { %p3086_p7 = pnand %p3085_p4, %p3079_p12 }
 0xa38   : > { %3089 = shalt.err (!%p3086_p7)
}
 0xa39   : > { %2936 = dma.vmem_to_hbm [thread:$0]  (%p3343_p5), %s3829_s10, 128, %s3807_s25, %s2388_s23  }
 0xa3a   : > { %s3090_s4 = scalar_lea.vmem %s2424_s28, 16  ;;  %s3096_s27 = scalar_lea.vmem %s2424_s28, 32 }
 0xa3b   : > { %p3091_p8 = scmp.ne.s32.totalorder %s2424_s28, %s3090_s4  ;;  %p3097_p11 = scmp.lt.s32.totalorder %s2424_s28, %s2424_s28 }
 0xa3c   : > { %p3098_p13 = scmp.lt.s32.totalorder %s3096_s27, %s3090_s4 }
 0xa3d   : > { %p3092_p9 = pnand %p3091_p8, %p583_p2 }
 0xa3e   : > { %p3099_p0 = por %p3098_p13, %p3097_p11 }
 0xa3f   : > { %p3093_p10 = pneg %p3092_p9 }
 0xa41   : > { %p3100_p1 = pnand %p3099_p0, %p3093_p10 }
 0xa43   : > { %3103 = shalt.err (!%p3100_p1)
}
 0xa44   : > { %s3993_s7 = sld [smem:[#allocation43_spill]] }
 0xa4a   : > { %s3994_s2 = smov %s3993_s7  ;;  %s3104_s3 = scalar_lea.hbm %s3993_s7, 16 }
 0xa4b   : > { %p3105_p5 = scmp.ne.s32.totalorder %s3994_s2, %s3104_s3  ;;  %p3110_p4 = scmp.lt.u32.totalorder %s3104_s3, %s3994_s2 }
 0xa4d   : > { %p3106_p12 = pnand %p3105_p5, %p583_p2 }
 0xa4f   : > { %p3107_p3 = pneg %p3106_p12 }
 0xa51   : > { %p3112_p7 = pnand %p3110_p4, %p3107_p3 }
 0xa53   : > { %3115 = shalt.err (!%p3112_p7)
}
 0xa54   : > { %2940 = dma.vmem_to_hbm [thread:$0]  (%p583_p2), %s2424_s28, 16, %s3994_s2, [#allocation15]  }
 0xa55   : > { %3133 = dma.done.wait (%p583_p2), [#allocation15], 144  }
 0xa56   : > { %3135 = vsyncadd (%p583_p2), [#allocation15], 4294967152 }
 0xa57 PF: > { %s3995_s4 = sld [smem:[#allocation22_spill]]  ;;  %s3996_s27 = sld [smem:[#allocation19_spill]] }
 0xa5d   : > { %p2954_p8 = scmp.ge.s32.totalorder %s3995_s4, 2  ;;  %s2443_s22 = sand.u32 1, %s3996_s27  }
 0xa5e   : > { %s2444_s7 = scalar_lea.sflag [#allocation13], %s2443_s22 }
 0xa5f   : > { %p2947_p9 = pnand %p2954_p8, %p3347_p6 }
 0xa61   : > { %3137 = dma.done.wait (!%p2947_p9), %s2444_s7, 128  }
 0xa62   : > { %3139 = vsyncadd (!%p2947_p9), %s2444_s7, 4294967168  ;;  %s3998_s28 = sld [smem:[#allocation23_spill]]  ;;  %s3999_s27 = sld [smem:[#allocation20_spill]] }
 0xa63   : > { %s4000_s3 = sld [smem:[#allocation21_spill]]  ;;  %s4001_s7 = sld [smem:[#allocation24_spill]] }
 0xa68   : > { %p38_p10 = scmp.ge.s32.totalorder %s3998_s28, 4  }
 0xa6a   :  { %40 = sbr.rel (!%p38_p10) target bundleno = 22 (0x16), region = 184 }
 0xa71   :  { %2449 = vsyncpa [#allocation13], 1 }
 0xa72   :  { %2451 = vsyncpa [#allocation13 + $0x1], 1 }
 0xa73   :  { %2452 = vsyncpa [#allocation15], 1 }

</bundles_post_ra>
